<compile_context>
chip_gen: v7x
topology: tpu7x:2x2x1
jax: 0.10.0
libtpu: 0.0.40
codegen_flags: <defaults>
</compile_context>

<pallas_src>
import math
import functools

import jax
import jax.numpy as jnp
from jax.experimental import pallas as pl
from jax.experimental.pallas import tpu as pltpu


def attn_kernel(x_ref, o_ref, *, scale, num_batches):
    # x_ref / o_ref: full (B*C, S, S) blocks resident in VMEM.
    def body(b, carry):
        x = x_ref[b]                                           # (S, S) f32
        # s = (x @ x^T) * scale; transpose folded into the contraction dims.
        s = jax.lax.dot_general(
            x, x,
            dimension_numbers=(((1,), (1,)), ((), ())),
            preferred_element_type=jnp.float32) * scale        # (S, S)
        m = jnp.max(s, axis=-1, keepdims=True)
        p = jnp.exp(s - m)
        denom = jnp.sum(p, axis=-1, keepdims=True)
        w = p / denom                                          # softmax(dim=-1), exact
        out = jnp.dot(w, x, preferred_element_type=jnp.float32)
        o_ref[b] = out.astype(o_ref.dtype)
        return carry

    jax.lax.fori_loop(0, num_batches, body, 0, unroll=True)


def model_forward(x1):
    B, C, S, S2 = x1.shape
    assert S == S2
    scale = 1.0 / math.sqrt(C)  # matches torch: / sqrt(k.size(1))
    BC = B * C
    xf = x1.reshape(BC, S, S)

    # Advisory cost estimate: two S^3 matmuls + softmax per batch element.
    flops = BC * (2 * 2 * S * S * S + 4 * S * S)
    transcendentals = BC * S * S                       # exp per score element
    bytes_accessed = 2 * BC * S * S * x1.dtype.itemsize

    out = pl.pallas_call(
        functools.partial(attn_kernel, scale=scale, num_batches=BC),
        out_shape=jax.ShapeDtypeStruct((BC, S, S), x1.dtype),
        grid=(1,),
        in_specs=[pl.BlockSpec((BC, S, S), lambda i: (0, 0, 0))],
        out_specs=pl.BlockSpec((BC, S, S), lambda i: (0, 0, 0)),
        compiler_params=pltpu.CompilerParams(
            dimension_semantics=("arbitrary",)),
        cost_estimate=pl.CostEstimate(
            flops=flops,
            transcendentals=transcendentals,
            bytes_accessed=bytes_accessed),
    )(xf)
    return out.reshape(B, C, S, S)


def model_forward_ref(x1):
    # Pure-JAX reference for verification.
    inv_scale = math.sqrt(x1.shape[1])
    s = jnp.matmul(x1, jnp.swapaxes(x1, -2, -1)) / inv_scale
    w = jax.nn.softmax(s, axis=-1)
    return jnp.matmul(w, x1)


if __name__ == "__main__":
    key = jax.random.PRNGKey(0)
    k_x, k_p = jax.random.split(key)

    # Deterministic input at the module's implied shape (5, 7, 6, 6).
    x1 = jax.random.normal(k_x, (5, 7, 6, 6), dtype=jnp.float32)

    # Unused module parameter `self.key` (7, 1, 17) — initialized for parity.
    _key_param = jax.random.normal(k_p, (7, 1, 17), dtype=jnp.float32)

    out = model_forward(x1)
    out = jax.block_until_ready(out)

    ref = model_forward_ref(x1)
    assert out.shape == (5, 7, 6, 6)
    assert jnp.allclose(out, ref, atol=1e-5, rtol=1e-5), "mismatch vs reference"

    print("KERNEL_OK")
</pallas_src>

<mosaic_0001>
module attributes {stable_mosaic.version = 11 : i64} {
  func.func @attn_kernel(%arg0: i32, %arg1: memref<35x6x6xf32, #tpu.memory_space<vmem>>, %arg2: memref<35x6x6xf32, #tpu.memory_space<vmem>>) attributes {dimension_semantics = [#tpu.dimension_semantics<arbitrary>], iteration_bounds = array<i64: 1>, scalar_prefetch = 0 : i64, scratch_operands = 0 : i64, tpu.core_type = #tpu.core_type<tc>, window_params = [{pipeline_mode = #tpu.pipeline_mode<synchronous>, transform_indices = @transform_0, window_bounds = array<i64: 35, 6, 6>}, {pipeline_mode = #tpu.pipeline_mode<synchronous>, transform_indices = @transform_1, window_bounds = array<i64: 35, 6, 6>}]} {
    %c0_i32 = arith.constant 0 : i32
    %0 = arith.index_cast %c0_i32 : i32 to index
    %c0 = arith.constant 0 : index
    %c0_0 = arith.constant 0 : index
    %1 = vector.load %arg1[%0, %c0, %c0_0] : memref<35x6x6xf32, #tpu.memory_space<vmem>>, vector<1x6x6xf32>
    %2 = vector.shape_cast %1 : vector<1x6x6xf32> to vector<6x6xf32>
    %cst = arith.constant dense<0.000000e+00> : vector<6x6xf32>
    %3 = tpu.matmul %2, %2, %cst {dimension_numbers = #tpu.dot_dimension_numbers<[1], [1], [0], [0], [0, 0, 1, 0], [], []>} : vector<6x6xf32>, vector<6x6xf32>, vector<6x6xf32> -> vector<6x6xf32>
    %cst_1 = arith.constant 0.377964467 : f32
    %4 = vector.broadcast %cst_1 : f32 to vector<6x6xf32>
    %5 = arith.mulf %3, %4 : vector<6x6xf32>
    %cst_2 = arith.constant dense<0xFF800000> : vector<6xf32>
    %6 = vector.multi_reduction <maximumf>, %5, %cst_2 [1] : vector<6x6xf32> to vector<6xf32>
    %7 = vector.shape_cast %6 : vector<6xf32> to vector<6x1xf32>
    %8 = vector.broadcast %7 : vector<6x1xf32> to vector<6x6xf32>
    %9 = arith.subf %5, %8 : vector<6x6xf32>
    %10 = math.exp %9 : vector<6x6xf32>
    %cst_3 = arith.constant dense<0.000000e+00> : vector<6xf32>
    %11 = vector.multi_reduction <add>, %10, %cst_3 [1] : vector<6x6xf32> to vector<6xf32>
    %12 = vector.shape_cast %11 : vector<6xf32> to vector<6x1xf32>
    %13 = vector.broadcast %12 : vector<6x1xf32> to vector<6x6xf32>
    %14 = arith.divf %10, %13 : vector<6x6xf32>
    %cst_4 = arith.constant dense<0.000000e+00> : vector<6x6xf32>
    %15 = tpu.matmul %14, %2, %cst_4 {dimension_numbers = #tpu.dot_dimension_numbers<[1], [0], [0], [1], [0, 0, 1, 1], [], []>} : vector<6x6xf32>, vector<6x6xf32>, vector<6x6xf32> -> vector<6x6xf32>
    %16 = arith.index_cast %c0_i32 : i32 to index
    %c0_5 = arith.constant 0 : index
    %c0_6 = arith.constant 0 : index
    %17 = vector.load %arg2[%16, %c0_5, %c0_6] : memref<35x6x6xf32, #tpu.memory_space<vmem>>, vector<1x6x6xf32>
    %18 = vector.shape_cast %17 : vector<1x6x6xf32> to vector<6x6xf32>
    %19 = vector.shape_cast %15 : vector<6x6xf32> to vector<1x6x6xf32>
    tpu.vector_store %arg2[%16, %c0_5, %c0_6], %19 {strides = array<i32>} : memref<35x6x6xf32, #tpu.memory_space<vmem>>, vector<1x6x6xf32>,
    %c1_i32 = arith.constant 1 : i32
    %20 = arith.index_cast %c1_i32 : i32 to index
    %c0_7 = arith.constant 0 : index
    %c0_8 = arith.constant 0 : index
    %21 = vector.load %arg1[%20, %c0_7, %c0_8] : memref<35x6x6xf32, #tpu.memory_space<vmem>>, vector<1x6x6xf32>
    %22 = vector.shape_cast %21 : vector<1x6x6xf32> to vector<6x6xf32>
    %cst_9 = arith.constant dense<0.000000e+00> : vector<6x6xf32>
    %23 = tpu.matmul %22, %22, %cst_9 {dimension_numbers = #tpu.dot_dimension_numbers<[1], [1], [0], [0], [0, 0, 1, 0], [], []>} : vector<6x6xf32>, vector<6x6xf32>, vector<6x6xf32> -> vector<6x6xf32>
    %cst_10 = arith.constant 0.377964467 : f32
    %24 = vector.broadcast %cst_10 : f32 to vector<6x6xf32>
    %25 = arith.mulf %23, %24 : vector<6x6xf32>
    %cst_11 = arith.constant dense<0xFF800000> : vector<6xf32>
    %26 = vector.multi_reduction <maximumf>, %25, %cst_11 [1] : vector<6x6xf32> to vector<6xf32>
    %27 = vector.shape_cast %26 : vector<6xf32> to vector<6x1xf32>
    %28 = vector.broadcast %27 : vector<6x1xf32> to vector<6x6xf32>
    %29 = arith.subf %25, %28 : vector<6x6xf32>
    %30 = math.exp %29 : vector<6x6xf32>
    %cst_12 = arith.constant dense<0.000000e+00> : vector<6xf32>
    %31 = vector.multi_reduction <add>, %30, %cst_12 [1] : vector<6x6xf32> to vector<6xf32>
    %32 = vector.shape_cast %31 : vector<6xf32> to vector<6x1xf32>
    %33 = vector.broadcast %32 : vector<6x1xf32> to vector<6x6xf32>
    %34 = arith.divf %30, %33 : vector<6x6xf32>
    %cst_13 = arith.constant dense<0.000000e+00> : vector<6x6xf32>
    %35 = tpu.matmul %34, %22, %cst_13 {dimension_numbers = #tpu.dot_dimension_numbers<[1], [0], [0], [1], [0, 0, 1, 1], [], []>} : vector<6x6xf32>, vector<6x6xf32>, vector<6x6xf32> -> vector<6x6xf32>
    %36 = arith.index_cast %c1_i32 : i32 to index
    %c0_14 = arith.constant 0 : index
    %c0_15 = arith.constant 0 : index
    %37 = vector.load %arg2[%36, %c0_14, %c0_15] : memref<35x6x6xf32, #tpu.memory_space<vmem>>, vector<1x6x6xf32>
    %38 = vector.shape_cast %37 : vector<1x6x6xf32> to vector<6x6xf32>
    %39 = vector.shape_cast %35 : vector<6x6xf32> to vector<1x6x6xf32>
    tpu.vector_store %arg2[%36, %c0_14, %c0_15], %39 {strides = array<i32>} : memref<35x6x6xf32, #tpu.memory_space<vmem>>, vector<1x6x6xf32>,
    %c2_i32 = arith.constant 2 : i32
    %40 = arith.index_cast %c2_i32 : i32 to index
    %c0_16 = arith.constant 0 : index
    %c0_17 = arith.constant 0 : index
    %41 = vector.load %arg1[%40, %c0_16, %c0_17] : memref<35x6x6xf32, #tpu.memory_space<vmem>>, vector<1x6x6xf32>
    %42 = vector.shape_cast %41 : vector<1x6x6xf32> to vector<6x6xf32>
    %cst_18 = arith.constant dense<0.000000e+00> : vector<6x6xf32>
    %43 = tpu.matmul %42, %42, %cst_18 {dimension_numbers = #tpu.dot_dimension_numbers<[1], [1], [0], [0], [0, 0, 1, 0], [], []>} : vector<6x6xf32>, vector<6x6xf32>, vector<6x6xf32> -> vector<6x6xf32>
    %cst_19 = arith.constant 0.377964467 : f32
    %44 = vector.broadcast %cst_19 : f32 to vector<6x6xf32>
    %45 = arith.mulf %43, %44 : vector<6x6xf32>
    %cst_20 = arith.constant dense<0xFF800000> : vector<6xf32>
    %46 = vector.multi_reduction <maximumf>, %45, %cst_20 [1] : vector<6x6xf32> to vector<6xf32>
    %47 = vector.shape_cast %46 : vector<6xf32> to vector<6x1xf32>
    %48 = vector.broadcast %47 : vector<6x1xf32> to vector<6x6xf32>
    %49 = arith.subf %45, %48 : vector<6x6xf32>
    %50 = math.exp %49 : vector<6x6xf32>
    %cst_21 = arith.constant dense<0.000000e+00> : vector<6xf32>
    %51 = vector.multi_reduction <add>, %50, %cst_21 [1] : vector<6x6xf32> to vector<6xf32>
    %52 = vector.shape_cast %51 : vector<6xf32> to vector<6x1xf32>
    %53 = vector.broadcast %52 : vector<6x1xf32> to vector<6x6xf32>
    %54 = arith.divf %50, %53 : vector<6x6xf32>
    %cst_22 = arith.constant dense<0.000000e+00> : vector<6x6xf32>
    %55 = tpu.matmul %54, %42, %cst_22 {dimension_numbers = #tpu.dot_dimension_numbers<[1], [0], [0], [1], [0, 0, 1, 1], [], []>} : vector<6x6xf32>, vector<6x6xf32>, vector<6x6xf32> -> vector<6x6xf32>
    %56 = arith.index_cast %c2_i32 : i32 to index
    %c0_23 = arith.constant 0 : index
    %c0_24 = arith.constant 0 : index
    %57 = vector.load %arg2[%56, %c0_23, %c0_24] : memref<35x6x6xf32, #tpu.memory_space<vmem>>, vector<1x6x6xf32>
    %58 = vector.shape_cast %57 : vector<1x6x6xf32> to vector<6x6xf32>
    %59 = vector.shape_cast %55 : vector<6x6xf32> to vector<1x6x6xf32>
    tpu.vector_store %arg2[%56, %c0_23, %c0_24], %59 {strides = array<i32>} : memref<35x6x6xf32, #tpu.memory_space<vmem>>, vector<1x6x6xf32>,
    %c3_i32 = arith.constant 3 : i32
    %60 = arith.index_cast %c3_i32 : i32 to index
    %c0_25 = arith.constant 0 : index
    %c0_26 = arith.constant 0 : index
    %61 = vector.load %arg1[%60, %c0_25, %c0_26] : memref<35x6x6xf32, #tpu.memory_space<vmem>>, vector<1x6x6xf32>
    %62 = vector.shape_cast %61 : vector<1x6x6xf32> to vector<6x6xf32>
    %cst_27 = arith.constant dense<0.000000e+00> : vector<6x6xf32>
    %63 = tpu.matmul %62, %62, %cst_27 {dimension_numbers = #tpu.dot_dimension_numbers<[1], [1], [0], [0], [0, 0, 1, 0], [], []>} : vector<6x6xf32>, vector<6x6xf32>, vector<6x6xf32> -> vector<6x6xf32>
    %cst_28 = arith.constant 0.377964467 : f32
    %64 = vector.broadcast %cst_28 : f32 to vector<6x6xf32>
    %65 = arith.mulf %63, %64 : vector<6x6xf32>
    %cst_29 = arith.constant dense<0xFF800000> : vector<6xf32>
    %66 = vector.multi_reduction <maximumf>, %65, %cst_29 [1] : vector<6x6xf32> to vector<6xf32>
    %67 = vector.shape_cast %66 : vector<6xf32> to vector<6x1xf32>
    %68 = vector.broadcast %67 : vector<6x1xf32> to vector<6x6xf32>
    %69 = arith.subf %65, %68 : vector<6x6xf32>
    %70 = math.exp %69 : vector<6x6xf32>
    %cst_30 = arith.constant dense<0.000000e+00> : vector<6xf32>
    %71 = vector.multi_reduction <add>, %70, %cst_30 [1] : vector<6x6xf32> to vector<6xf32>
    %72 = vector.shape_cast %71 : vector<6xf32> to vector<6x1xf32>
    %73 = vector.broadcast %72 : vector<6x1xf32> to vector<6x6xf32>
    %74 = arith.divf %70, %73 : vector<6x6xf32>
    %cst_31 = arith.constant dense<0.000000e+00> : vector<6x6xf32>
    %75 = tpu.matmul %74, %62, %cst_31 {dimension_numbers = #tpu.dot_dimension_numbers<[1], [0], [0], [1], [0, 0, 1, 1], [], []>} : vector<6x6xf32>, vector<6x6xf32>, vector<6x6xf32> -> vector<6x6xf32>
    %76 = arith.index_cast %c3_i32 : i32 to index
    %c0_32 = arith.constant 0 : index
    %c0_33 = arith.constant 0 : index
    %77 = vector.load %arg2[%76, %c0_32, %c0_33] : memref<35x6x6xf32, #tpu.memory_space<vmem>>, vector<1x6x6xf32>
    %78 = vector.shape_cast %77 : vector<1x6x6xf32> to vector<6x6xf32>
    %79 = vector.shape_cast %75 : vector<6x6xf32> to vector<1x6x6xf32>
    tpu.vector_store %arg2[%76, %c0_32, %c0_33], %79 {strides = array<i32>} : memref<35x6x6xf32, #tpu.memory_space<vmem>>, vector<1x6x6xf32>,
    %c4_i32 = arith.constant 4 : i32
    %80 = arith.index_cast %c4_i32 : i32 to index
    %c0_34 = arith.constant 0 : index
    %c0_35 = arith.constant 0 : index
    %81 = vector.load %arg1[%80, %c0_34, %c0_35] : memref<35x6x6xf32, #tpu.memory_space<vmem>>, vector<1x6x6xf32>
    %82 = vector.shape_cast %81 : vector<1x6x6xf32> to vector<6x6xf32>
    %cst_36 = arith.constant dense<0.000000e+00> : vector<6x6xf32>
    %83 = tpu.matmul %82, %82, %cst_36 {dimension_numbers = #tpu.dot_dimension_numbers<[1], [1], [0], [0], [0, 0, 1, 0], [], []>} : vector<6x6xf32>, vector<6x6xf32>, vector<6x6xf32> -> vector<6x6xf32>
    %cst_37 = arith.constant 0.377964467 : f32
    %84 = vector.broadcast %cst_37 : f32 to vector<6x6xf32>
    %85 = arith.mulf %83, %84 : vector<6x6xf32>
    %cst_38 = arith.constant dense<0xFF800000> : vector<6xf32>
    %86 = vector.multi_reduction <maximumf>, %85, %cst_38 [1] : vector<6x6xf32> to vector<6xf32>
    %87 = vector.shape_cast %86 : vector<6xf32> to vector<6x1xf32>
    %88 = vector.broadcast %87 : vector<6x1xf32> to vector<6x6xf32>
    %89 = arith.subf %85, %88 : vector<6x6xf32>
    %90 = math.exp %89 : vector<6x6xf32>
    %cst_39 = arith.constant dense<0.000000e+00> : vector<6xf32>
    %91 = vector.multi_reduction <add>, %90, %cst_39 [1] : vector<6x6xf32> to vector<6xf32>
    %92 = vector.shape_cast %91 : vector<6xf32> to vector<6x1xf32>
    %93 = vector.broadcast %92 : vector<6x1xf32> to vector<6x6xf32>
    %94 = arith.divf %90, %93 : vector<6x6xf32>
    %cst_40 = arith.constant dense<0.000000e+00> : vector<6x6xf32>
    %95 = tpu.matmul %94, %82, %cst_40 {dimension_numbers = #tpu.dot_dimension_numbers<[1], [0], [0], [1], [0, 0, 1, 1], [], []>} : vector<6x6xf32>, vector<6x6xf32>, vector<6x6xf32> -> vector<6x6xf32>
    %96 = arith.index_cast %c4_i32 : i32 to index
    %c0_41 = arith.constant 0 : index
    %c0_42 = arith.constant 0 : index
    %97 = vector.load %arg2[%96, %c0_41, %c0_42] : memref<35x6x6xf32, #tpu.memory_space<vmem>>, vector<1x6x6xf32>
    %98 = vector.shape_cast %97 : vector<1x6x6xf32> to vector<6x6xf32>
    %99 = vector.shape_cast %95 : vector<6x6xf32> to vector<1x6x6xf32>
    tpu.vector_store %arg2[%96, %c0_41, %c0_42], %99 {strides = array<i32>} : memref<35x6x6xf32, #tpu.memory_space<vmem>>, vector<1x6x6xf32>,
    %c5_i32 = arith.constant 5 : i32
    %100 = arith.index_cast %c5_i32 : i32 to index
    %c0_43 = arith.constant 0 : index
    %c0_44 = arith.constant 0 : index
    %101 = vector.load %arg1[%100, %c0_43, %c0_44] : memref<35x6x6xf32, #tpu.memory_space<vmem>>, vector<1x6x6xf32>
    %102 = vector.shape_cast %101 : vector<1x6x6xf32> to vector<6x6xf32>
    %cst_45 = arith.constant dense<0.000000e+00> : vector<6x6xf32>
    %103 = tpu.matmul %102, %102, %cst_45 {dimension_numbers = #tpu.dot_dimension_numbers<[1], [1], [0], [0], [0, 0, 1, 0], [], []>} : vector<6x6xf32>, vector<6x6xf32>, vector<6x6xf32> -> vector<6x6xf32>
    %cst_46 = arith.constant 0.377964467 : f32
    %104 = vector.broadcast %cst_46 : f32 to vector<6x6xf32>
    %105 = arith.mulf %103, %104 : vector<6x6xf32>
    %cst_47 = arith.constant dense<0xFF800000> : vector<6xf32>
    %106 = vector.multi_reduction <maximumf>, %105, %cst_47 [1] : vector<6x6xf32> to vector<6xf32>
    %107 = vector.shape_cast %106 : vector<6xf32> to vector<6x1xf32>
    %108 = vector.broadcast %107 : vector<6x1xf32> to vector<6x6xf32>
    %109 = arith.subf %105, %108 : vector<6x6xf32>
    %110 = math.exp %109 : vector<6x6xf32>
    %cst_48 = arith.constant dense<0.000000e+00> : vector<6xf32>
    %111 = vector.multi_reduction <add>, %110, %cst_48 [1] : vector<6x6xf32> to vector<6xf32>
    %112 = vector.shape_cast %111 : vector<6xf32> to vector<6x1xf32>
    %113 = vector.broadcast %112 : vector<6x1xf32> to vector<6x6xf32>
    %114 = arith.divf %110, %113 : vector<6x6xf32>
    %cst_49 = arith.constant dense<0.000000e+00> : vector<6x6xf32>
    %115 = tpu.matmul %114, %102, %cst_49 {dimension_numbers = #tpu.dot_dimension_numbers<[1], [0], [0], [1], [0, 0, 1, 1], [], []>} : vector<6x6xf32>, vector<6x6xf32>, vector<6x6xf32> -> vector<6x6xf32>
    %116 = arith.index_cast %c5_i32 : i32 to index
    %c0_50 = arith.constant 0 : index
    %c0_51 = arith.constant 0 : index
    %117 = vector.load %arg2[%116, %c0_50, %c0_51] : memref<35x6x6xf32, #tpu.memory_space<vmem>>, vector<1x6x6xf32>
    %118 = vector.shape_cast %117 : vector<1x6x6xf32> to vector<6x6xf32>
    %119 = vector.shape_cast %115 : vector<6x6xf32> to vector<1x6x6xf32>
    tpu.vector_store %arg2[%116, %c0_50, %c0_51], %119 {strides = array<i32>} : memref<35x6x6xf32, #tpu.memory_space<vmem>>, vector<1x6x6xf32>,
    %c6_i32 = arith.constant 6 : i32
    %120 = arith.index_cast %c6_i32 : i32 to index
    %c0_52 = arith.constant 0 : index
    %c0_53 = arith.constant 0 : index
    %121 = vector.load %arg1[%120, %c0_52, %c0_53] : memref<35x6x6xf32, #tpu.memory_space<vmem>>, vector<1x6x6xf32>
    %122 = vector.shape_cast %121 : vector<1x6x6xf32> to vector<6x6xf32>
    %cst_54 = arith.constant dense<0.000000e+00> : vector<6x6xf32>
    %123 = tpu.matmul %122, %122, %cst_54 {dimension_numbers = #tpu.dot_dimension_numbers<[1], [1], [0], [0], [0, 0, 1, 0], [], []>} : vector<6x6xf32>, vector<6x6xf32>, vector<6x6xf32> -> vector<6x6xf32>
    %cst_55 = arith.constant 0.377964467 : f32
    %124 = vector.broadcast %cst_55 : f32 to vector<6x6xf32>
    %125 = arith.mulf %123, %124 : vector<6x6xf32>
    %cst_56 = arith.constant dense<0xFF800000> : vector<6xf32>
    %126 = vector.multi_reduction <maximumf>, %125, %cst_56 [1] : vector<6x6xf32> to vector<6xf32>
    %127 = vector.shape_cast %126 : vector<6xf32> to vector<6x1xf32>
    %128 = vector.broadcast %127 : vector<6x1xf32> to vector<6x6xf32>
    %129 = arith.subf %125, %128 : vector<6x6xf32>
    %130 = math.exp %129 : vector<6x6xf32>
    %cst_57 = arith.constant dense<0.000000e+00> : vector<6xf32>
    %131 = vector.multi_reduction <add>, %130, %cst_57 [1] : vector<6x6xf32> to vector<6xf32>
    %132 = vector.shape_cast %131 : vector<6xf32> to vector<6x1xf32>
    %133 = vector.broadcast %132 : vector<6x1xf32> to vector<6x6xf32>
    %134 = arith.divf %130, %133 : vector<6x6xf32>
    %cst_58 = arith.constant dense<0.000000e+00> : vector<6x6xf32>
    %135 = tpu.matmul %134, %122, %cst_58 {dimension_numbers = #tpu.dot_dimension_numbers<[1], [0], [0], [1], [0, 0, 1, 1], [], []>} : vector<6x6xf32>, vector<6x6xf32>, vector<6x6xf32> -> vector<6x6xf32>
    %136 = arith.index_cast %c6_i32 : i32 to index
    %c0_59 = arith.constant 0 : index
    %c0_60 = arith.constant 0 : index
    %137 = vector.load %arg2[%136, %c0_59, %c0_60] : memref<35x6x6xf32, #tpu.memory_space<vmem>>, vector<1x6x6xf32>
    %138 = vector.shape_cast %137 : vector<1x6x6xf32> to vector<6x6xf32>
    %139 = vector.shape_cast %135 : vector<6x6xf32> to vector<1x6x6xf32>
    tpu.vector_store %arg2[%136, %c0_59, %c0_60], %139 {strides = array<i32>} : memref<35x6x6xf32, #tpu.memory_space<vmem>>, vector<1x6x6xf32>,
    %c7_i32 = arith.constant 7 : i32
    %140 = arith.index_cast %c7_i32 : i32 to index
    %c0_61 = arith.constant 0 : index
    %c0_62 = arith.constant 0 : index
    %141 = vector.load %arg1[%140, %c0_61, %c0_62] : memref<35x6x6xf32, #tpu.memory_space<vmem>>, vector<1x6x6xf32>
    %142 = vector.shape_cast %141 : vector<1x6x6xf32> to vector<6x6xf32>
    %cst_63 = arith.constant dense<0.000000e+00> : vector<6x6xf32>
    %143 = tpu.matmul %142, %142, %cst_63 {dimension_numbers = #tpu.dot_dimension_numbers<[1], [1], [0], [0], [0, 0, 1, 0], [], []>} : vector<6x6xf32>, vector<6x6xf32>, vector<6x6xf32> -> vector<6x6xf32>
    %cst_64 = arith.constant 0.377964467 : f32
    %144 = vector.broadcast %cst_64 : f32 to vector<6x6xf32>
    %145 = arith.mulf %143, %144 : vector<6x6xf32>
    %cst_65 = arith.constant dense<0xFF800000> : vector<6xf32>
    %146 = vector.multi_reduction <maximumf>, %145, %cst_65 [1] : vector<6x6xf32> to vector<6xf32>
    %147 = vector.shape_cast %146 : vector<6xf32> to vector<6x1xf32>
    %148 = vector.broadcast %147 : vector<6x1xf32> to vector<6x6xf32>
    %149 = arith.subf %145, %148 : vector<6x6xf32>
    %150 = math.exp %149 : vector<6x6xf32>
    %cst_66 = arith.constant dense<0.000000e+00> : vector<6xf32>
    %151 = vector.multi_reduction <add>, %150, %cst_66 [1] : vector<6x6xf32> to vector<6xf32>
    %152 = vector.shape_cast %151 : vector<6xf32> to vector<6x1xf32>
    %153 = vector.broadcast %152 : vector<6x1xf32> to vector<6x6xf32>
    %154 = arith.divf %150, %153 : vector<6x6xf32>
    %cst_67 = arith.constant dense<0.000000e+00> : vector<6x6xf32>
    %155 = tpu.matmul %154, %142, %cst_67 {dimension_numbers = #tpu.dot_dimension_numbers<[1], [0], [0], [1], [0, 0, 1, 1], [], []>} : vector<6x6xf32>, vector<6x6xf32>, vector<6x6xf32> -> vector<6x6xf32>
    %156 = arith.index_cast %c7_i32 : i32 to index
    %c0_68 = arith.constant 0 : index
    %c0_69 = arith.constant 0 : index
    %157 = vector.load %arg2[%156, %c0_68, %c0_69] : memref<35x6x6xf32, #tpu.memory_space<vmem>>, vector<1x6x6xf32>
    %158 = vector.shape_cast %157 : vector<1x6x6xf32> to vector<6x6xf32>
    %159 = vector.shape_cast %155 : vector<6x6xf32> to vector<1x6x6xf32>
    tpu.vector_store %arg2[%156, %c0_68, %c0_69], %159 {strides = array<i32>} : memref<35x6x6xf32, #tpu.memory_space<vmem>>, vector<1x6x6xf32>,
    %c8_i32 = arith.constant 8 : i32
    %160 = arith.index_cast %c8_i32 : i32 to index
    %c0_70 = arith.constant 0 : index
    %c0_71 = arith.constant 0 : index
    %161 = vector.load %arg1[%160, %c0_70, %c0_71] : memref<35x6x6xf32, #tpu.memory_space<vmem>>, vector<1x6x6xf32>
    %162 = vector.shape_cast %161 : vector<1x6x6xf32> to vector<6x6xf32>
    %cst_72 = arith.constant dense<0.000000e+00> : vector<6x6xf32>
    %163 = tpu.matmul %162, %162, %cst_72 {dimension_numbers = #tpu.dot_dimension_numbers<[1], [1], [0], [0], [0, 0, 1, 0], [], []>} : vector<6x6xf32>, vector<6x6xf32>, vector<6x6xf32> -> vector<6x6xf32>
    %cst_73 = arith.constant 0.377964467 : f32
    %164 = vector.broadcast %cst_73 : f32 to vector<6x6xf32>
    %165 = arith.mulf %163, %164 : vector<6x6xf32>
    %cst_74 = arith.constant dense<0xFF800000> : vector<6xf32>
    %166 = vector.multi_reduction <maximumf>, %165, %cst_74 [1] : vector<6x6xf32> to vector<6xf32>
    %167 = vector.shape_cast %166 : vector<6xf32> to vector<6x1xf32>
    %168 = vector.broadcast %167 : vector<6x1xf32> to vector<6x6xf32>
    %169 = arith.subf %165, %168 : vector<6x6xf32>
    %170 = math.exp %169 : vector<6x6xf32>
    %cst_75 = arith.constant dense<0.000000e+00> : vector<6xf32>
    %171 = vector.multi_reduction <add>, %170, %cst_75 [1] : vector<6x6xf32> to vector<6xf32>
    %172 = vector.shape_cast %171 : vector<6xf32> to vector<6x1xf32>
    %173 = vector.broadcast %172 : vector<6x1xf32> to vector<6x6xf32>
    %174 = arith.divf %170, %173 : vector<6x6xf32>
    %cst_76 = arith.constant dense<0.000000e+00> : vector<6x6xf32>
    %175 = tpu.matmul %174, %162, %cst_76 {dimension_numbers = #tpu.dot_dimension_numbers<[1], [0], [0], [1], [0, 0, 1, 1], [], []>} : vector<6x6xf32>, vector<6x6xf32>, vector<6x6xf32> -> vector<6x6xf32>
    %176 = arith.index_cast %c8_i32 : i32 to index
    %c0_77 = arith.constant 0 : index
    %c0_78 = arith.constant 0 : index
    %177 = vector.load %arg2[%176, %c0_77, %c0_78] : memref<35x6x6xf32, #tpu.memory_space<vmem>>, vector<1x6x6xf32>
    %178 = vector.shape_cast %177 : vector<1x6x6xf32> to vector<6x6xf32>
    %179 = vector.shape_cast %175 : vector<6x6xf32> to vector<1x6x6xf32>
    tpu.vector_store %arg2[%176, %c0_77, %c0_78], %179 {strides = array<i32>} : memref<35x6x6xf32, #tpu.memory_space<vmem>>, vector<1x6x6xf32>,
    %c9_i32 = arith.constant 9 : i32
    %180 = arith.index_cast %c9_i32 : i32 to index
    %c0_79 = arith.constant 0 : index
    %c0_80 = arith.constant 0 : index
    %181 = vector.load %arg1[%180, %c0_79, %c0_80] : memref<35x6x6xf32, #tpu.memory_space<vmem>>, vector<1x6x6xf32>
    %182 = vector.shape_cast %181 : vector<1x6x6xf32> to vector<6x6xf32>
    %cst_81 = arith.constant dense<0.000000e+00> : vector<6x6xf32>
    %183 = tpu.matmul %182, %182, %cst_81 {dimension_numbers = #tpu.dot_dimension_numbers<[1], [1], [0], [0], [0, 0, 1, 0], [], []>} : vector<6x6xf32>, vector<6x6xf32>, vector<6x6xf32> -> vector<6x6xf32>
    %cst_82 = arith.constant 0.377964467 : f32
    %184 = vector.broadcast %cst_82 : f32 to vector<6x6xf32>
    %185 = arith.mulf %183, %184 : vector<6x6xf32>
    %cst_83 = arith.constant dense<0xFF800000> : vector<6xf32>
    %186 = vector.multi_reduction <maximumf>, %185, %cst_83 [1] : vector<6x6xf32> to vector<6xf32>
    %187 = vector.shape_cast %186 : vector<6xf32> to vector<6x1xf32>
    %188 = vector.broadcast %187 : vector<6x1xf32> to vector<6x6xf32>
    %189 = arith.subf %185, %188 : vector<6x6xf32>
    %190 = math.exp %189 : vector<6x6xf32>
    %cst_84 = arith.constant dense<0.000000e+00> : vector<6xf32>
    %191 = vector.multi_reduction <add>, %190, %cst_84 [1] : vector<6x6xf32> to vector<6xf32>
    %192 = vector.shape_cast %191 : vector<6xf32> to vector<6x1xf32>
    %193 = vector.broadcast %192 : vector<6x1xf32> to vector<6x6xf32>
    %194 = arith.divf %190, %193 : vector<6x6xf32>
    %cst_85 = arith.constant dense<0.000000e+00> : vector<6x6xf32>
    %195 = tpu.matmul %194, %182, %cst_85 {dimension_numbers = #tpu.dot_dimension_numbers<[1], [0], [0], [1], [0, 0, 1, 1], [], []>} : vector<6x6xf32>, vector<6x6xf32>, vector<6x6xf32> -> vector<6x6xf32>
    %196 = arith.index_cast %c9_i32 : i32 to index
    %c0_86 = arith.constant 0 : index
    %c0_87 = arith.constant 0 : index
    %197 = vector.load %arg2[%196, %c0_86, %c0_87] : memref<35x6x6xf32, #tpu.memory_space<vmem>>, vector<1x6x6xf32>
    %198 = vector.shape_cast %197 : vector<1x6x6xf32> to vector<6x6xf32>
    %199 = vector.shape_cast %195 : vector<6x6xf32> to vector<1x6x6xf32>
    tpu.vector_store %arg2[%196, %c0_86, %c0_87], %199 {strides = array<i32>} : memref<35x6x6xf32, #tpu.memory_space<vmem>>, vector<1x6x6xf32>,
    %c10_i32 = arith.constant 10 : i32
    %200 = arith.index_cast %c10_i32 : i32 to index
    %c0_88 = arith.constant 0 : index
    %c0_89 = arith.constant 0 : index
    %201 = vector.load %arg1[%200, %c0_88, %c0_89] : memref<35x6x6xf32, #tpu.memory_space<vmem>>, vector<1x6x6xf32>
    %202 = vector.shape_cast %201 : vector<1x6x6xf32> to vector<6x6xf32>
    %cst_90 = arith.constant dense<0.000000e+00> : vector<6x6xf32>
    %203 = tpu.matmul %202, %202, %cst_90 {dimension_numbers = #tpu.dot_dimension_numbers<[1], [1], [0], [0], [0, 0, 1, 0], [], []>} : vector<6x6xf32>, vector<6x6xf32>, vector<6x6xf32> -> vector<6x6xf32>
    %cst_91 = arith.constant 0.377964467 : f32
    %204 = vector.broadcast %cst_91 : f32 to vector<6x6xf32>
    %205 = arith.mulf %203, %204 : vector<6x6xf32>
    %cst_92 = arith.constant dense<0xFF800000> : vector<6xf32>
    %206 = vector.multi_reduction <maximumf>, %205, %cst_92 [1] : vector<6x6xf32> to vector<6xf32>
    %207 = vector.shape_cast %206 : vector<6xf32> to vector<6x1xf32>
    %208 = vector.broadcast %207 : vector<6x1xf32> to vector<6x6xf32>
    %209 = arith.subf %205, %208 : vector<6x6xf32>
    %210 = math.exp %209 : vector<6x6xf32>
    %cst_93 = arith.constant dense<0.000000e+00> : vector<6xf32>
    %211 = vector.multi_reduction <add>, %210, %cst_93 [1] : vector<6x6xf32> to vector<6xf32>
    %212 = vector.shape_cast %211 : vector<6xf32> to vector<6x1xf32>
    %213 = vector.broadcast %212 : vector<6x1xf32> to vector<6x6xf32>
    %214 = arith.divf %210, %213 : vector<6x6xf32>
    %cst_94 = arith.constant dense<0.000000e+00> : vector<6x6xf32>
    %215 = tpu.matmul %214, %202, %cst_94 {dimension_numbers = #tpu.dot_dimension_numbers<[1], [0], [0], [1], [0, 0, 1, 1], [], []>} : vector<6x6xf32>, vector<6x6xf32>, vector<6x6xf32> -> vector<6x6xf32>
    %216 = arith.index_cast %c10_i32 : i32 to index
    %c0_95 = arith.constant 0 : index
    %c0_96 = arith.constant 0 : index
    %217 = vector.load %arg2[%216, %c0_95, %c0_96] : memref<35x6x6xf32, #tpu.memory_space<vmem>>, vector<1x6x6xf32>
    %218 = vector.shape_cast %217 : vector<1x6x6xf32> to vector<6x6xf32>
    %219 = vector.shape_cast %215 : vector<6x6xf32> to vector<1x6x6xf32>
    tpu.vector_store %arg2[%216, %c0_95, %c0_96], %219 {strides = array<i32>} : memref<35x6x6xf32, #tpu.memory_space<vmem>>, vector<1x6x6xf32>,
    %c11_i32 = arith.constant 11 : i32
    %220 = arith.index_cast %c11_i32 : i32 to index
    %c0_97 = arith.constant 0 : index
    %c0_98 = arith.constant 0 : index
    %221 = vector.load %arg1[%220, %c0_97, %c0_98] : memref<35x6x6xf32, #tpu.memory_space<vmem>>, vector<1x6x6xf32>
    %222 = vector.shape_cast %221 : vector<1x6x6xf32> to vector<6x6xf32>
    %cst_99 = arith.constant dense<0.000000e+00> : vector<6x6xf32>
    %223 = tpu.matmul %222, %222, %cst_99 {dimension_numbers = #tpu.dot_dimension_numbers<[1], [1], [0], [0], [0, 0, 1, 0], [], []>} : vector<6x6xf32>, vector<6x6xf32>, vector<6x6xf32> -> vector<6x6xf32>
    %cst_100 = arith.constant 0.377964467 : f32
    %224 = vector.broadcast %cst_100 : f32 to vector<6x6xf32>
    %225 = arith.mulf %223, %224 : vector<6x6xf32>
    %cst_101 = arith.constant dense<0xFF800000> : vector<6xf32>
    %226 = vector.multi_reduction <maximumf>, %225, %cst_101 [1] : vector<6x6xf32> to vector<6xf32>
    %227 = vector.shape_cast %226 : vector<6xf32> to vector<6x1xf32>
    %228 = vector.broadcast %227 : vector<6x1xf32> to vector<6x6xf32>
    %229 = arith.subf %225, %228 : vector<6x6xf32>
    %230 = math.exp %229 : vector<6x6xf32>
    %cst_102 = arith.constant dense<0.000000e+00> : vector<6xf32>
    %231 = vector.multi_reduction <add>, %230, %cst_102 [1] : vector<6x6xf32> to vector<6xf32>
    %232 = vector.shape_cast %231 : vector<6xf32> to vector<6x1xf32>
    %233 = vector.broadcast %232 : vector<6x1xf32> to vector<6x6xf32>
    %234 = arith.divf %230, %233 : vector<6x6xf32>
    %cst_103 = arith.constant dense<0.000000e+00> : vector<6x6xf32>
    %235 = tpu.matmul %234, %222, %cst_103 {dimension_numbers = #tpu.dot_dimension_numbers<[1], [0], [0], [1], [0, 0, 1, 1], [], []>} : vector<6x6xf32>, vector<6x6xf32>, vector<6x6xf32> -> vector<6x6xf32>
    %236 = arith.index_cast %c11_i32 : i32 to index
    %c0_104 = arith.constant 0 : index
    %c0_105 = arith.constant 0 : index
    %237 = vector.load %arg2[%236, %c0_104, %c0_105] : memref<35x6x6xf32, #tpu.memory_space<vmem>>, vector<1x6x6xf32>
    %238 = vector.shape_cast %237 : vector<1x6x6xf32> to vector<6x6xf32>
    %239 = vector.shape_cast %235 : vector<6x6xf32> to vector<1x6x6xf32>
    tpu.vector_store %arg2[%236, %c0_104, %c0_105], %239 {strides = array<i32>} : memref<35x6x6xf32, #tpu.memory_space<vmem>>, vector<1x6x6xf32>,
    %c12_i32 = arith.constant 12 : i32
    %240 = arith.index_cast %c12_i32 : i32 to index
    %c0_106 = arith.constant 0 : index
    %c0_107 = arith.constant 0 : index
    %241 = vector.load %arg1[%240, %c0_106, %c0_107] : memref<35x6x6xf32, #tpu.memory_space<vmem>>, vector<1x6x6xf32>
    %242 = vector.shape_cast %241 : vector<1x6x6xf32> to vector<6x6xf32>
    %cst_108 = arith.constant dense<0.000000e+00> : vector<6x6xf32>
    %243 = tpu.matmul %242, %242, %cst_108 {dimension_numbers = #tpu.dot_dimension_numbers<[1], [1], [0], [0], [0, 0, 1, 0], [], []>} : vector<6x6xf32>, vector<6x6xf32>, vector<6x6xf32> -> vector<6x6xf32>
    %cst_109 = arith.constant 0.377964467 : f32
    %244 = vector.broadcast %cst_109 : f32 to vector<6x6xf32>
    %245 = arith.mulf %243, %244 : vector<6x6xf32>
    %cst_110 = arith.constant dense<0xFF800000> : vector<6xf32>
    %246 = vector.multi_reduction <maximumf>, %245, %cst_110 [1] : vector<6x6xf32> to vector<6xf32>
    %247 = vector.shape_cast %246 : vector<6xf32> to vector<6x1xf32>
    %248 = vector.broadcast %247 : vector<6x1xf32> to vector<6x6xf32>
    %249 = arith.subf %245, %248 : vector<6x6xf32>
    %250 = math.exp %249 : vector<6x6xf32>
    %cst_111 = arith.constant dense<0.000000e+00> : vector<6xf32>
    %251 = vector.multi_reduction <add>, %250, %cst_111 [1] : vector<6x6xf32> to vector<6xf32>
    %252 = vector.shape_cast %251 : vector<6xf32> to vector<6x1xf32>
    %253 = vector.broadcast %252 : vector<6x1xf32> to vector<6x6xf32>
    %254 = arith.divf %250, %253 : vector<6x6xf32>
    %cst_112 = arith.constant dense<0.000000e+00> : vector<6x6xf32>
    %255 = tpu.matmul %254, %242, %cst_112 {dimension_numbers = #tpu.dot_dimension_numbers<[1], [0], [0], [1], [0, 0, 1, 1], [], []>} : vector<6x6xf32>, vector<6x6xf32>, vector<6x6xf32> -> vector<6x6xf32>
    %256 = arith.index_cast %c12_i32 : i32 to index
    %c0_113 = arith.constant 0 : index
    %c0_114 = arith.constant 0 : index
    %257 = vector.load %arg2[%256, %c0_113, %c0_114] : memref<35x6x6xf32, #tpu.memory_space<vmem>>, vector<1x6x6xf32>
    %258 = vector.shape_cast %257 : vector<1x6x6xf32> to vector<6x6xf32>
    %259 = vector.shape_cast %255 : vector<6x6xf32> to vector<1x6x6xf32>
    tpu.vector_store %arg2[%256, %c0_113, %c0_114], %259 {strides = array<i32>} : memref<35x6x6xf32, #tpu.memory_space<vmem>>, vector<1x6x6xf32>,
    %c13_i32 = arith.constant 13 : i32
    %260 = arith.index_cast %c13_i32 : i32 to index
    %c0_115 = arith.constant 0 : index
    %c0_116 = arith.constant 0 : index
    %261 = vector.load %arg1[%260, %c0_115, %c0_116] : memref<35x6x6xf32, #tpu.memory_space<vmem>>, vector<1x6x6xf32>
    %262 = vector.shape_cast %261 : vector<1x6x6xf32> to vector<6x6xf32>
    %cst_117 = arith.constant dense<0.000000e+00> : vector<6x6xf32>
    %263 = tpu.matmul %262, %262, %cst_117 {dimension_numbers = #tpu.dot_dimension_numbers<[1], [1], [0], [0], [0, 0, 1, 0], [], []>} : vector<6x6xf32>, vector<6x6xf32>, vector<6x6xf32> -> vector<6x6xf32>
    %cst_118 = arith.constant 0.377964467 : f32
    %264 = vector.broadcast %cst_118 : f32 to vector<6x6xf32>
    %265 = arith.mulf %263, %264 : vector<6x6xf32>
    %cst_119 = arith.constant dense<0xFF800000> : vector<6xf32>
    %266 = vector.multi_reduction <maximumf>, %265, %cst_119 [1] : vector<6x6xf32> to vector<6xf32>
    %267 = vector.shape_cast %266 : vector<6xf32> to vector<6x1xf32>
    %268 = vector.broadcast %267 : vector<6x1xf32> to vector<6x6xf32>
    %269 = arith.subf %265, %268 : vector<6x6xf32>
    %270 = math.exp %269 : vector<6x6xf32>
    %cst_120 = arith.constant dense<0.000000e+00> : vector<6xf32>
    %271 = vector.multi_reduction <add>, %270, %cst_120 [1] : vector<6x6xf32> to vector<6xf32>
    %272 = vector.shape_cast %271 : vector<6xf32> to vector<6x1xf32>
    %273 = vector.broadcast %272 : vector<6x1xf32> to vector<6x6xf32>
    %274 = arith.divf %270, %273 : vector<6x6xf32>
    %cst_121 = arith.constant dense<0.000000e+00> : vector<6x6xf32>
    %275 = tpu.matmul %274, %262, %cst_121 {dimension_numbers = #tpu.dot_dimension_numbers<[1], [0], [0], [1], [0, 0, 1, 1], [], []>} : vector<6x6xf32>, vector<6x6xf32>, vector<6x6xf32> -> vector<6x6xf32>
    %276 = arith.index_cast %c13_i32 : i32 to index
    %c0_122 = arith.constant 0 : index
    %c0_123 = arith.constant 0 : index
    %277 = vector.load %arg2[%276, %c0_122, %c0_123] : memref<35x6x6xf32, #tpu.memory_space<vmem>>, vector<1x6x6xf32>
    %278 = vector.shape_cast %277 : vector<1x6x6xf32> to vector<6x6xf32>
    %279 = vector.shape_cast %275 : vector<6x6xf32> to vector<1x6x6xf32>
    tpu.vector_store %arg2[%276, %c0_122, %c0_123], %279 {strides = array<i32>} : memref<35x6x6xf32, #tpu.memory_space<vmem>>, vector<1x6x6xf32>,
    %c14_i32 = arith.constant 14 : i32
    %280 = arith.index_cast %c14_i32 : i32 to index
    %c0_124 = arith.constant 0 : index
    %c0_125 = arith.constant 0 : index
    %281 = vector.load %arg1[%280, %c0_124, %c0_125] : memref<35x6x6xf32, #tpu.memory_space<vmem>>, vector<1x6x6xf32>
    %282 = vector.shape_cast %281 : vector<1x6x6xf32> to vector<6x6xf32>
    %cst_126 = arith.constant dense<0.000000e+00> : vector<6x6xf32>
    %283 = tpu.matmul %282, %282, %cst_126 {dimension_numbers = #tpu.dot_dimension_numbers<[1], [1], [0], [0], [0, 0, 1, 0], [], []>} : vector<6x6xf32>, vector<6x6xf32>, vector<6x6xf32> -> vector<6x6xf32>
    %cst_127 = arith.constant 0.377964467 : f32
    %284 = vector.broadcast %cst_127 : f32 to vector<6x6xf32>
    %285 = arith.mulf %283, %284 : vector<6x6xf32>
    %cst_128 = arith.constant dense<0xFF800000> : vector<6xf32>
    %286 = vector.multi_reduction <maximumf>, %285, %cst_128 [1] : vector<6x6xf32> to vector<6xf32>
    %287 = vector.shape_cast %286 : vector<6xf32> to vector<6x1xf32>
    %288 = vector.broadcast %287 : vector<6x1xf32> to vector<6x6xf32>
    %289 = arith.subf %285, %288 : vector<6x6xf32>
    %290 = math.exp %289 : vector<6x6xf32>
    %cst_129 = arith.constant dense<0.000000e+00> : vector<6xf32>
    %291 = vector.multi_reduction <add>, %290, %cst_129 [1] : vector<6x6xf32> to vector<6xf32>
    %292 = vector.shape_cast %291 : vector<6xf32> to vector<6x1xf32>
    %293 = vector.broadcast %292 : vector<6x1xf32> to vector<6x6xf32>
    %294 = arith.divf %290, %293 : vector<6x6xf32>
    %cst_130 = arith.constant dense<0.000000e+00> : vector<6x6xf32>
    %295 = tpu.matmul %294, %282, %cst_130 {dimension_numbers = #tpu.dot_dimension_numbers<[1], [0], [0], [1], [0, 0, 1, 1], [], []>} : vector<6x6xf32>, vector<6x6xf32>, vector<6x6xf32> -> vector<6x6xf32>
    %296 = arith.index_cast %c14_i32 : i32 to index
    %c0_131 = arith.constant 0 : index
    %c0_132 = arith.constant 0 : index
    %297 = vector.load %arg2[%296, %c0_131, %c0_132] : memref<35x6x6xf32, #tpu.memory_space<vmem>>, vector<1x6x6xf32>
    %298 = vector.shape_cast %297 : vector<1x6x6xf32> to vector<6x6xf32>
    %299 = vector.shape_cast %295 : vector<6x6xf32> to vector<1x6x6xf32>
    tpu.vector_store %arg2[%296, %c0_131, %c0_132], %299 {strides = array<i32>} : memref<35x6x6xf32, #tpu.memory_space<vmem>>, vector<1x6x6xf32>,
    %c15_i32 = arith.constant 15 : i32
    %300 = arith.index_cast %c15_i32 : i32 to index
    %c0_133 = arith.constant 0 : index
    %c0_134 = arith.constant 0 : index
    %301 = vector.load %arg1[%300, %c0_133, %c0_134] : memref<35x6x6xf32, #tpu.memory_space<vmem>>, vector<1x6x6xf32>
    %302 = vector.shape_cast %301 : vector<1x6x6xf32> to vector<6x6xf32>
    %cst_135 = arith.constant dense<0.000000e+00> : vector<6x6xf32>
    %303 = tpu.matmul %302, %302, %cst_135 {dimension_numbers = #tpu.dot_dimension_numbers<[1], [1], [0], [0], [0, 0, 1, 0], [], []>} : vector<6x6xf32>, vector<6x6xf32>, vector<6x6xf32> -> vector<6x6xf32>
    %cst_136 = arith.constant 0.377964467 : f32
    %304 = vector.broadcast %cst_136 : f32 to vector<6x6xf32>
    %305 = arith.mulf %303, %304 : vector<6x6xf32>
    %cst_137 = arith.constant dense<0xFF800000> : vector<6xf32>
    %306 = vector.multi_reduction <maximumf>, %305, %cst_137 [1] : vector<6x6xf32> to vector<6xf32>
    %307 = vector.shape_cast %306 : vector<6xf32> to vector<6x1xf32>
    %308 = vector.broadcast %307 : vector<6x1xf32> to vector<6x6xf32>
    %309 = arith.subf %305, %308 : vector<6x6xf32>
    %310 = math.exp %309 : vector<6x6xf32>
    %cst_138 = arith.constant dense<0.000000e+00> : vector<6xf32>
    %311 = vector.multi_reduction <add>, %310, %cst_138 [1] : vector<6x6xf32> to vector<6xf32>
    %312 = vector.shape_cast %311 : vector<6xf32> to vector<6x1xf32>
    %313 = vector.broadcast %312 : vector<6x1xf32> to vector<6x6xf32>
    %314 = arith.divf %310, %313 : vector<6x6xf32>
    %cst_139 = arith.constant dense<0.000000e+00> : vector<6x6xf32>
    %315 = tpu.matmul %314, %302, %cst_139 {dimension_numbers = #tpu.dot_dimension_numbers<[1], [0], [0], [1], [0, 0, 1, 1], [], []>} : vector<6x6xf32>, vector<6x6xf32>, vector<6x6xf32> -> vector<6x6xf32>
    %316 = arith.index_cast %c15_i32 : i32 to index
    %c0_140 = arith.constant 0 : index
    %c0_141 = arith.constant 0 : index
    %317 = vector.load %arg2[%316, %c0_140, %c0_141] : memref<35x6x6xf32, #tpu.memory_space<vmem>>, vector<1x6x6xf32>
    %318 = vector.shape_cast %317 : vector<1x6x6xf32> to vector<6x6xf32>
    %319 = vector.shape_cast %315 : vector<6x6xf32> to vector<1x6x6xf32>
    tpu.vector_store %arg2[%316, %c0_140, %c0_141], %319 {strides = array<i32>} : memref<35x6x6xf32, #tpu.memory_space<vmem>>, vector<1x6x6xf32>,
    %c16_i32 = arith.constant 16 : i32
    %320 = arith.index_cast %c16_i32 : i32 to index
    %c0_142 = arith.constant 0 : index
    %c0_143 = arith.constant 0 : index
    %321 = vector.load %arg1[%320, %c0_142, %c0_143] : memref<35x6x6xf32, #tpu.memory_space<vmem>>, vector<1x6x6xf32>
    %322 = vector.shape_cast %321 : vector<1x6x6xf32> to vector<6x6xf32>
    %cst_144 = arith.constant dense<0.000000e+00> : vector<6x6xf32>
    %323 = tpu.matmul %322, %322, %cst_144 {dimension_numbers = #tpu.dot_dimension_numbers<[1], [1], [0], [0], [0, 0, 1, 0], [], []>} : vector<6x6xf32>, vector<6x6xf32>, vector<6x6xf32> -> vector<6x6xf32>
    %cst_145 = arith.constant 0.377964467 : f32
    %324 = vector.broadcast %cst_145 : f32 to vector<6x6xf32>
    %325 = arith.mulf %323, %324 : vector<6x6xf32>
    %cst_146 = arith.constant dense<0xFF800000> : vector<6xf32>
    %326 = vector.multi_reduction <maximumf>, %325, %cst_146 [1] : vector<6x6xf32> to vector<6xf32>
    %327 = vector.shape_cast %326 : vector<6xf32> to vector<6x1xf32>
    %328 = vector.broadcast %327 : vector<6x1xf32> to vector<6x6xf32>
    %329 = arith.subf %325, %328 : vector<6x6xf32>
    %330 = math.exp %329 : vector<6x6xf32>
    %cst_147 = arith.constant dense<0.000000e+00> : vector<6xf32>
    %331 = vector.multi_reduction <add>, %330, %cst_147 [1] : vector<6x6xf32> to vector<6xf32>
    %332 = vector.shape_cast %331 : vector<6xf32> to vector<6x1xf32>
    %333 = vector.broadcast %332 : vector<6x1xf32> to vector<6x6xf32>
    %334 = arith.divf %330, %333 : vector<6x6xf32>
    %cst_148 = arith.constant dense<0.000000e+00> : vector<6x6xf32>
    %335 = tpu.matmul %334, %322, %cst_148 {dimension_numbers = #tpu.dot_dimension_numbers<[1], [0], [0], [1], [0, 0, 1, 1], [], []>} : vector<6x6xf32>, vector<6x6xf32>, vector<6x6xf32> -> vector<6x6xf32>
    %336 = arith.index_cast %c16_i32 : i32 to index
    %c0_149 = arith.constant 0 : index
    %c0_150 = arith.constant 0 : index
    %337 = vector.load %arg2[%336, %c0_149, %c0_150] : memref<35x6x6xf32, #tpu.memory_space<vmem>>, vector<1x6x6xf32>
    %338 = vector.shape_cast %337 : vector<1x6x6xf32> to vector<6x6xf32>
    %339 = vector.shape_cast %335 : vector<6x6xf32> to vector<1x6x6xf32>
    tpu.vector_store %arg2[%336, %c0_149, %c0_150], %339 {strides = array<i32>} : memref<35x6x6xf32, #tpu.memory_space<vmem>>, vector<1x6x6xf32>,
    %c17_i32 = arith.constant 17 : i32
    %340 = arith.index_cast %c17_i32 : i32 to index
    %c0_151 = arith.constant 0 : index
    %c0_152 = arith.constant 0 : index
    %341 = vector.load %arg1[%340, %c0_151, %c0_152] : memref<35x6x6xf32, #tpu.memory_space<vmem>>, vector<1x6x6xf32>
    %342 = vector.shape_cast %341 : vector<1x6x6xf32> to vector<6x6xf32>
    %cst_153 = arith.constant dense<0.000000e+00> : vector<6x6xf32>
    %343 = tpu.matmul %342, %342, %cst_153 {dimension_numbers = #tpu.dot_dimension_numbers<[1], [1], [0], [0], [0, 0, 1, 0], [], []>} : vector<6x6xf32>, vector<6x6xf32>, vector<6x6xf32> -> vector<6x6xf32>
    %cst_154 = arith.constant 0.377964467 : f32
    %344 = vector.broadcast %cst_154 : f32 to vector<6x6xf32>
    %345 = arith.mulf %343, %344 : vector<6x6xf32>
    %cst_155 = arith.constant dense<0xFF800000> : vector<6xf32>
    %346 = vector.multi_reduction <maximumf>, %345, %cst_155 [1] : vector<6x6xf32> to vector<6xf32>
    %347 = vector.shape_cast %346 : vector<6xf32> to vector<6x1xf32>
    %348 = vector.broadcast %347 : vector<6x1xf32> to vector<6x6xf32>
    %349 = arith.subf %345, %348 : vector<6x6xf32>
    %350 = math.exp %349 : vector<6x6xf32>
    %cst_156 = arith.constant dense<0.000000e+00> : vector<6xf32>
    %351 = vector.multi_reduction <add>, %350, %cst_156 [1] : vector<6x6xf32> to vector<6xf32>
    %352 = vector.shape_cast %351 : vector<6xf32> to vector<6x1xf32>
    %353 = vector.broadcast %352 : vector<6x1xf32> to vector<6x6xf32>
    %354 = arith.divf %350, %353 : vector<6x6xf32>
    %cst_157 = arith.constant dense<0.000000e+00> : vector<6x6xf32>
    %355 = tpu.matmul %354, %342, %cst_157 {dimension_numbers = #tpu.dot_dimension_numbers<[1], [0], [0], [1], [0, 0, 1, 1], [], []>} : vector<6x6xf32>, vector<6x6xf32>, vector<6x6xf32> -> vector<6x6xf32>
    %356 = arith.index_cast %c17_i32 : i32 to index
    %c0_158 = arith.constant 0 : index
    %c0_159 = arith.constant 0 : index
    %357 = vector.load %arg2[%356, %c0_158, %c0_159] : memref<35x6x6xf32, #tpu.memory_space<vmem>>, vector<1x6x6xf32>
    %358 = vector.shape_cast %357 : vector<1x6x6xf32> to vector<6x6xf32>
    %359 = vector.shape_cast %355 : vector<6x6xf32> to vector<1x6x6xf32>
    tpu.vector_store %arg2[%356, %c0_158, %c0_159], %359 {strides = array<i32>} : memref<35x6x6xf32, #tpu.memory_space<vmem>>, vector<1x6x6xf32>,
    %c18_i32 = arith.constant 18 : i32
    %360 = arith.index_cast %c18_i32 : i32 to index
    %c0_160 = arith.constant 0 : index
    %c0_161 = arith.constant 0 : index
    %361 = vector.load %arg1[%360, %c0_160, %c0_161] : memref<35x6x6xf32, #tpu.memory_space<vmem>>, vector<1x6x6xf32>
    %362 = vector.shape_cast %361 : vector<1x6x6xf32> to vector<6x6xf32>
    %cst_162 = arith.constant dense<0.000000e+00> : vector<6x6xf32>
    %363 = tpu.matmul %362, %362, %cst_162 {dimension_numbers = #tpu.dot_dimension_numbers<[1], [1], [0], [0], [0, 0, 1, 0], [], []>} : vector<6x6xf32>, vector<6x6xf32>, vector<6x6xf32> -> vector<6x6xf32>
    %cst_163 = arith.constant 0.377964467 : f32
    %364 = vector.broadcast %cst_163 : f32 to vector<6x6xf32>
    %365 = arith.mulf %363, %364 : vector<6x6xf32>
    %cst_164 = arith.constant dense<0xFF800000> : vector<6xf32>
    %366 = vector.multi_reduction <maximumf>, %365, %cst_164 [1] : vector<6x6xf32> to vector<6xf32>
    %367 = vector.shape_cast %366 : vector<6xf32> to vector<6x1xf32>
    %368 = vector.broadcast %367 : vector<6x1xf32> to vector<6x6xf32>
    %369 = arith.subf %365, %368 : vector<6x6xf32>
    %370 = math.exp %369 : vector<6x6xf32>
    %cst_165 = arith.constant dense<0.000000e+00> : vector<6xf32>
    %371 = vector.multi_reduction <add>, %370, %cst_165 [1] : vector<6x6xf32> to vector<6xf32>
    %372 = vector.shape_cast %371 : vector<6xf32> to vector<6x1xf32>
    %373 = vector.broadcast %372 : vector<6x1xf32> to vector<6x6xf32>
    %374 = arith.divf %370, %373 : vector<6x6xf32>
    %cst_166 = arith.constant dense<0.000000e+00> : vector<6x6xf32>
    %375 = tpu.matmul %374, %362, %cst_166 {dimension_numbers = #tpu.dot_dimension_numbers<[1], [0], [0], [1], [0, 0, 1, 1], [], []>} : vector<6x6xf32>, vector<6x6xf32>, vector<6x6xf32> -> vector<6x6xf32>
    %376 = arith.index_cast %c18_i32 : i32 to index
    %c0_167 = arith.constant 0 : index
    %c0_168 = arith.constant 0 : index
    %377 = vector.load %arg2[%376, %c0_167, %c0_168] : memref<35x6x6xf32, #tpu.memory_space<vmem>>, vector<1x6x6xf32>
    %378 = vector.shape_cast %377 : vector<1x6x6xf32> to vector<6x6xf32>
    %379 = vector.shape_cast %375 : vector<6x6xf32> to vector<1x6x6xf32>
    tpu.vector_store %arg2[%376, %c0_167, %c0_168], %379 {strides = array<i32>} : memref<35x6x6xf32, #tpu.memory_space<vmem>>, vector<1x6x6xf32>,
    %c19_i32 = arith.constant 19 : i32
    %380 = arith.index_cast %c19_i32 : i32 to index
    %c0_169 = arith.constant 0 : index
    %c0_170 = arith.constant 0 : index
    %381 = vector.load %arg1[%380, %c0_169, %c0_170] : memref<35x6x6xf32, #tpu.memory_space<vmem>>, vector<1x6x6xf32>
    %382 = vector.shape_cast %381 : vector<1x6x6xf32> to vector<6x6xf32>
    %cst_171 = arith.constant dense<0.000000e+00> : vector<6x6xf32>
    %383 = tpu.matmul %382, %382, %cst_171 {dimension_numbers = #tpu.dot_dimension_numbers<[1], [1], [0], [0], [0, 0, 1, 0], [], []>} : vector<6x6xf32>, vector<6x6xf32>, vector<6x6xf32> -> vector<6x6xf32>
    %cst_172 = arith.constant 0.377964467 : f32
    %384 = vector.broadcast %cst_172 : f32 to vector<6x6xf32>
    %385 = arith.mulf %383, %384 : vector<6x6xf32>
    %cst_173 = arith.constant dense<0xFF800000> : vector<6xf32>
    %386 = vector.multi_reduction <maximumf>, %385, %cst_173 [1] : vector<6x6xf32> to vector<6xf32>
    %387 = vector.shape_cast %386 : vector<6xf32> to vector<6x1xf32>
    %388 = vector.broadcast %387 : vector<6x1xf32> to vector<6x6xf32>
    %389 = arith.subf %385, %388 : vector<6x6xf32>
    %390 = math.exp %389 : vector<6x6xf32>
    %cst_174 = arith.constant dense<0.000000e+00> : vector<6xf32>
    %391 = vector.multi_reduction <add>, %390, %cst_174 [1] : vector<6x6xf32> to vector<6xf32>
    %392 = vector.shape_cast %391 : vector<6xf32> to vector<6x1xf32>
    %393 = vector.broadcast %392 : vector<6x1xf32> to vector<6x6xf32>
    %394 = arith.divf %390, %393 : vector<6x6xf32>
    %cst_175 = arith.constant dense<0.000000e+00> : vector<6x6xf32>
    %395 = tpu.matmul %394, %382, %cst_175 {dimension_numbers = #tpu.dot_dimension_numbers<[1], [0], [0], [1], [0, 0, 1, 1], [], []>} : vector<6x6xf32>, vector<6x6xf32>, vector<6x6xf32> -> vector<6x6xf32>
    %396 = arith.index_cast %c19_i32 : i32 to index
    %c0_176 = arith.constant 0 : index
    %c0_177 = arith.constant 0 : index
    %397 = vector.load %arg2[%396, %c0_176, %c0_177] : memref<35x6x6xf32, #tpu.memory_space<vmem>>, vector<1x6x6xf32>
    %398 = vector.shape_cast %397 : vector<1x6x6xf32> to vector<6x6xf32>
    %399 = vector.shape_cast %395 : vector<6x6xf32> to vector<1x6x6xf32>
    tpu.vector_store %arg2[%396, %c0_176, %c0_177], %399 {strides = array<i32>} : memref<35x6x6xf32, #tpu.memory_space<vmem>>, vector<1x6x6xf32>,
    %c20_i32 = arith.constant 20 : i32
    %400 = arith.index_cast %c20_i32 : i32 to index
    %c0_178 = arith.constant 0 : index
    %c0_179 = arith.constant 0 : index
    %401 = vector.load %arg1[%400, %c0_178, %c0_179] : memref<35x6x6xf32, #tpu.memory_space<vmem>>, vector<1x6x6xf32>
    %402 = vector.shape_cast %401 : vector<1x6x6xf32> to vector<6x6xf32>
    %cst_180 = arith.constant dense<0.000000e+00> : vector<6x6xf32>
    %403 = tpu.matmul %402, %402, %cst_180 {dimension_numbers = #tpu.dot_dimension_numbers<[1], [1], [0], [0], [0, 0, 1, 0], [], []>} : vector<6x6xf32>, vector<6x6xf32>, vector<6x6xf32> -> vector<6x6xf32>
    %cst_181 = arith.constant 0.377964467 : f32
    %404 = vector.broadcast %cst_181 : f32 to vector<6x6xf32>
    %405 = arith.mulf %403, %404 : vector<6x6xf32>
    %cst_182 = arith.constant dense<0xFF800000> : vector<6xf32>
    %406 = vector.multi_reduction <maximumf>, %405, %cst_182 [1] : vector<6x6xf32> to vector<6xf32>
    %407 = vector.shape_cast %406 : vector<6xf32> to vector<6x1xf32>
    %408 = vector.broadcast %407 : vector<6x1xf32> to vector<6x6xf32>
    %409 = arith.subf %405, %408 : vector<6x6xf32>
    %410 = math.exp %409 : vector<6x6xf32>
    %cst_183 = arith.constant dense<0.000000e+00> : vector<6xf32>
    %411 = vector.multi_reduction <add>, %410, %cst_183 [1] : vector<6x6xf32> to vector<6xf32>
    %412 = vector.shape_cast %411 : vector<6xf32> to vector<6x1xf32>
    %413 = vector.broadcast %412 : vector<6x1xf32> to vector<6x6xf32>
    %414 = arith.divf %410, %413 : vector<6x6xf32>
    %cst_184 = arith.constant dense<0.000000e+00> : vector<6x6xf32>
    %415 = tpu.matmul %414, %402, %cst_184 {dimension_numbers = #tpu.dot_dimension_numbers<[1], [0], [0], [1], [0, 0, 1, 1], [], []>} : vector<6x6xf32>, vector<6x6xf32>, vector<6x6xf32> -> vector<6x6xf32>
    %416 = arith.index_cast %c20_i32 : i32 to index
    %c0_185 = arith.constant 0 : index
    %c0_186 = arith.constant 0 : index
    %417 = vector.load %arg2[%416, %c0_185, %c0_186] : memref<35x6x6xf32, #tpu.memory_space<vmem>>, vector<1x6x6xf32>
    %418 = vector.shape_cast %417 : vector<1x6x6xf32> to vector<6x6xf32>
    %419 = vector.shape_cast %415 : vector<6x6xf32> to vector<1x6x6xf32>
    tpu.vector_store %arg2[%416, %c0_185, %c0_186], %419 {strides = array<i32>} : memref<35x6x6xf32, #tpu.memory_space<vmem>>, vector<1x6x6xf32>,
    %c21_i32 = arith.constant 21 : i32
    %420 = arith.index_cast %c21_i32 : i32 to index
    %c0_187 = arith.constant 0 : index
    %c0_188 = arith.constant 0 : index
    %421 = vector.load %arg1[%420, %c0_187, %c0_188] : memref<35x6x6xf32, #tpu.memory_space<vmem>>, vector<1x6x6xf32>
    %422 = vector.shape_cast %421 : vector<1x6x6xf32> to vector<6x6xf32>
    %cst_189 = arith.constant dense<0.000000e+00> : vector<6x6xf32>
    %423 = tpu.matmul %422, %422, %cst_189 {dimension_numbers = #tpu.dot_dimension_numbers<[1], [1], [0], [0], [0, 0, 1, 0], [], []>} : vector<6x6xf32>, vector<6x6xf32>, vector<6x6xf32> -> vector<6x6xf32>
    %cst_190 = arith.constant 0.377964467 : f32
    %424 = vector.broadcast %cst_190 : f32 to vector<6x6xf32>
    %425 = arith.mulf %423, %424 : vector<6x6xf32>
    %cst_191 = arith.constant dense<0xFF800000> : vector<6xf32>
    %426 = vector.multi_reduction <maximumf>, %425, %cst_191 [1] : vector<6x6xf32> to vector<6xf32>
    %427 = vector.shape_cast %426 : vector<6xf32> to vector<6x1xf32>
    %428 = vector.broadcast %427 : vector<6x1xf32> to vector<6x6xf32>
    %429 = arith.subf %425, %428 : vector<6x6xf32>
    %430 = math.exp %429 : vector<6x6xf32>
    %cst_192 = arith.constant dense<0.000000e+00> : vector<6xf32>
    %431 = vector.multi_reduction <add>, %430, %cst_192 [1] : vector<6x6xf32> to vector<6xf32>
    %432 = vector.shape_cast %431 : vector<6xf32> to vector<6x1xf32>
    %433 = vector.broadcast %432 : vector<6x1xf32> to vector<6x6xf32>
    %434 = arith.divf %430, %433 : vector<6x6xf32>
    %cst_193 = arith.constant dense<0.000000e+00> : vector<6x6xf32>
    %435 = tpu.matmul %434, %422, %cst_193 {dimension_numbers = #tpu.dot_dimension_numbers<[1], [0], [0], [1], [0, 0, 1, 1], [], []>} : vector<6x6xf32>, vector<6x6xf32>, vector<6x6xf32> -> vector<6x6xf32>
    %436 = arith.index_cast %c21_i32 : i32 to index
    %c0_194 = arith.constant 0 : index
    %c0_195 = arith.constant 0 : index
    %437 = vector.load %arg2[%436, %c0_194, %c0_195] : memref<35x6x6xf32, #tpu.memory_space<vmem>>, vector<1x6x6xf32>
    %438 = vector.shape_cast %437 : vector<1x6x6xf32> to vector<6x6xf32>
    %439 = vector.shape_cast %435 : vector<6x6xf32> to vector<1x6x6xf32>
    tpu.vector_store %arg2[%436, %c0_194, %c0_195], %439 {strides = array<i32>} : memref<35x6x6xf32, #tpu.memory_space<vmem>>, vector<1x6x6xf32>,
    %c22_i32 = arith.constant 22 : i32
    %440 = arith.index_cast %c22_i32 : i32 to index
    %c0_196 = arith.constant 0 : index
    %c0_197 = arith.constant 0 : index
    %441 = vector.load %arg1[%440, %c0_196, %c0_197] : memref<35x6x6xf32, #tpu.memory_space<vmem>>, vector<1x6x6xf32>
    %442 = vector.shape_cast %441 : vector<1x6x6xf32> to vector<6x6xf32>
    %cst_198 = arith.constant dense<0.000000e+00> : vector<6x6xf32>
    %443 = tpu.matmul %442, %442, %cst_198 {dimension_numbers = #tpu.dot_dimension_numbers<[1], [1], [0], [0], [0, 0, 1, 0], [], []>} : vector<6x6xf32>, vector<6x6xf32>, vector<6x6xf32> -> vector<6x6xf32>
    %cst_199 = arith.constant 0.377964467 : f32
    %444 = vector.broadcast %cst_199 : f32 to vector<6x6xf32>
    %445 = arith.mulf %443, %444 : vector<6x6xf32>
    %cst_200 = arith.constant dense<0xFF800000> : vector<6xf32>
    %446 = vector.multi_reduction <maximumf>, %445, %cst_200 [1] : vector<6x6xf32> to vector<6xf32>
    %447 = vector.shape_cast %446 : vector<6xf32> to vector<6x1xf32>
    %448 = vector.broadcast %447 : vector<6x1xf32> to vector<6x6xf32>
    %449 = arith.subf %445, %448 : vector<6x6xf32>
    %450 = math.exp %449 : vector<6x6xf32>
    %cst_201 = arith.constant dense<0.000000e+00> : vector<6xf32>
    %451 = vector.multi_reduction <add>, %450, %cst_201 [1] : vector<6x6xf32> to vector<6xf32>
    %452 = vector.shape_cast %451 : vector<6xf32> to vector<6x1xf32>
    %453 = vector.broadcast %452 : vector<6x1xf32> to vector<6x6xf32>
    %454 = arith.divf %450, %453 : vector<6x6xf32>
    %cst_202 = arith.constant dense<0.000000e+00> : vector<6x6xf32>
    %455 = tpu.matmul %454, %442, %cst_202 {dimension_numbers = #tpu.dot_dimension_numbers<[1], [0], [0], [1], [0, 0, 1, 1], [], []>} : vector<6x6xf32>, vector<6x6xf32>, vector<6x6xf32> -> vector<6x6xf32>
    %456 = arith.index_cast %c22_i32 : i32 to index
    %c0_203 = arith.constant 0 : index
    %c0_204 = arith.constant 0 : index
    %457 = vector.load %arg2[%456, %c0_203, %c0_204] : memref<35x6x6xf32, #tpu.memory_space<vmem>>, vector<1x6x6xf32>
    %458 = vector.shape_cast %457 : vector<1x6x6xf32> to vector<6x6xf32>
    %459 = vector.shape_cast %455 : vector<6x6xf32> to vector<1x6x6xf32>
    tpu.vector_store %arg2[%456, %c0_203, %c0_204], %459 {strides = array<i32>} : memref<35x6x6xf32, #tpu.memory_space<vmem>>, vector<1x6x6xf32>,
    %c23_i32 = arith.constant 23 : i32
    %460 = arith.index_cast %c23_i32 : i32 to index
    %c0_205 = arith.constant 0 : index
    %c0_206 = arith.constant 0 : index
    %461 = vector.load %arg1[%460, %c0_205, %c0_206] : memref<35x6x6xf32, #tpu.memory_space<vmem>>, vector<1x6x6xf32>
    %462 = vector.shape_cast %461 : vector<1x6x6xf32> to vector<6x6xf32>
    %cst_207 = arith.constant dense<0.000000e+00> : vector<6x6xf32>
    %463 = tpu.matmul %462, %462, %cst_207 {dimension_numbers = #tpu.dot_dimension_numbers<[1], [1], [0], [0], [0, 0, 1, 0], [], []>} : vector<6x6xf32>, vector<6x6xf32>, vector<6x6xf32> -> vector<6x6xf32>
    %cst_208 = arith.constant 0.377964467 : f32
    %464 = vector.broadcast %cst_208 : f32 to vector<6x6xf32>
    %465 = arith.mulf %463, %464 : vector<6x6xf32>
    %cst_209 = arith.constant dense<0xFF800000> : vector<6xf32>
    %466 = vector.multi_reduction <maximumf>, %465, %cst_209 [1] : vector<6x6xf32> to vector<6xf32>
    %467 = vector.shape_cast %466 : vector<6xf32> to vector<6x1xf32>
    %468 = vector.broadcast %467 : vector<6x1xf32> to vector<6x6xf32>
    %469 = arith.subf %465, %468 : vector<6x6xf32>
    %470 = math.exp %469 : vector<6x6xf32>
    %cst_210 = arith.constant dense<0.000000e+00> : vector<6xf32>
    %471 = vector.multi_reduction <add>, %470, %cst_210 [1] : vector<6x6xf32> to vector<6xf32>
    %472 = vector.shape_cast %471 : vector<6xf32> to vector<6x1xf32>
    %473 = vector.broadcast %472 : vector<6x1xf32> to vector<6x6xf32>
    %474 = arith.divf %470, %473 : vector<6x6xf32>
    %cst_211 = arith.constant dense<0.000000e+00> : vector<6x6xf32>
    %475 = tpu.matmul %474, %462, %cst_211 {dimension_numbers = #tpu.dot_dimension_numbers<[1], [0], [0], [1], [0, 0, 1, 1], [], []>} : vector<6x6xf32>, vector<6x6xf32>, vector<6x6xf32> -> vector<6x6xf32>
    %476 = arith.index_cast %c23_i32 : i32 to index
    %c0_212 = arith.constant 0 : index
    %c0_213 = arith.constant 0 : index
    %477 = vector.load %arg2[%476, %c0_212, %c0_213] : memref<35x6x6xf32, #tpu.memory_space<vmem>>, vector<1x6x6xf32>
    %478 = vector.shape_cast %477 : vector<1x6x6xf32> to vector<6x6xf32>
    %479 = vector.shape_cast %475 : vector<6x6xf32> to vector<1x6x6xf32>
    tpu.vector_store %arg2[%476, %c0_212, %c0_213], %479 {strides = array<i32>} : memref<35x6x6xf32, #tpu.memory_space<vmem>>, vector<1x6x6xf32>,
    %c24_i32 = arith.constant 24 : i32
    %480 = arith.index_cast %c24_i32 : i32 to index
    %c0_214 = arith.constant 0 : index
    %c0_215 = arith.constant 0 : index
    %481 = vector.load %arg1[%480, %c0_214, %c0_215] : memref<35x6x6xf32, #tpu.memory_space<vmem>>, vector<1x6x6xf32>
    %482 = vector.shape_cast %481 : vector<1x6x6xf32> to vector<6x6xf32>
    %cst_216 = arith.constant dense<0.000000e+00> : vector<6x6xf32>
    %483 = tpu.matmul %482, %482, %cst_216 {dimension_numbers = #tpu.dot_dimension_numbers<[1], [1], [0], [0], [0, 0, 1, 0], [], []>} : vector<6x6xf32>, vector<6x6xf32>, vector<6x6xf32> -> vector<6x6xf32>
    %cst_217 = arith.constant 0.377964467 : f32
    %484 = vector.broadcast %cst_217 : f32 to vector<6x6xf32>
    %485 = arith.mulf %483, %484 : vector<6x6xf32>
    %cst_218 = arith.constant dense<0xFF800000> : vector<6xf32>
    %486 = vector.multi_reduction <maximumf>, %485, %cst_218 [1] : vector<6x6xf32> to vector<6xf32>
    %487 = vector.shape_cast %486 : vector<6xf32> to vector<6x1xf32>
    %488 = vector.broadcast %487 : vector<6x1xf32> to vector<6x6xf32>
    %489 = arith.subf %485, %488 : vector<6x6xf32>
    %490 = math.exp %489 : vector<6x6xf32>
    %cst_219 = arith.constant dense<0.000000e+00> : vector<6xf32>
    %491 = vector.multi_reduction <add>, %490, %cst_219 [1] : vector<6x6xf32> to vector<6xf32>
    %492 = vector.shape_cast %491 : vector<6xf32> to vector<6x1xf32>
    %493 = vector.broadcast %492 : vector<6x1xf32> to vector<6x6xf32>
    %494 = arith.divf %490, %493 : vector<6x6xf32>
    %cst_220 = arith.constant dense<0.000000e+00> : vector<6x6xf32>
    %495 = tpu.matmul %494, %482, %cst_220 {dimension_numbers = #tpu.dot_dimension_numbers<[1], [0], [0], [1], [0, 0, 1, 1], [], []>} : vector<6x6xf32>, vector<6x6xf32>, vector<6x6xf32> -> vector<6x6xf32>
    %496 = arith.index_cast %c24_i32 : i32 to index
    %c0_221 = arith.constant 0 : index
    %c0_222 = arith.constant 0 : index
    %497 = vector.load %arg2[%496, %c0_221, %c0_222] : memref<35x6x6xf32, #tpu.memory_space<vmem>>, vector<1x6x6xf32>
    %498 = vector.shape_cast %497 : vector<1x6x6xf32> to vector<6x6xf32>
    %499 = vector.shape_cast %495 : vector<6x6xf32> to vector<1x6x6xf32>
    tpu.vector_store %arg2[%496, %c0_221, %c0_222], %499 {strides = array<i32>} : memref<35x6x6xf32, #tpu.memory_space<vmem>>, vector<1x6x6xf32>,
    %c25_i32 = arith.constant 25 : i32
    %500 = arith.index_cast %c25_i32 : i32 to index
    %c0_223 = arith.constant 0 : index
    %c0_224 = arith.constant 0 : index
    %501 = vector.load %arg1[%500, %c0_223, %c0_224] : memref<35x6x6xf32, #tpu.memory_space<vmem>>, vector<1x6x6xf32>
    %502 = vector.shape_cast %501 : vector<1x6x6xf32> to vector<6x6xf32>
    %cst_225 = arith.constant dense<0.000000e+00> : vector<6x6xf32>
    %503 = tpu.matmul %502, %502, %cst_225 {dimension_numbers = #tpu.dot_dimension_numbers<[1], [1], [0], [0], [0, 0, 1, 0], [], []>} : vector<6x6xf32>, vector<6x6xf32>, vector<6x6xf32> -> vector<6x6xf32>
    %cst_226 = arith.constant 0.377964467 : f32
    %504 = vector.broadcast %cst_226 : f32 to vector<6x6xf32>
    %505 = arith.mulf %503, %504 : vector<6x6xf32>
    %cst_227 = arith.constant dense<0xFF800000> : vector<6xf32>
    %506 = vector.multi_reduction <maximumf>, %505, %cst_227 [1] : vector<6x6xf32> to vector<6xf32>
    %507 = vector.shape_cast %506 : vector<6xf32> to vector<6x1xf32>
    %508 = vector.broadcast %507 : vector<6x1xf32> to vector<6x6xf32>
    %509 = arith.subf %505, %508 : vector<6x6xf32>
    %510 = math.exp %509 : vector<6x6xf32>
    %cst_228 = arith.constant dense<0.000000e+00> : vector<6xf32>
    %511 = vector.multi_reduction <add>, %510, %cst_228 [1] : vector<6x6xf32> to vector<6xf32>
    %512 = vector.shape_cast %511 : vector<6xf32> to vector<6x1xf32>
    %513 = vector.broadcast %512 : vector<6x1xf32> to vector<6x6xf32>
    %514 = arith.divf %510, %513 : vector<6x6xf32>
    %cst_229 = arith.constant dense<0.000000e+00> : vector<6x6xf32>
    %515 = tpu.matmul %514, %502, %cst_229 {dimension_numbers = #tpu.dot_dimension_numbers<[1], [0], [0], [1], [0, 0, 1, 1], [], []>} : vector<6x6xf32>, vector<6x6xf32>, vector<6x6xf32> -> vector<6x6xf32>
    %516 = arith.index_cast %c25_i32 : i32 to index
    %c0_230 = arith.constant 0 : index
    %c0_231 = arith.constant 0 : index
    %517 = vector.load %arg2[%516, %c0_230, %c0_231] : memref<35x6x6xf32, #tpu.memory_space<vmem>>, vector<1x6x6xf32>
    %518 = vector.shape_cast %517 : vector<1x6x6xf32> to vector<6x6xf32>
    %519 = vector.shape_cast %515 : vector<6x6xf32> to vector<1x6x6xf32>
    tpu.vector_store %arg2[%516, %c0_230, %c0_231], %519 {strides = array<i32>} : memref<35x6x6xf32, #tpu.memory_space<vmem>>, vector<1x6x6xf32>,
    %c26_i32 = arith.constant 26 : i32
    %520 = arith.index_cast %c26_i32 : i32 to index
    %c0_232 = arith.constant 0 : index
    %c0_233 = arith.constant 0 : index
    %521 = vector.load %arg1[%520, %c0_232, %c0_233] : memref<35x6x6xf32, #tpu.memory_space<vmem>>, vector<1x6x6xf32>
    %522 = vector.shape_cast %521 : vector<1x6x6xf32> to vector<6x6xf32>
    %cst_234 = arith.constant dense<0.000000e+00> : vector<6x6xf32>
    %523 = tpu.matmul %522, %522, %cst_234 {dimension_numbers = #tpu.dot_dimension_numbers<[1], [1], [0], [0], [0, 0, 1, 0], [], []>} : vector<6x6xf32>, vector<6x6xf32>, vector<6x6xf32> -> vector<6x6xf32>
    %cst_235 = arith.constant 0.377964467 : f32
    %524 = vector.broadcast %cst_235 : f32 to vector<6x6xf32>
    %525 = arith.mulf %523, %524 : vector<6x6xf32>
    %cst_236 = arith.constant dense<0xFF800000> : vector<6xf32>
    %526 = vector.multi_reduction <maximumf>, %525, %cst_236 [1] : vector<6x6xf32> to vector<6xf32>
    %527 = vector.shape_cast %526 : vector<6xf32> to vector<6x1xf32>
    %528 = vector.broadcast %527 : vector<6x1xf32> to vector<6x6xf32>
    %529 = arith.subf %525, %528 : vector<6x6xf32>
    %530 = math.exp %529 : vector<6x6xf32>
    %cst_237 = arith.constant dense<0.000000e+00> : vector<6xf32>
    %531 = vector.multi_reduction <add>, %530, %cst_237 [1] : vector<6x6xf32> to vector<6xf32>
    %532 = vector.shape_cast %531 : vector<6xf32> to vector<6x1xf32>
    %533 = vector.broadcast %532 : vector<6x1xf32> to vector<6x6xf32>
    %534 = arith.divf %530, %533 : vector<6x6xf32>
    %cst_238 = arith.constant dense<0.000000e+00> : vector<6x6xf32>
    %535 = tpu.matmul %534, %522, %cst_238 {dimension_numbers = #tpu.dot_dimension_numbers<[1], [0], [0], [1], [0, 0, 1, 1], [], []>} : vector<6x6xf32>, vector<6x6xf32>, vector<6x6xf32> -> vector<6x6xf32>
    %536 = arith.index_cast %c26_i32 : i32 to index
    %c0_239 = arith.constant 0 : index
    %c0_240 = arith.constant 0 : index
    %537 = vector.load %arg2[%536, %c0_239, %c0_240] : memref<35x6x6xf32, #tpu.memory_space<vmem>>, vector<1x6x6xf32>
    %538 = vector.shape_cast %537 : vector<1x6x6xf32> to vector<6x6xf32>
    %539 = vector.shape_cast %535 : vector<6x6xf32> to vector<1x6x6xf32>
    tpu.vector_store %arg2[%536, %c0_239, %c0_240], %539 {strides = array<i32>} : memref<35x6x6xf32, #tpu.memory_space<vmem>>, vector<1x6x6xf32>,
    %c27_i32 = arith.constant 27 : i32
    %540 = arith.index_cast %c27_i32 : i32 to index
    %c0_241 = arith.constant 0 : index
    %c0_242 = arith.constant 0 : index
    %541 = vector.load %arg1[%540, %c0_241, %c0_242] : memref<35x6x6xf32, #tpu.memory_space<vmem>>, vector<1x6x6xf32>
    %542 = vector.shape_cast %541 : vector<1x6x6xf32> to vector<6x6xf32>
    %cst_243 = arith.constant dense<0.000000e+00> : vector<6x6xf32>
    %543 = tpu.matmul %542, %542, %cst_243 {dimension_numbers = #tpu.dot_dimension_numbers<[1], [1], [0], [0], [0, 0, 1, 0], [], []>} : vector<6x6xf32>, vector<6x6xf32>, vector<6x6xf32> -> vector<6x6xf32>
    %cst_244 = arith.constant 0.377964467 : f32
    %544 = vector.broadcast %cst_244 : f32 to vector<6x6xf32>
    %545 = arith.mulf %543, %544 : vector<6x6xf32>
    %cst_245 = arith.constant dense<0xFF800000> : vector<6xf32>
    %546 = vector.multi_reduction <maximumf>, %545, %cst_245 [1] : vector<6x6xf32> to vector<6xf32>
    %547 = vector.shape_cast %546 : vector<6xf32> to vector<6x1xf32>
    %548 = vector.broadcast %547 : vector<6x1xf32> to vector<6x6xf32>
    %549 = arith.subf %545, %548 : vector<6x6xf32>
    %550 = math.exp %549 : vector<6x6xf32>
    %cst_246 = arith.constant dense<0.000000e+00> : vector<6xf32>
    %551 = vector.multi_reduction <add>, %550, %cst_246 [1] : vector<6x6xf32> to vector<6xf32>
    %552 = vector.shape_cast %551 : vector<6xf32> to vector<6x1xf32>
    %553 = vector.broadcast %552 : vector<6x1xf32> to vector<6x6xf32>
    %554 = arith.divf %550, %553 : vector<6x6xf32>
    %cst_247 = arith.constant dense<0.000000e+00> : vector<6x6xf32>
    %555 = tpu.matmul %554, %542, %cst_247 {dimension_numbers = #tpu.dot_dimension_numbers<[1], [0], [0], [1], [0, 0, 1, 1], [], []>} : vector<6x6xf32>, vector<6x6xf32>, vector<6x6xf32> -> vector<6x6xf32>
    %556 = arith.index_cast %c27_i32 : i32 to index
    %c0_248 = arith.constant 0 : index
    %c0_249 = arith.constant 0 : index
    %557 = vector.load %arg2[%556, %c0_248, %c0_249] : memref<35x6x6xf32, #tpu.memory_space<vmem>>, vector<1x6x6xf32>
    %558 = vector.shape_cast %557 : vector<1x6x6xf32> to vector<6x6xf32>
    %559 = vector.shape_cast %555 : vector<6x6xf32> to vector<1x6x6xf32>
    tpu.vector_store %arg2[%556, %c0_248, %c0_249], %559 {strides = array<i32>} : memref<35x6x6xf32, #tpu.memory_space<vmem>>, vector<1x6x6xf32>,
    %c28_i32 = arith.constant 28 : i32
    %560 = arith.index_cast %c28_i32 : i32 to index
    %c0_250 = arith.constant 0 : index
    %c0_251 = arith.constant 0 : index
    %561 = vector.load %arg1[%560, %c0_250, %c0_251] : memref<35x6x6xf32, #tpu.memory_space<vmem>>, vector<1x6x6xf32>
    %562 = vector.shape_cast %561 : vector<1x6x6xf32> to vector<6x6xf32>
    %cst_252 = arith.constant dense<0.000000e+00> : vector<6x6xf32>
    %563 = tpu.matmul %562, %562, %cst_252 {dimension_numbers = #tpu.dot_dimension_numbers<[1], [1], [0], [0], [0, 0, 1, 0], [], []>} : vector<6x6xf32>, vector<6x6xf32>, vector<6x6xf32> -> vector<6x6xf32>
    %cst_253 = arith.constant 0.377964467 : f32
    %564 = vector.broadcast %cst_253 : f32 to vector<6x6xf32>
    %565 = arith.mulf %563, %564 : vector<6x6xf32>
    %cst_254 = arith.constant dense<0xFF800000> : vector<6xf32>
    %566 = vector.multi_reduction <maximumf>, %565, %cst_254 [1] : vector<6x6xf32> to vector<6xf32>
    %567 = vector.shape_cast %566 : vector<6xf32> to vector<6x1xf32>
    %568 = vector.broadcast %567 : vector<6x1xf32> to vector<6x6xf32>
    %569 = arith.subf %565, %568 : vector<6x6xf32>
    %570 = math.exp %569 : vector<6x6xf32>
    %cst_255 = arith.constant dense<0.000000e+00> : vector<6xf32>
    %571 = vector.multi_reduction <add>, %570, %cst_255 [1] : vector<6x6xf32> to vector<6xf32>
    %572 = vector.shape_cast %571 : vector<6xf32> to vector<6x1xf32>
    %573 = vector.broadcast %572 : vector<6x1xf32> to vector<6x6xf32>
    %574 = arith.divf %570, %573 : vector<6x6xf32>
    %cst_256 = arith.constant dense<0.000000e+00> : vector<6x6xf32>
    %575 = tpu.matmul %574, %562, %cst_256 {dimension_numbers = #tpu.dot_dimension_numbers<[1], [0], [0], [1], [0, 0, 1, 1], [], []>} : vector<6x6xf32>, vector<6x6xf32>, vector<6x6xf32> -> vector<6x6xf32>
    %576 = arith.index_cast %c28_i32 : i32 to index
    %c0_257 = arith.constant 0 : index
    %c0_258 = arith.constant 0 : index
    %577 = vector.load %arg2[%576, %c0_257, %c0_258] : memref<35x6x6xf32, #tpu.memory_space<vmem>>, vector<1x6x6xf32>
    %578 = vector.shape_cast %577 : vector<1x6x6xf32> to vector<6x6xf32>
    %579 = vector.shape_cast %575 : vector<6x6xf32> to vector<1x6x6xf32>
    tpu.vector_store %arg2[%576, %c0_257, %c0_258], %579 {strides = array<i32>} : memref<35x6x6xf32, #tpu.memory_space<vmem>>, vector<1x6x6xf32>,
    %c29_i32 = arith.constant 29 : i32
    %580 = arith.index_cast %c29_i32 : i32 to index
    %c0_259 = arith.constant 0 : index
    %c0_260 = arith.constant 0 : index
    %581 = vector.load %arg1[%580, %c0_259, %c0_260] : memref<35x6x6xf32, #tpu.memory_space<vmem>>, vector<1x6x6xf32>
    %582 = vector.shape_cast %581 : vector<1x6x6xf32> to vector<6x6xf32>
    %cst_261 = arith.constant dense<0.000000e+00> : vector<6x6xf32>
    %583 = tpu.matmul %582, %582, %cst_261 {dimension_numbers = #tpu.dot_dimension_numbers<[1], [1], [0], [0], [0, 0, 1, 0], [], []>} : vector<6x6xf32>, vector<6x6xf32>, vector<6x6xf32> -> vector<6x6xf32>
    %cst_262 = arith.constant 0.377964467 : f32
    %584 = vector.broadcast %cst_262 : f32 to vector<6x6xf32>
    %585 = arith.mulf %583, %584 : vector<6x6xf32>
    %cst_263 = arith.constant dense<0xFF800000> : vector<6xf32>
    %586 = vector.multi_reduction <maximumf>, %585, %cst_263 [1] : vector<6x6xf32> to vector<6xf32>
    %587 = vector.shape_cast %586 : vector<6xf32> to vector<6x1xf32>
    %588 = vector.broadcast %587 : vector<6x1xf32> to vector<6x6xf32>
    %589 = arith.subf %585, %588 : vector<6x6xf32>
    %590 = math.exp %589 : vector<6x6xf32>
    %cst_264 = arith.constant dense<0.000000e+00> : vector<6xf32>
    %591 = vector.multi_reduction <add>, %590, %cst_264 [1] : vector<6x6xf32> to vector<6xf32>
    %592 = vector.shape_cast %591 : vector<6xf32> to vector<6x1xf32>
    %593 = vector.broadcast %592 : vector<6x1xf32> to vector<6x6xf32>
    %594 = arith.divf %590, %593 : vector<6x6xf32>
    %cst_265 = arith.constant dense<0.000000e+00> : vector<6x6xf32>
    %595 = tpu.matmul %594, %582, %cst_265 {dimension_numbers = #tpu.dot_dimension_numbers<[1], [0], [0], [1], [0, 0, 1, 1], [], []>} : vector<6x6xf32>, vector<6x6xf32>, vector<6x6xf32> -> vector<6x6xf32>
    %596 = arith.index_cast %c29_i32 : i32 to index
    %c0_266 = arith.constant 0 : index
    %c0_267 = arith.constant 0 : index
    %597 = vector.load %arg2[%596, %c0_266, %c0_267] : memref<35x6x6xf32, #tpu.memory_space<vmem>>, vector<1x6x6xf32>
    %598 = vector.shape_cast %597 : vector<1x6x6xf32> to vector<6x6xf32>
    %599 = vector.shape_cast %595 : vector<6x6xf32> to vector<1x6x6xf32>
    tpu.vector_store %arg2[%596, %c0_266, %c0_267], %599 {strides = array<i32>} : memref<35x6x6xf32, #tpu.memory_space<vmem>>, vector<1x6x6xf32>,
    %c30_i32 = arith.constant 30 : i32
    %600 = arith.index_cast %c30_i32 : i32 to index
    %c0_268 = arith.constant 0 : index
    %c0_269 = arith.constant 0 : index
    %601 = vector.load %arg1[%600, %c0_268, %c0_269] : memref<35x6x6xf32, #tpu.memory_space<vmem>>, vector<1x6x6xf32>
    %602 = vector.shape_cast %601 : vector<1x6x6xf32> to vector<6x6xf32>
    %cst_270 = arith.constant dense<0.000000e+00> : vector<6x6xf32>
    %603 = tpu.matmul %602, %602, %cst_270 {dimension_numbers = #tpu.dot_dimension_numbers<[1], [1], [0], [0], [0, 0, 1, 0], [], []>} : vector<6x6xf32>, vector<6x6xf32>, vector<6x6xf32> -> vector<6x6xf32>
    %cst_271 = arith.constant 0.377964467 : f32
    %604 = vector.broadcast %cst_271 : f32 to vector<6x6xf32>
    %605 = arith.mulf %603, %604 : vector<6x6xf32>
    %cst_272 = arith.constant dense<0xFF800000> : vector<6xf32>
    %606 = vector.multi_reduction <maximumf>, %605, %cst_272 [1] : vector<6x6xf32> to vector<6xf32>
    %607 = vector.shape_cast %606 : vector<6xf32> to vector<6x1xf32>
    %608 = vector.broadcast %607 : vector<6x1xf32> to vector<6x6xf32>
    %609 = arith.subf %605, %608 : vector<6x6xf32>
    %610 = math.exp %609 : vector<6x6xf32>
    %cst_273 = arith.constant dense<0.000000e+00> : vector<6xf32>
    %611 = vector.multi_reduction <add>, %610, %cst_273 [1] : vector<6x6xf32> to vector<6xf32>
    %612 = vector.shape_cast %611 : vector<6xf32> to vector<6x1xf32>
    %613 = vector.broadcast %612 : vector<6x1xf32> to vector<6x6xf32>
    %614 = arith.divf %610, %613 : vector<6x6xf32>
    %cst_274 = arith.constant dense<0.000000e+00> : vector<6x6xf32>
    %615 = tpu.matmul %614, %602, %cst_274 {dimension_numbers = #tpu.dot_dimension_numbers<[1], [0], [0], [1], [0, 0, 1, 1], [], []>} : vector<6x6xf32>, vector<6x6xf32>, vector<6x6xf32> -> vector<6x6xf32>
    %616 = arith.index_cast %c30_i32 : i32 to index
    %c0_275 = arith.constant 0 : index
    %c0_276 = arith.constant 0 : index
    %617 = vector.load %arg2[%616, %c0_275, %c0_276] : memref<35x6x6xf32, #tpu.memory_space<vmem>>, vector<1x6x6xf32>
    %618 = vector.shape_cast %617 : vector<1x6x6xf32> to vector<6x6xf32>
    %619 = vector.shape_cast %615 : vector<6x6xf32> to vector<1x6x6xf32>
    tpu.vector_store %arg2[%616, %c0_275, %c0_276], %619 {strides = array<i32>} : memref<35x6x6xf32, #tpu.memory_space<vmem>>, vector<1x6x6xf32>,
    %c31_i32 = arith.constant 31 : i32
    %620 = arith.index_cast %c31_i32 : i32 to index
    %c0_277 = arith.constant 0 : index
    %c0_278 = arith.constant 0 : index
    %621 = vector.load %arg1[%620, %c0_277, %c0_278] : memref<35x6x6xf32, #tpu.memory_space<vmem>>, vector<1x6x6xf32>
    %622 = vector.shape_cast %621 : vector<1x6x6xf32> to vector<6x6xf32>
    %cst_279 = arith.constant dense<0.000000e+00> : vector<6x6xf32>
    %623 = tpu.matmul %622, %622, %cst_279 {dimension_numbers = #tpu.dot_dimension_numbers<[1], [1], [0], [0], [0, 0, 1, 0], [], []>} : vector<6x6xf32>, vector<6x6xf32>, vector<6x6xf32> -> vector<6x6xf32>
    %cst_280 = arith.constant 0.377964467 : f32
    %624 = vector.broadcast %cst_280 : f32 to vector<6x6xf32>
    %625 = arith.mulf %623, %624 : vector<6x6xf32>
    %cst_281 = arith.constant dense<0xFF800000> : vector<6xf32>
    %626 = vector.multi_reduction <maximumf>, %625, %cst_281 [1] : vector<6x6xf32> to vector<6xf32>
    %627 = vector.shape_cast %626 : vector<6xf32> to vector<6x1xf32>
    %628 = vector.broadcast %627 : vector<6x1xf32> to vector<6x6xf32>
    %629 = arith.subf %625, %628 : vector<6x6xf32>
    %630 = math.exp %629 : vector<6x6xf32>
    %cst_282 = arith.constant dense<0.000000e+00> : vector<6xf32>
    %631 = vector.multi_reduction <add>, %630, %cst_282 [1] : vector<6x6xf32> to vector<6xf32>
    %632 = vector.shape_cast %631 : vector<6xf32> to vector<6x1xf32>
    %633 = vector.broadcast %632 : vector<6x1xf32> to vector<6x6xf32>
    %634 = arith.divf %630, %633 : vector<6x6xf32>
    %cst_283 = arith.constant dense<0.000000e+00> : vector<6x6xf32>
    %635 = tpu.matmul %634, %622, %cst_283 {dimension_numbers = #tpu.dot_dimension_numbers<[1], [0], [0], [1], [0, 0, 1, 1], [], []>} : vector<6x6xf32>, vector<6x6xf32>, vector<6x6xf32> -> vector<6x6xf32>
    %636 = arith.index_cast %c31_i32 : i32 to index
    %c0_284 = arith.constant 0 : index
    %c0_285 = arith.constant 0 : index
    %637 = vector.load %arg2[%636, %c0_284, %c0_285] : memref<35x6x6xf32, #tpu.memory_space<vmem>>, vector<1x6x6xf32>
    %638 = vector.shape_cast %637 : vector<1x6x6xf32> to vector<6x6xf32>
    %639 = vector.shape_cast %635 : vector<6x6xf32> to vector<1x6x6xf32>
    tpu.vector_store %arg2[%636, %c0_284, %c0_285], %639 {strides = array<i32>} : memref<35x6x6xf32, #tpu.memory_space<vmem>>, vector<1x6x6xf32>,
    %c32_i32 = arith.constant 32 : i32
    %640 = arith.index_cast %c32_i32 : i32 to index
    %c0_286 = arith.constant 0 : index
    %c0_287 = arith.constant 0 : index
    %641 = vector.load %arg1[%640, %c0_286, %c0_287] : memref<35x6x6xf32, #tpu.memory_space<vmem>>, vector<1x6x6xf32>
    %642 = vector.shape_cast %641 : vector<1x6x6xf32> to vector<6x6xf32>
    %cst_288 = arith.constant dense<0.000000e+00> : vector<6x6xf32>
    %643 = tpu.matmul %642, %642, %cst_288 {dimension_numbers = #tpu.dot_dimension_numbers<[1], [1], [0], [0], [0, 0, 1, 0], [], []>} : vector<6x6xf32>, vector<6x6xf32>, vector<6x6xf32> -> vector<6x6xf32>
    %cst_289 = arith.constant 0.377964467 : f32
    %644 = vector.broadcast %cst_289 : f32 to vector<6x6xf32>
    %645 = arith.mulf %643, %644 : vector<6x6xf32>
    %cst_290 = arith.constant dense<0xFF800000> : vector<6xf32>
    %646 = vector.multi_reduction <maximumf>, %645, %cst_290 [1] : vector<6x6xf32> to vector<6xf32>
    %647 = vector.shape_cast %646 : vector<6xf32> to vector<6x1xf32>
    %648 = vector.broadcast %647 : vector<6x1xf32> to vector<6x6xf32>
    %649 = arith.subf %645, %648 : vector<6x6xf32>
    %650 = math.exp %649 : vector<6x6xf32>
    %cst_291 = arith.constant dense<0.000000e+00> : vector<6xf32>
    %651 = vector.multi_reduction <add>, %650, %cst_291 [1] : vector<6x6xf32> to vector<6xf32>
    %652 = vector.shape_cast %651 : vector<6xf32> to vector<6x1xf32>
    %653 = vector.broadcast %652 : vector<6x1xf32> to vector<6x6xf32>
    %654 = arith.divf %650, %653 : vector<6x6xf32>
    %cst_292 = arith.constant dense<0.000000e+00> : vector<6x6xf32>
    %655 = tpu.matmul %654, %642, %cst_292 {dimension_numbers = #tpu.dot_dimension_numbers<[1], [0], [0], [1], [0, 0, 1, 1], [], []>} : vector<6x6xf32>, vector<6x6xf32>, vector<6x6xf32> -> vector<6x6xf32>
    %656 = arith.index_cast %c32_i32 : i32 to index
    %c0_293 = arith.constant 0 : index
    %c0_294 = arith.constant 0 : index
    %657 = vector.load %arg2[%656, %c0_293, %c0_294] : memref<35x6x6xf32, #tpu.memory_space<vmem>>, vector<1x6x6xf32>
    %658 = vector.shape_cast %657 : vector<1x6x6xf32> to vector<6x6xf32>
    %659 = vector.shape_cast %655 : vector<6x6xf32> to vector<1x6x6xf32>
    tpu.vector_store %arg2[%656, %c0_293, %c0_294], %659 {strides = array<i32>} : memref<35x6x6xf32, #tpu.memory_space<vmem>>, vector<1x6x6xf32>,
    %c33_i32 = arith.constant 33 : i32
    %660 = arith.index_cast %c33_i32 : i32 to index
    %c0_295 = arith.constant 0 : index
    %c0_296 = arith.constant 0 : index
    %661 = vector.load %arg1[%660, %c0_295, %c0_296] : memref<35x6x6xf32, #tpu.memory_space<vmem>>, vector<1x6x6xf32>
    %662 = vector.shape_cast %661 : vector<1x6x6xf32> to vector<6x6xf32>
    %cst_297 = arith.constant dense<0.000000e+00> : vector<6x6xf32>
    %663 = tpu.matmul %662, %662, %cst_297 {dimension_numbers = #tpu.dot_dimension_numbers<[1], [1], [0], [0], [0, 0, 1, 0], [], []>} : vector<6x6xf32>, vector<6x6xf32>, vector<6x6xf32> -> vector<6x6xf32>
    %cst_298 = arith.constant 0.377964467 : f32
    %664 = vector.broadcast %cst_298 : f32 to vector<6x6xf32>
    %665 = arith.mulf %663, %664 : vector<6x6xf32>
    %cst_299 = arith.constant dense<0xFF800000> : vector<6xf32>
    %666 = vector.multi_reduction <maximumf>, %665, %cst_299 [1] : vector<6x6xf32> to vector<6xf32>
    %667 = vector.shape_cast %666 : vector<6xf32> to vector<6x1xf32>
    %668 = vector.broadcast %667 : vector<6x1xf32> to vector<6x6xf32>
    %669 = arith.subf %665, %668 : vector<6x6xf32>
    %670 = math.exp %669 : vector<6x6xf32>
    %cst_300 = arith.constant dense<0.000000e+00> : vector<6xf32>
    %671 = vector.multi_reduction <add>, %670, %cst_300 [1] : vector<6x6xf32> to vector<6xf32>
    %672 = vector.shape_cast %671 : vector<6xf32> to vector<6x1xf32>
    %673 = vector.broadcast %672 : vector<6x1xf32> to vector<6x6xf32>
    %674 = arith.divf %670, %673 : vector<6x6xf32>
    %cst_301 = arith.constant dense<0.000000e+00> : vector<6x6xf32>
    %675 = tpu.matmul %674, %662, %cst_301 {dimension_numbers = #tpu.dot_dimension_numbers<[1], [0], [0], [1], [0, 0, 1, 1], [], []>} : vector<6x6xf32>, vector<6x6xf32>, vector<6x6xf32> -> vector<6x6xf32>
    %676 = arith.index_cast %c33_i32 : i32 to index
    %c0_302 = arith.constant 0 : index
    %c0_303 = arith.constant 0 : index
    %677 = vector.load %arg2[%676, %c0_302, %c0_303] : memref<35x6x6xf32, #tpu.memory_space<vmem>>, vector<1x6x6xf32>
    %678 = vector.shape_cast %677 : vector<1x6x6xf32> to vector<6x6xf32>
    %679 = vector.shape_cast %675 : vector<6x6xf32> to vector<1x6x6xf32>
    tpu.vector_store %arg2[%676, %c0_302, %c0_303], %679 {strides = array<i32>} : memref<35x6x6xf32, #tpu.memory_space<vmem>>, vector<1x6x6xf32>,
    %c34_i32 = arith.constant 34 : i32
    %680 = arith.index_cast %c34_i32 : i32 to index
    %c0_304 = arith.constant 0 : index
    %c0_305 = arith.constant 0 : index
    %681 = vector.load %arg1[%680, %c0_304, %c0_305] : memref<35x6x6xf32, #tpu.memory_space<vmem>>, vector<1x6x6xf32>
    %682 = vector.shape_cast %681 : vector<1x6x6xf32> to vector<6x6xf32>
    %cst_306 = arith.constant dense<0.000000e+00> : vector<6x6xf32>
    %683 = tpu.matmul %682, %682, %cst_306 {dimension_numbers = #tpu.dot_dimension_numbers<[1], [1], [0], [0], [0, 0, 1, 0], [], []>} : vector<6x6xf32>, vector<6x6xf32>, vector<6x6xf32> -> vector<6x6xf32>
    %cst_307 = arith.constant 0.377964467 : f32
    %684 = vector.broadcast %cst_307 : f32 to vector<6x6xf32>
    %685 = arith.mulf %683, %684 : vector<6x6xf32>
    %cst_308 = arith.constant dense<0xFF800000> : vector<6xf32>
    %686 = vector.multi_reduction <maximumf>, %685, %cst_308 [1] : vector<6x6xf32> to vector<6xf32>
    %687 = vector.shape_cast %686 : vector<6xf32> to vector<6x1xf32>
    %688 = vector.broadcast %687 : vector<6x1xf32> to vector<6x6xf32>
    %689 = arith.subf %685, %688 : vector<6x6xf32>
    %690 = math.exp %689 : vector<6x6xf32>
    %cst_309 = arith.constant dense<0.000000e+00> : vector<6xf32>
    %691 = vector.multi_reduction <add>, %690, %cst_309 [1] : vector<6x6xf32> to vector<6xf32>
    %692 = vector.shape_cast %691 : vector<6xf32> to vector<6x1xf32>
    %693 = vector.broadcast %692 : vector<6x1xf32> to vector<6x6xf32>
    %694 = arith.divf %690, %693 : vector<6x6xf32>
    %cst_310 = arith.constant dense<0.000000e+00> : vector<6x6xf32>
    %695 = tpu.matmul %694, %682, %cst_310 {dimension_numbers = #tpu.dot_dimension_numbers<[1], [0], [0], [1], [0, 0, 1, 1], [], []>} : vector<6x6xf32>, vector<6x6xf32>, vector<6x6xf32> -> vector<6x6xf32>
    %696 = arith.index_cast %c34_i32 : i32 to index
    %c0_311 = arith.constant 0 : index
    %c0_312 = arith.constant 0 : index
    %697 = vector.load %arg2[%696, %c0_311, %c0_312] : memref<35x6x6xf32, #tpu.memory_space<vmem>>, vector<1x6x6xf32>
    %698 = vector.shape_cast %697 : vector<1x6x6xf32> to vector<6x6xf32>
    %699 = vector.shape_cast %695 : vector<6x6xf32> to vector<1x6x6xf32>
    tpu.vector_store %arg2[%696, %c0_311, %c0_312], %699 {strides = array<i32>} : memref<35x6x6xf32, #tpu.memory_space<vmem>>, vector<1x6x6xf32>,
    %c35_i32 = arith.constant 35 : i32
    return
  }
  func.func @transform_0(%arg0: i32) -> (i32, i32, i32) {
    %c0_i32 = arith.constant 0 : i32
    %c0_i32_0 = arith.constant 0 : i32
    %c0_i32_1 = arith.constant 0 : i32
    %c0_i32_2 = arith.constant 0 : i32
    return %c0_i32, %c0_i32_0, %c0_i32_1 : i32, i32, i32
  }
  func.func @transform_1(%arg0: i32) -> (i32, i32, i32) {
    %c0_i32 = arith.constant 0 : i32
    %c0_i32_0 = arith.constant 0 : i32
    %c0_i32_1 = arith.constant 0 : i32
    %c0_i32_2 = arith.constant 0 : i32
    return %c0_i32, %c0_i32_0, %c0_i32_1 : i32, i32, i32
  }
}

</mosaic_0001>

<bundles_post_ra>
// kernel: tpu_custom_call.1
= control target key start
LH: loop header
LB: loop body
LE: loop exit
PB: predicated region body
PF: predicated region fallthrough
CT: control target
= control target key end

     0   :  { %vm9_vm0 = vcmask 48128   ;;  %v6626_v0 = vmov 0.0   ;;  %vm6627_vm1 = vmmov 0   ;;  %vm84_vm2 = vcmask 46080   ;;  %s7674_s0 = inlined_call_operand.vmem [shape: f32[35,6,6], index: 0, kind: input, shape index: {}]   ;;  %s7675_s1 = inlined_call_operand.vmem [shape: f32[35,6,6], index: 1, kind: output, shape index: {}]  }
   0x1   :  { %6101 = vmatprep.subr.mxu0 %v6626_v0  ;;  %v8_v1 = vld [vmem:[%s7674_s0] sm:$0x3f]  ;;  %6103 = vmatprep.mubr.msk.f32.mxu0 %vm6627_vm1, %v6626_v0  ;;  %vm99_vm3 = vcmask 1045504   ;;  %v5757_v11 = vld [vmem:[%s7674_s0 + $0x8] sm:$0x3f] }
   0x2   :  { %6102 = vmatpush3.xpose.msk.msra.mxu0 %vm9_vm0, %v8_v1  ;;  %6106 = vmatprep.subr.mxu1 %v6626_v0  ;;  %v5763_v15 = vld [vmem:[%s7674_s0 + $0x10] sm:$0x3f]  ;;  %v5769_v16 = vld [vmem:[%s7674_s0 + $0x18] sm:$0x3f]  ;;  %v5775_v17 = vld [vmem:[%s7674_s0 + $0x20] sm:$0x3f] }
   0x3   :  { %6108 = vmatprep.mubr.msk.f32.mxu1 %vm6627_vm1, %v6626_v0  ;;  %6116 = vmatprep.subr.mxu0 %v6626_v0  ;;  %v5781_v18 = vld [vmem:[%s7674_s0 + $0x28] sm:$0x3f]  ;;  %v5787_v19 = vld [vmem:[%s7674_s0 + $0x30] sm:$0x3f]  ;;  %v5793_v20 = vld [vmem:[%s7674_s0 + $0x38] sm:$0x3f] }
   0x4   :  { %6107 = vmatpush3.msk.msra.mxu1 %vm99_vm3, %v8_v1  ;;  %v5799_v21 = vld [vmem:[%s7674_s0 + $0x40] sm:$0x3f]  ;;  %v5805_v22 = vld [vmem:[%s7674_s0 + $0x48] sm:$0x3f]  ;;  %v5811_v23 = vld [vmem:[%s7674_s0 + $0x50] sm:$0x3f] }
   0x5   :  { %6104 = vmatmul.mubr.msk.f32.vlgmr.msra.gmra.mrb[0].mxu0 %vm9_vm0, %v8_v1  ;;  %6111 = vmatprep.subr.mxu1 %v6626_v0  ;;  %v5817_v24 = vld [vmem:[%s7674_s0 + $0x58] sm:$0x3f]  ;;  %v5823_v25 = vld [vmem:[%s7674_s0 + $0x60] sm:$0x3f]  ;;  %v5829_v26 = vld [vmem:[%s7674_s0 + $0x68] sm:$0x3f] }
   0x6   :  { %6118 = vmatprep.mubr.msk.f32.mxu0 %vm6627_vm1, %v6626_v0  ;;  %6117 = vmatpush3.msk.msra.mxu0 %vm99_vm3, %v5757_v11  ;;  %v5835_v27 = vld [vmem:[%s7674_s0 + $0x70] sm:$0x3f]  ;;  %v5841_v28 = vld [vmem:[%s7674_s0 + $0x78] sm:$0x3f]  ;;  %v5847_v29 = vld [vmem:[%s7674_s0 + $0x80] sm:$0x3f] }
   0x7   :  { %6126 = vmatprep.subr.mxu0 %v6626_v0  ;;  %v5853_v30 = vld [vmem:[%s7674_s0 + $0x88] sm:$0x3f]  ;;  %v5859_v31 = vld [vmem:[%s7674_s0 + $0x90] sm:$0x3f]  ;;  %v5865_v32 = vld [vmem:[%s7674_s0 + $0x98] sm:$0x3f] }
   0x8   :  { %v5871_v33 = vld [vmem:[%s7674_s0 + $0xa0] sm:$0x3f]  ;;  %v5877_v34 = vld [vmem:[%s7674_s0 + $0xa8] sm:$0x3f]  ;;  %v5883_v35 = vld [vmem:[%s7674_s0 + $0xb0] sm:$0x3f] }
   0x9   :  { %v5889_v36 = vld [vmem:[%s7674_s0 + $0xb8] sm:$0x3f]  ;;  %v5895_v37 = vld [vmem:[%s7674_s0 + $0xc0] sm:$0x3f]  ;;  %v5901_v38 = vld [vmem:[%s7674_s0 + $0xc8] sm:$0x3f] }
   0xa   :  { %v5907_v39 = vld [vmem:[%s7674_s0 + $0xd0] sm:$0x3f]  ;;  %v5913_v40 = vld [vmem:[%s7674_s0 + $0xd8] sm:$0x3f]  ;;  %v5919_v41 = vld [vmem:[%s7674_s0 + $0xe0] sm:$0x3f] }
   0xb   :  { %v5925_v42 = vld [vmem:[%s7674_s0 + $0xe8] sm:$0x3f]  ;;  %v5931_v43 = vld [vmem:[%s7674_s0 + $0xf0] sm:$0x3f]  ;;  %v5937_v44 = vld [vmem:[%s7674_s0 + $0xf8] sm:$0x3f] }
   0xc   :  { %v5943_v45 = vld [vmem:[%s7674_s0 + $0x100] sm:$0x3f]  ;;  %v5949_v46 = vld [vmem:[%s7674_s0 + $0x108] sm:$0x3f]  ;;  %v5955_v47 = vld [vmem:[%s7674_s0 + $0x110] sm:$0x3f] }
  0xd8   :  { %v79_v2 = vpop.f32.mrb[0].mxu0 }
  0xd9   :  { %v83_v3 = vmul.f32 0.37796447, %v79_v2  ;;  %v6105_v4 = vpop.f32.mrb[1].mxu0 }
  0xdb   :  { %v85_v5 = vsel %vm84_vm2, %v83_v3, -inf }
  0xdc   :  { %86 = vmax.xlane.f32.xlu0 %v85_v5 }
 0x169   :  { %v87_v6 = vpop.xlane.xlu0 %86 }
 0x16a   :  { %v88_v7 = vsub.f32 %v83_v3, %v87_v6 }
 0x16c   :  { %v89_v8 = vmul.f32 1.442695, %v88_v7 }
 0x16e   :  { %6453 = vpow2.f32 %v89_v8 }
 0x178   :  { %v6454_v9 = vpop.eup %6453 }
 0x179   :  { %v91_v10 = vsel %vm84_vm2, %v6454_v9, 0.0 }
 0x17a   :  { %92 = vadd.xlane.f32.xlu0 %v91_v10 }
 0x207   :  { %v93_v12 = vpop.xlane.xlu0 %92 }
 0x208   :  { %6455 = vrcp.f32 %v93_v12 }
 0x212   :  { %v6456_v13 = vpop.eup %6455 }
 0x213   :  { %v95_v14 = vmul.f32 %v6456_v13, %v6454_v9 }
 0x215   :  { %6109 = vmatmul.mubr.msk.f32.vlgmr.msra.gmra.mrb[0].mxu1 %vm9_vm0, %v95_v14 }
 0x216   :  { %6112 = vmatpush3.xpose.msk.msra.mxu1 %vm9_vm0, %v5757_v11  ;;  %6113 = vmatprep.mubr.msk.f32.mxu1 %vm6627_vm1, %v6626_v0 }
 0x217   :  { %6121 = vmatprep.subr.mxu1 %v6626_v0 }
 0x219   :  { %6114 = vmatmul.mubr.msk.f32.vlgmr.msra.gmra.mrb[2].mxu1 %vm9_vm0, %v5757_v11 }
 0x21a   :  { %6122 = vmatpush3.xpose.msk.msra.mxu1 %vm9_vm0, %v5763_v15  ;;  %6123 = vmatprep.mubr.msk.f32.mxu1 %vm6627_vm1, %v6626_v0 }
 0x21b   :  { %6131 = vmatprep.subr.mxu1 %v6626_v0 }
 0x21d   :  { %6124 = vmatmul.mubr.msk.f32.vlgmr.msra.gmra.mrb[4].mxu1 %vm9_vm0, %v5763_v15 }
 0x21e   :  { %6132 = vmatpush3.xpose.msk.msra.mxu1 %vm9_vm0, %v5769_v16  ;;  %6133 = vmatprep.mubr.msk.f32.mxu1 %vm6627_vm1, %v6626_v0 }
 0x21f   :  { %6141 = vmatprep.subr.mxu1 %v6626_v0 }
 0x221   :  { %6134 = vmatmul.mubr.msk.f32.vlgmr.msra.gmra.mrb[6].mxu1 %vm9_vm0, %v5769_v16 }
 0x222   :  { %6142 = vmatpush3.xpose.msk.msra.mxu1 %vm9_vm0, %v5775_v17  ;;  %6143 = vmatprep.mubr.msk.f32.mxu1 %vm6627_vm1, %v6626_v0 }
 0x223   :  { %6151 = vmatprep.subr.mxu1 %v6626_v0 }
 0x225   :  { %6144 = vmatmul.mubr.msk.f32.vlgmr.msra.gmra.mrb[8].mxu1 %vm9_vm0, %v5775_v17 }
 0x226   :  { %6152 = vmatpush3.xpose.msk.msra.mxu1 %vm9_vm0, %v5781_v18  ;;  %6153 = vmatprep.mubr.msk.f32.mxu1 %vm6627_vm1, %v6626_v0 }
 0x227   :  { %6161 = vmatprep.subr.mxu1 %v6626_v0 }
 0x229   :  { %6154 = vmatmul.mubr.msk.f32.vlgmr.msra.gmra.mrb[10].mxu1 %vm9_vm0, %v5781_v18 }
 0x22a   :  { %6162 = vmatpush3.xpose.msk.msra.mxu1 %vm9_vm0, %v5787_v19  ;;  %6163 = vmatprep.mubr.msk.f32.mxu1 %vm6627_vm1, %v6626_v0 }
 0x22b   :  { %6171 = vmatprep.subr.mxu1 %v6626_v0 }
 0x22d   :  { %6164 = vmatmul.mubr.msk.f32.vlgmr.msra.gmra.mrb[12].mxu1 %vm9_vm0, %v5787_v19 }
 0x22e   :  { %6172 = vmatpush3.xpose.msk.msra.mxu1 %vm9_vm0, %v5793_v20  ;;  %6173 = vmatprep.mubr.msk.f32.mxu1 %vm6627_vm1, %v6626_v0 }
 0x22f   :  { %6181 = vmatprep.subr.mxu1 %v6626_v0 }
 0x231   :  { %6174 = vmatmul.mubr.msk.f32.vlgmr.msra.gmra.mrb[14].mxu1 %vm9_vm0, %v5793_v20 }
 0x232   :  { %6182 = vmatpush3.xpose.msk.msra.mxu1 %vm9_vm0, %v5799_v21  ;;  %6183 = vmatprep.mubr.msk.f32.mxu1 %vm6627_vm1, %v6626_v0 }
 0x233   :  { %6191 = vmatprep.subr.mxu1 %v6626_v0 }
 0x235   :  { %6184 = vmatmul.mubr.msk.f32.vlgmr.msra.gmra.mrb[16].mxu1 %vm9_vm0, %v5799_v21 }
 0x236   :  { %6192 = vmatpush3.xpose.msk.msra.mxu1 %vm9_vm0, %v5805_v22  ;;  %6193 = vmatprep.mubr.msk.f32.mxu1 %vm6627_vm1, %v6626_v0 }
 0x237   :  { %6201 = vmatprep.subr.mxu1 %v6626_v0 }
 0x239   :  { %6194 = vmatmul.mubr.msk.f32.vlgmr.msra.gmra.mrb[18].mxu1 %vm9_vm0, %v5805_v22 }
 0x23a   :  { %6202 = vmatpush3.xpose.msk.msra.mxu1 %vm9_vm0, %v5811_v23  ;;  %6203 = vmatprep.mubr.msk.f32.mxu1 %vm6627_vm1, %v6626_v0 }
 0x23b   :  { %6211 = vmatprep.subr.mxu1 %v6626_v0 }
 0x23d   :  { %6204 = vmatmul.mubr.msk.f32.vlgmr.msra.gmra.mrb[20].mxu1 %vm9_vm0, %v5811_v23 }
 0x23e   :  { %6212 = vmatpush3.xpose.msk.msra.mxu1 %vm9_vm0, %v5817_v24  ;;  %6213 = vmatprep.mubr.msk.f32.mxu1 %vm6627_vm1, %v6626_v0 }
 0x23f   :  { %6221 = vmatprep.subr.mxu1 %v6626_v0 }
 0x241   :  { %6214 = vmatmul.mubr.msk.f32.vlgmr.msra.gmra.mrb[22].mxu1 %vm9_vm0, %v5817_v24 }
 0x242   :  { %6222 = vmatpush3.xpose.msk.msra.mxu1 %vm9_vm0, %v5823_v25  ;;  %6223 = vmatprep.mubr.msk.f32.mxu1 %vm6627_vm1, %v6626_v0 }
 0x243   :  { %6231 = vmatprep.subr.mxu1 %v6626_v0 }
 0x245   :  { %6224 = vmatmul.mubr.msk.f32.vlgmr.msra.gmra.mrb[24].mxu1 %vm9_vm0, %v5823_v25 }
 0x246   :  { %6232 = vmatpush3.xpose.msk.msra.mxu1 %vm9_vm0, %v5829_v26  ;;  %6233 = vmatprep.mubr.msk.f32.mxu1 %vm6627_vm1, %v6626_v0 }
 0x247   :  { %6241 = vmatprep.subr.mxu1 %v6626_v0 }
 0x249   :  { %6234 = vmatmul.mubr.msk.f32.vlgmr.msra.gmra.mrb[26].mxu1 %vm9_vm0, %v5829_v26 }
 0x24a   :  { %6242 = vmatpush3.xpose.msk.msra.mxu1 %vm9_vm0, %v5835_v27  ;;  %6243 = vmatprep.mubr.msk.f32.mxu1 %vm6627_vm1, %v6626_v0 }
 0x24b   :  { %6251 = vmatprep.subr.mxu1 %v6626_v0 }
 0x24d   :  { %6244 = vmatmul.mubr.msk.f32.vlgmr.msra.gmra.mrb[28].mxu1 %vm9_vm0, %v5835_v27 }
 0x24e   :  { %6252 = vmatpush3.xpose.msk.msra.mxu1 %vm9_vm0, %v5841_v28  ;;  %6253 = vmatprep.mubr.msk.f32.mxu1 %vm6627_vm1, %v6626_v0 }
 0x24f   :  { %6261 = vmatprep.subr.mxu1 %v6626_v0 }
 0x251   :  { %6254 = vmatmul.mubr.msk.f32.vlgmr.msra.gmra.mrb[30].mxu1 %vm9_vm0, %v5841_v28 }
 0x252   :  { %6262 = vmatpush3.xpose.msk.msra.mxu1 %vm9_vm0, %v5847_v29  ;;  %6263 = vmatprep.mubr.msk.f32.mxu1 %vm6627_vm1, %v6626_v0 }
 0x253   :  { %6271 = vmatprep.subr.mxu1 %v6626_v0 }
 0x255   :  { %6264 = vmatmul.mubr.msk.f32.vlgmr.msra.gmra.mrb[32].mxu1 %vm9_vm0, %v5847_v29 }
 0x256   :  { %6272 = vmatpush3.xpose.msk.msra.mxu1 %vm9_vm0, %v5853_v30  ;;  %6273 = vmatprep.mubr.msk.f32.mxu1 %vm6627_vm1, %v6626_v0 }
 0x257   :  { %6281 = vmatprep.subr.mxu1 %v6626_v0 }
 0x259   :  { %6274 = vmatmul.mubr.msk.f32.vlgmr.msra.gmra.mrb[34].mxu1 %vm9_vm0, %v5853_v30 }
 0x25a   :  { %6282 = vmatpush3.xpose.msk.msra.mxu1 %vm9_vm0, %v5859_v31  ;;  %6283 = vmatprep.mubr.msk.f32.mxu1 %vm6627_vm1, %v6626_v0 }
 0x25b   :  { %6291 = vmatprep.subr.mxu1 %v6626_v0 }
 0x25d   :  { %6284 = vmatmul.mubr.msk.f32.vlgmr.msra.gmra.mrb[36].mxu1 %vm9_vm0, %v5859_v31 }
 0x25e   :  { %6292 = vmatpush3.xpose.msk.msra.mxu1 %vm9_vm0, %v5865_v32  ;;  %6293 = vmatprep.mubr.msk.f32.mxu1 %vm6627_vm1, %v6626_v0 }
 0x25f   :  { %6301 = vmatprep.subr.mxu1 %v6626_v0 }
 0x261   :  { %6294 = vmatmul.mubr.msk.f32.vlgmr.msra.gmra.mrb[38].mxu1 %vm9_vm0, %v5865_v32 }
 0x262   :  { %6302 = vmatpush3.xpose.msk.msra.mxu1 %vm9_vm0, %v5871_v33  ;;  %6303 = vmatprep.mubr.msk.f32.mxu1 %vm6627_vm1, %v6626_v0 }
 0x263   :  { %6311 = vmatprep.subr.mxu1 %v6626_v0 }
 0x265   :  { %6304 = vmatmul.mubr.msk.f32.vlgmr.msra.gmra.mrb[40].mxu1 %vm9_vm0, %v5871_v33 }
 0x266   :  { %6312 = vmatpush3.xpose.msk.msra.mxu1 %vm9_vm0, %v5877_v34  ;;  %6313 = vmatprep.mubr.msk.f32.mxu1 %vm6627_vm1, %v6626_v0 }
 0x267   :  { %6321 = vmatprep.subr.mxu1 %v6626_v0 }
 0x269   :  { %6314 = vmatmul.mubr.msk.f32.vlgmr.msra.gmra.mrb[42].mxu1 %vm9_vm0, %v5877_v34 }
 0x26a   :  { %6322 = vmatpush3.xpose.msk.msra.mxu1 %vm9_vm0, %v5883_v35  ;;  %6323 = vmatprep.mubr.msk.f32.mxu1 %vm6627_vm1, %v6626_v0 }
 0x26b   :  { %6331 = vmatprep.subr.mxu1 %v6626_v0 }
 0x26d   :  { %6324 = vmatmul.mubr.msk.f32.vlgmr.msra.gmra.mrb[44].mxu1 %vm9_vm0, %v5883_v35 }
 0x26e   :  { %6332 = vmatpush3.xpose.msk.msra.mxu1 %vm9_vm0, %v5889_v36  ;;  %6333 = vmatprep.mubr.msk.f32.mxu1 %vm6627_vm1, %v6626_v0 }
 0x26f   :  { %6341 = vmatprep.subr.mxu1 %v6626_v0 }
 0x271   :  { %6334 = vmatmul.mubr.msk.f32.vlgmr.msra.gmra.mrb[46].mxu1 %vm9_vm0, %v5889_v36 }
 0x272   :  { %6342 = vmatpush3.xpose.msk.msra.mxu1 %vm9_vm0, %v5895_v37  ;;  %6343 = vmatprep.mubr.msk.f32.mxu1 %vm6627_vm1, %v6626_v0 }
 0x273   :  { %6351 = vmatprep.subr.mxu1 %v6626_v0 }
 0x275   :  { %6344 = vmatmul.mubr.msk.f32.vlgmr.msra.gmra.mrb[48].mxu1 %vm9_vm0, %v5895_v37 }
 0x276   :  { %6352 = vmatpush3.xpose.msk.msra.mxu1 %vm9_vm0, %v5901_v38  ;;  %6353 = vmatprep.mubr.msk.f32.mxu1 %vm6627_vm1, %v6626_v0 }
 0x277   :  { %6361 = vmatprep.subr.mxu1 %v6626_v0 }
 0x279   :  { %6354 = vmatmul.mubr.msk.f32.vlgmr.msra.gmra.mrb[50].mxu1 %vm9_vm0, %v5901_v38 }
 0x27a   :  { %6362 = vmatpush3.xpose.msk.msra.mxu1 %vm9_vm0, %v5907_v39  ;;  %6363 = vmatprep.mubr.msk.f32.mxu1 %vm6627_vm1, %v6626_v0 }
 0x27b   :  { %6371 = vmatprep.subr.mxu1 %v6626_v0 }
 0x27d   :  { %6364 = vmatmul.mubr.msk.f32.vlgmr.msra.gmra.mrb[52].mxu1 %vm9_vm0, %v5907_v39 }
 0x27e   :  { %6372 = vmatpush3.xpose.msk.msra.mxu1 %vm9_vm0, %v5913_v40  ;;  %6373 = vmatprep.mubr.msk.f32.mxu1 %vm6627_vm1, %v6626_v0 }
 0x27f   :  { %6381 = vmatprep.subr.mxu1 %v6626_v0 }
 0x281   :  { %6374 = vmatmul.mubr.msk.f32.vlgmr.msra.gmra.mrb[54].mxu1 %vm9_vm0, %v5913_v40 }
 0x282   :  { %6382 = vmatpush3.xpose.msk.msra.mxu1 %vm9_vm0, %v5919_v41  ;;  %6383 = vmatprep.mubr.msk.f32.mxu1 %vm6627_vm1, %v6626_v0 }
 0x283   :  { %6391 = vmatprep.subr.mxu1 %v6626_v0 }
 0x285   :  { %6384 = vmatmul.mubr.msk.f32.vlgmr.msra.gmra.mrb[56].mxu1 %vm9_vm0, %v5919_v41 }
 0x286   :  { %6392 = vmatpush3.xpose.msk.msra.mxu1 %vm9_vm0, %v5925_v42  ;;  %6393 = vmatprep.mubr.msk.f32.mxu1 %vm6627_vm1, %v6626_v0 }
 0x287   :  { %6401 = vmatprep.subr.mxu1 %v6626_v0 }
 0x289   :  { %6394 = vmatmul.mubr.msk.f32.vlgmr.msra.gmra.mrb[58].mxu1 %vm9_vm0, %v5925_v42 }
 0x28a   :  { %6402 = vmatpush3.xpose.msk.msra.mxu1 %vm9_vm0, %v5931_v43  ;;  %6403 = vmatprep.mubr.msk.f32.mxu1 %vm6627_vm1, %v6626_v0 }
 0x28b   :  { %6411 = vmatprep.subr.mxu1 %v6626_v0 }
 0x28d   :  { %6404 = vmatmul.mubr.msk.f32.vlgmr.msra.gmra.mrb[60].mxu1 %vm9_vm0, %v5931_v43 }
 0x28e   :  { %6412 = vmatpush3.xpose.msk.msra.mxu1 %vm9_vm0, %v5937_v44  ;;  %6413 = vmatprep.mubr.msk.f32.mxu1 %vm6627_vm1, %v6626_v0 }
 0x28f   :  { %6421 = vmatprep.subr.mxu1 %v6626_v0 }
 0x291   :  { %6414 = vmatmul.mubr.msk.f32.vlgmr.msra.gmra.mrb[62].mxu1 %vm9_vm0, %v5937_v44 }
 0x292   :  { %6422 = vmatpush3.xpose.msk.msra.mxu1 %vm9_vm0, %v5943_v45  ;;  %6423 = vmatprep.mubr.msk.f32.mxu1 %vm6627_vm1, %v6626_v0 }
 0x293   :  { %6431 = vmatprep.subr.mxu1 %v6626_v0 }
 0x295   :  { %6424 = vmatmul.mubr.msk.f32.vlgmr.msra.gmra.mrb[64].mxu1 %vm9_vm0, %v5943_v45 }
 0x296   :  { %6432 = vmatpush3.xpose.msk.msra.mxu1 %vm9_vm0, %v5949_v46  ;;  %6433 = vmatprep.mubr.msk.f32.mxu1 %vm6627_vm1, %v6626_v0 }
 0x297   :  { %6441 = vmatprep.subr.mxu1 %v6626_v0 }
 0x299   :  { %6434 = vmatmul.mubr.msk.f32.vlgmr.msra.gmra.mrb[66].mxu1 %vm9_vm0, %v5949_v46 }
 0x29a   :  { %6442 = vmatpush3.xpose.msk.msra.mxu1 %vm9_vm0, %v5955_v47  ;;  %6443 = vmatprep.mubr.msk.f32.mxu1 %vm6627_vm1, %v6626_v0 }
 0x29d   :  { %6444 = vmatmul.mubr.msk.f32.vlgmr.msra.gmra.mrb[68].mxu1 %vm9_vm0, %v5955_v47 }
 0x2e8   :  { %v168_v48 = vpop.f32.mrb[0].mxu1 }
 0x2e9   :  { %172 = vst.msk [vmem:[%s7675_s1] sm:$0x3f] %vm84_vm2, %v168_v48  ;;  %v6110_v49 = vpop.f32.mrb[1].mxu1 }
 0x2ec   :  { %v244_v50 = vpop.f32.mrb[2].mxu1 }
 0x2ed   :  { %v6934_v51 = vmul.f32 0.37796447, %v244_v50  ;;  %v6115_v52 = vpop.f32.mrb[3].mxu1 }
 0x2ef   :  { %v249_v53 = vsel %vm84_vm2, %v6934_v51, -inf }
 0x2f0   :  { %250 = vmax.xlane.f32.xlu1 %v249_v53  ;;  %v408_v54 = vpop.f32.mrb[4].mxu1 }
 0x2f1   :  { %v6938_v55 = vmul.f32 0.37796447, %v408_v54  ;;  %v6125_v56 = vpop.f32.mrb[5].mxu1 }
 0x2f3   :  { %v413_v57 = vsel %vm84_vm2, %v6938_v55, -inf }
 0x2f4   :  { %414 = vmax.xlane.f32.xlu1 %v413_v57  ;;  %v572_v58 = vpop.f32.mrb[6].mxu1 }
 0x2f5   :  { %v6942_v59 = vmul.f32 0.37796447, %v572_v58  ;;  %v6135_v60 = vpop.f32.mrb[7].mxu1 }
 0x2f7   :  { %v577_v61 = vsel %vm84_vm2, %v6942_v59, -inf }
 0x2f8   :  { %578 = vmax.xlane.f32.xlu0 %v577_v61  ;;  %v736_v62 = vpop.f32.mrb[8].mxu1 }
 0x2f9   :  { %v6946_v63 = vmul.f32 0.37796447, %v736_v62  ;;  %v6145_v1 = vpop.f32.mrb[9].mxu1 }
 0x2fb   :  { %v741_v2 = vsel %vm84_vm2, %v6946_v63, -inf }
 0x2fc   :  { %742 = vmax.xlane.f32.xlu1 %v741_v2  ;;  %v900_v3 = vpop.f32.mrb[10].mxu1 }
 0x2fd   :  { %v6950_v4 = vmul.f32 0.37796447, %v900_v3  ;;  %v6155_v5 = vpop.f32.mrb[11].mxu1 }
 0x2ff   :  { %v905_v6 = vsel %vm84_vm2, %v6950_v4, -inf }
 0x300   :  { %906 = vmax.xlane.f32.xlu0 %v905_v6  ;;  %v1064_v7 = vpop.f32.mrb[12].mxu1 }
 0x301   :  { %v6954_v8 = vmul.f32 0.37796447, %v1064_v7  ;;  %v6165_v9 = vpop.f32.mrb[13].mxu1 }
 0x303   :  { %v1069_v10 = vsel %vm84_vm2, %v6954_v8, -inf }
 0x304   :  { %1070 = vmax.xlane.f32.xlu1 %v1069_v10  ;;  %v1228_v11 = vpop.f32.mrb[14].mxu1 }
 0x305   :  { %v6958_v12 = vmul.f32 0.37796447, %v1228_v11  ;;  %v6175_v13 = vpop.f32.mrb[15].mxu1 }
 0x307   :  { %v1233_v14 = vsel %vm84_vm2, %v6958_v12, -inf }
 0x308   :  { %1234 = vmax.xlane.f32.xlu0 %v1233_v14  ;;  %v1392_v15 = vpop.f32.mrb[16].mxu1 }
 0x309   :  { %v6962_v16 = vmul.f32 0.37796447, %v1392_v15  ;;  %v6185_v17 = vpop.f32.mrb[17].mxu1 }
 0x30b   :  { %v1397_v18 = vsel %vm84_vm2, %v6962_v16, -inf }
 0x30c   :  { %1398 = vmax.xlane.f32.xlu1 %v1397_v18  ;;  %v1556_v19 = vpop.f32.mrb[18].mxu1 }
 0x30d   :  { %v6966_v20 = vmul.f32 0.37796447, %v1556_v19  ;;  %v6195_v21 = vpop.f32.mrb[19].mxu1 }
 0x30f   :  { %v1561_v22 = vsel %vm84_vm2, %v6966_v20, -inf }
 0x310   :  { %1562 = vmax.xlane.f32.xlu0 %v1561_v22  ;;  %v1720_v23 = vpop.f32.mrb[20].mxu1 }
 0x311   :  { %v6970_v24 = vmul.f32 0.37796447, %v1720_v23  ;;  %v6205_v25 = vpop.f32.mrb[21].mxu1 }
 0x313   :  { %v1725_v26 = vsel %vm84_vm2, %v6970_v24, -inf }
 0x314   :  { %1726 = vmax.xlane.f32.xlu1 %v1725_v26  ;;  %v1884_v27 = vpop.f32.mrb[22].mxu1 }
 0x315   :  { %v6974_v28 = vmul.f32 0.37796447, %v1884_v27  ;;  %v6215_v29 = vpop.f32.mrb[23].mxu1 }
 0x317   :  { %v1889_v30 = vsel %vm84_vm2, %v6974_v28, -inf }
 0x318   :  { %1890 = vmax.xlane.f32.xlu0 %v1889_v30  ;;  %v2048_v31 = vpop.f32.mrb[24].mxu1 }
 0x319   :  { %v6978_v32 = vmul.f32 0.37796447, %v2048_v31  ;;  %v6225_v33 = vpop.f32.mrb[25].mxu1 }
 0x31b   :  { %v2053_v34 = vsel %vm84_vm2, %v6978_v32, -inf }
 0x31c   :  { %2054 = vmax.xlane.f32.xlu1 %v2053_v34  ;;  %v2212_v35 = vpop.f32.mrb[26].mxu1 }
 0x31d   :  { %v6982_v36 = vmul.f32 0.37796447, %v2212_v35  ;;  %v6235_v37 = vpop.f32.mrb[27].mxu1 }
 0x31f   :  { %v2217_v38 = vsel %vm84_vm2, %v6982_v36, -inf }
 0x320   :  { %2218 = vmax.xlane.f32.xlu0 %v2217_v38  ;;  %v2376_v39 = vpop.f32.mrb[28].mxu1 }
 0x321   :  { %v6986_v40 = vmul.f32 0.37796447, %v2376_v39  ;;  %v6245_v41 = vpop.f32.mrb[29].mxu1 }
 0x323   :  { %v2381_v42 = vsel %vm84_vm2, %v6986_v40, -inf }
 0x324   :  { %2382 = vmax.xlane.f32.xlu1 %v2381_v42  ;;  %v2540_v43 = vpop.f32.mrb[30].mxu1 }
 0x325   :  { %v6990_v44 = vmul.f32 0.37796447, %v2540_v43  ;;  %v6255_v45 = vpop.f32.mrb[31].mxu1 }
 0x327   :  { %v2545_v46 = vsel %vm84_vm2, %v6990_v44, -inf }
 0x328   :  { %2546 = vmax.xlane.f32.xlu0 %v2545_v46  ;;  %v2704_v47 = vpop.f32.mrb[32].mxu1 }
 0x329   :  { %v6994_v48 = vmul.f32 0.37796447, %v2704_v47  ;;  %v6265_v49 = vpop.f32.mrb[33].mxu1 }
 0x32b   :  { %v2709_v50 = vsel %vm84_vm2, %v6994_v48, -inf }
 0x32c   :  { %2710 = vmax.xlane.f32.xlu1 %v2709_v50  ;;  %v2868_v52 = vpop.f32.mrb[34].mxu1 }
 0x32d   :  { %v6998_v53 = vmul.f32 0.37796447, %v2868_v52  ;;  %v6275_v54 = vpop.f32.mrb[35].mxu1 }
 0x32f   :  { %v2873_v56 = vsel %vm84_vm2, %v6998_v53, -inf }
 0x330   :  { %2874 = vmax.xlane.f32.xlu0 %v2873_v56  ;;  %v3032_v57 = vpop.f32.mrb[36].mxu1 }
 0x331   :  { %v7002_v58 = vmul.f32 0.37796447, %v3032_v57  ;;  %v6285_v60 = vpop.f32.mrb[37].mxu1 }
 0x333   :  { %v3037_v61 = vsel %vm84_vm2, %v7002_v58, -inf }
 0x334   :  { %3038 = vmax.xlane.f32.xlu1 %v3037_v61  ;;  %v3196_v62 = vpop.f32.mrb[38].mxu1 }
 0x335   :  { %v7006_v1 = vmul.f32 0.37796447, %v3196_v62  ;;  %v6295_v2 = vpop.f32.mrb[39].mxu1 }
 0x337   :  { %v3201_v3 = vsel %vm84_vm2, %v7006_v1, -inf }
 0x338   :  { %3202 = vmax.xlane.f32.xlu0 %v3201_v3  ;;  %v3360_v5 = vpop.f32.mrb[40].mxu1 }
 0x339   :  { %v7010_v6 = vmul.f32 0.37796447, %v3360_v5  ;;  %v6305_v7 = vpop.f32.mrb[41].mxu1 }
 0x33b   :  { %v3365_v9 = vsel %vm84_vm2, %v7010_v6, -inf }
 0x33c   :  { %3366 = vmax.xlane.f32.xlu1 %v3365_v9  ;;  %v3524_v10 = vpop.f32.mrb[42].mxu1 }
 0x33d   :  { %v7014_v11 = vmul.f32 0.37796447, %v3524_v10  ;;  %v6315_v13 = vpop.f32.mrb[43].mxu1 }
 0x33f   :  { %v3529_v14 = vsel %vm84_vm2, %v7014_v11, -inf }
 0x340   :  { %3530 = vmax.xlane.f32.xlu0 %v3529_v14  ;;  %v3688_v15 = vpop.f32.mrb[44].mxu1 }
 0x341   :  { %v7018_v17 = vmul.f32 0.37796447, %v3688_v15  ;;  %v6325_v18 = vpop.f32.mrb[45].mxu1 }
 0x343   :  { %v3693_v19 = vsel %vm84_vm2, %v7018_v17, -inf }
 0x344   :  { %3694 = vmax.xlane.f32.xlu1 %v3693_v19  ;;  %v3852_v21 = vpop.f32.mrb[46].mxu1 }
 0x345   :  { %v7022_v22 = vmul.f32 0.37796447, %v3852_v21  ;;  %v6335_v23 = vpop.f32.mrb[47].mxu1 }
 0x347   :  { %v3857_v25 = vsel %vm84_vm2, %v7022_v22, -inf }
 0x348   :  { %3858 = vmax.xlane.f32.xlu1 %v3857_v25  ;;  %v4016_v26 = vpop.f32.mrb[48].mxu1 }
 0x349   :  { %v7026_v27 = vmul.f32 0.37796447, %v4016_v26  ;;  %v6345_v29 = vpop.f32.mrb[49].mxu1 }
 0x34b   :  { %v4021_v30 = vsel %vm84_vm2, %v7026_v27, -inf }
 0x34c   :  { %4022 = vmax.xlane.f32.xlu1 %v4021_v30  ;;  %v4180_v31 = vpop.f32.mrb[50].mxu1 }
 0x34d   :  { %v7030_v33 = vmul.f32 0.37796447, %v4180_v31  ;;  %v6355_v34 = vpop.f32.mrb[51].mxu1 }
 0x34f   :  { %v4185_v35 = vsel %vm84_vm2, %v7030_v33, -inf }
 0x350   :  { %4186 = vmax.xlane.f32.xlu1 %v4185_v35  ;;  %v4344_v37 = vpop.f32.mrb[52].mxu1 }
 0x351   :  { %v7034_v38 = vmul.f32 0.37796447, %v4344_v37  ;;  %v6365_v39 = vpop.f32.mrb[53].mxu1 }
 0x353   :  { %v4349_v41 = vsel %vm84_vm2, %v7034_v38, -inf }
 0x354   :  { %4350 = vmax.xlane.f32.xlu1 %v4349_v41  ;;  %v4508_v42 = vpop.f32.mrb[54].mxu1 }
 0x355   :  { %v7038_v43 = vmul.f32 0.37796447, %v4508_v42  ;;  %v6375_v45 = vpop.f32.mrb[55].mxu1 }
 0x357   :  { %v4513_v46 = vsel %vm84_vm2, %v7038_v43, -inf }
 0x358   :  { %4514 = vmax.xlane.f32.xlu1 %v4513_v46  ;;  %v4672_v47 = vpop.f32.mrb[56].mxu1 }
 0x359   :  { %v7042_v49 = vmul.f32 0.37796447, %v4672_v47  ;;  %v6385_v50 = vpop.f32.mrb[57].mxu1 }
 0x35b   :  { %v4677_v52 = vsel %vm84_vm2, %v7042_v49, -inf }
 0x35c   :  { %4678 = vmax.xlane.f32.xlu1 %v4677_v52  ;;  %v4836_v54 = vpop.f32.mrb[58].mxu1 }
 0x35d   :  { %v7046_v56 = vmul.f32 0.37796447, %v4836_v54  ;;  %v6395_v57 = vpop.f32.mrb[59].mxu1 }
 0x35f   :  { %v4841_v60 = vsel %vm84_vm2, %v7046_v56, -inf }
 0x360   :  { %4842 = vmax.xlane.f32.xlu1 %v4841_v60  ;;  %v5000_v61 = vpop.f32.mrb[60].mxu1 }
 0x361   :  { %v7050_v62 = vmul.f32 0.37796447, %v5000_v61  ;;  %v6405_v2 = vpop.f32.mrb[61].mxu1 }
 0x363   :  { %v5005_v3 = vsel %vm84_vm2, %v7050_v62, -inf }
 0x364   :  { %5006 = vmax.xlane.f32.xlu1 %v5005_v3  ;;  %v5164_v5 = vpop.f32.mrb[62].mxu1 }
 0x365   :  { %v7054_v7 = vmul.f32 0.37796447, %v5164_v5  ;;  %v6415_v9 = vpop.f32.mrb[63].mxu1 }
 0x367   :  { %v5169_v10 = vsel %vm84_vm2, %v7054_v7, -inf }
 0x368   :  { %5170 = vmax.xlane.f32.xlu1 %v5169_v10  ;;  %v5328_v13 = vpop.f32.mrb[64].mxu1 }
 0x369   :  { %v7058_v14 = vmul.f32 0.37796447, %v5328_v13  ;;  %v6425_v15 = vpop.f32.mrb[65].mxu1 }
 0x36b   :  { %v5333_v18 = vsel %vm84_vm2, %v7058_v14, -inf }
 0x36c   :  { %5334 = vmax.xlane.f32.xlu1 %v5333_v18  ;;  %v5492_v19 = vpop.f32.mrb[66].mxu1 }
 0x36d   :  { %v7062_v21 = vmul.f32 0.37796447, %v5492_v19  ;;  %v6435_v23 = vpop.f32.mrb[67].mxu1 }
 0x36f   :  { %v5497_v25 = vsel %vm84_vm2, %v7062_v21, -inf }
 0x370   :  { %5498 = vmax.xlane.f32.xlu1 %v5497_v25  ;;  %v5656_v26 = vpop.f32.mrb[68].mxu1 }
 0x371   :  { %v7066_v29 = vmul.f32 0.37796447, %v5656_v26  ;;  %v6445_v30 = vpop.f32.mrb[69].mxu1 }
 0x373   :  { %v5661_v31 = vsel %vm84_vm2, %v7066_v29, -inf }
 0x374   :  { %5662 = vmax.xlane.f32.xlu1 %v5661_v31 }
 0x37d   :  { %v251_v34 = vpop.xlane.xlu1 %250 }
 0x37e   :  { %v252_v35 = vsub.f32 %v6934_v51, %v251_v34 }
 0x380   :  { %v253_v37 = vmul.f32 1.442695, %v252_v35 }
 0x381   :  { %v415_v39 = vpop.xlane.xlu1 %414 }
 0x382   :  { %6457 = vpow2.f32 %v253_v37  ;;  %v416_v41 = vsub.f32 %v6938_v55, %v415_v39 }
 0x384   :  { %v417_v42 = vmul.f32 1.442695, %v416_v41 }
 0x385   :  { %v579_v45 = vpop.xlane.xlu0 %578 }
 0x386   :  { %6459 = vpow2.f32 %v417_v42  ;;  %v580_v46 = vsub.f32 %v6942_v59, %v579_v45 }
 0x388   :  { %v581_v47 = vmul.f32 1.442695, %v580_v46 }
 0x389   :  { %v743_v50 = vpop.xlane.xlu1 %742 }
 0x38a   :  { %6461 = vpow2.f32 %v581_v47  ;;  %v744_v52 = vsub.f32 %v6946_v63, %v743_v50 }
 0x38c   :  { %v7074_v54 = vpop.eup %6457  ;;  %v745_v57 = vmul.f32 1.442695, %v744_v52 }
 0x38d   :  { %v907_v60 = vpop.xlane.xlu0 %906  ;;  %v255_v51 = vsel %vm84_vm2, %v7074_v54, 0.0 }
 0x38e   :  { %6463 = vpow2.f32 %v745_v57  ;;  %v908_v55 = vsub.f32 %v6950_v4, %v907_v60  ;;  %256 = vadd.xlane.f32.xlu0 %v255_v51 }
 0x390   :  { %v7079_v61 = vpop.eup %6459  ;;  %v909_v2 = vmul.f32 1.442695, %v908_v55 }
 0x391   :  { %v1071_v59 = vpop.xlane.xlu1 %1070  ;;  %v419_v3 = vsel %vm84_vm2, %v7079_v61, 0.0 }
 0x392   :  { %6465 = vpow2.f32 %v909_v2  ;;  %v1072_v63 = vsub.f32 %v6954_v8, %v1071_v59  ;;  %420 = vadd.xlane.f32.xlu0 %v419_v3 }
 0x394   :  { %v7084_v5 = vpop.eup %6461  ;;  %v1073_v9 = vmul.f32 1.442695, %v1072_v63 }
 0x395   :  { %v1235_v10 = vpop.xlane.xlu0 %1234  ;;  %v583_v13 = vsel %vm84_vm2, %v7084_v5, 0.0 }
 0x396   :  { %6467 = vpow2.f32 %v1073_v9  ;;  %v1236_v4 = vsub.f32 %v6958_v12, %v1235_v10  ;;  %584 = vadd.xlane.f32.xlu0 %v583_v13 }
 0x398   :  { %v7089_v15 = vpop.eup %6463  ;;  %v1237_v18 = vmul.f32 1.442695, %v1236_v4 }
 0x399   :  { %v1399_v19 = vpop.xlane.xlu1 %1398  ;;  %v747_v23 = vsel %vm84_vm2, %v7089_v15, 0.0 }
 0x39a   :  { %6469 = vpow2.f32 %v1237_v18  ;;  %v1400_v8 = vsub.f32 %v6962_v16, %v1399_v19  ;;  %748 = vadd.xlane.f32.xlu0 %v747_v23 }
 0x39c   :  { %v7094_v25 = vpop.eup %6465  ;;  %v1401_v26 = vmul.f32 1.442695, %v1400_v8 }
 0x39d   :  { %v1563_v30 = vpop.xlane.xlu0 %1562  ;;  %v911_v31 = vsel %vm84_vm2, %v7094_v25, 0.0 }
 0x39e   :  { %6471 = vpow2.f32 %v1401_v26  ;;  %v1564_v12 = vsub.f32 %v6966_v20, %v1563_v30  ;;  %912 = vadd.xlane.f32.xlu0 %v911_v31 }
 0x3a0   :  { %v7099_v34 = vpop.eup %6467  ;;  %v1565_v35 = vmul.f32 1.442695, %v1564_v12 }
 0x3a1   :  { %v1727_v37 = vpop.xlane.xlu1 %1726  ;;  %v1075_v39 = vsel %vm84_vm2, %v7099_v34, 0.0 }
 0x3a2   :  { %6473 = vpow2.f32 %v1565_v35  ;;  %v1728_v16 = vsub.f32 %v6970_v24, %v1727_v37  ;;  %1076 = vadd.xlane.f32.xlu0 %v1075_v39 }
 0x3a4   :  { %v7104_v41 = vpop.eup %6469  ;;  %v1729_v42 = vmul.f32 1.442695, %v1728_v16 }
 0x3a5   :  { %v1891_v45 = vpop.xlane.xlu0 %1890  ;;  %v1239_v46 = vsel %vm84_vm2, %v7104_v41, 0.0 }
 0x3a6   :  { %6475 = vpow2.f32 %v1729_v42  ;;  %v1892_v20 = vsub.f32 %v6974_v28, %v1891_v45  ;;  %1240 = vadd.xlane.f32.xlu0 %v1239_v46 }
 0x3a8   :  { %v7109_v47 = vpop.eup %6471  ;;  %v1893_v50 = vmul.f32 1.442695, %v1892_v20 }
 0x3a9   :  { %v2055_v52 = vpop.xlane.xlu1 %2054  ;;  %v1403_v57 = vsel %vm84_vm2, %v7109_v47, 0.0 }
 0x3aa   :  { %6477 = vpow2.f32 %v1893_v50  ;;  %v2056_v24 = vsub.f32 %v6978_v32, %v2055_v52  ;;  %1404 = vadd.xlane.f32.xlu0 %v1403_v57 }
 0x3ac   :  { %v7114_v60 = vpop.eup %6473  ;;  %v2057_v51 = vmul.f32 1.442695, %v2056_v24 }
 0x3ad   :  { %v2219_v55 = vpop.xlane.xlu0 %2218  ;;  %v1567_v2 = vsel %vm84_vm2, %v7114_v60, 0.0 }
 0x3ae   :  { %6479 = vpow2.f32 %v2057_v51  ;;  %v2220_v28 = vsub.f32 %v6982_v36, %v2219_v55  ;;  %1568 = vadd.xlane.f32.xlu0 %v1567_v2 }
 0x3b0   :  { %v7119_v59 = vpop.eup %6475  ;;  %v2221_v3 = vmul.f32 1.442695, %v2220_v28 }
 0x3b1   :  { %v2383_v63 = vpop.xlane.xlu1 %2382  ;;  %v1731_v9 = vsel %vm84_vm2, %v7119_v59, 0.0 }
 0x3b2   :  { %6481 = vpow2.f32 %v2221_v3  ;;  %v2384_v32 = vsub.f32 %v6986_v40, %v2383_v63  ;;  %1732 = vadd.xlane.f32.xlu0 %v1731_v9 }
 0x3b4   :  { %v7124_v10 = vpop.eup %6477  ;;  %v2385_v13 = vmul.f32 1.442695, %v2384_v32 }
 0x3b5   :  { %v2547_v4 = vpop.xlane.xlu0 %2546  ;;  %v1895_v18 = vsel %vm84_vm2, %v7124_v10, 0.0 }
 0x3b6   :  { %6483 = vpow2.f32 %v2385_v13  ;;  %v2548_v36 = vsub.f32 %v6990_v44, %v2547_v4  ;;  %1896 = vadd.xlane.f32.xlu0 %v1895_v18 }
 0x3b8   :  { %v7129_v19 = vpop.eup %6479  ;;  %v2549_v23 = vmul.f32 1.442695, %v2548_v36 }
 0x3b9   :  { %v2711_v8 = vpop.xlane.xlu1 %2710  ;;  %v2059_v26 = vsel %vm84_vm2, %v7129_v19, 0.0 }
 0x3ba   :  { %6485 = vpow2.f32 %v2549_v23  ;;  %v2712_v40 = vsub.f32 %v6994_v48, %v2711_v8  ;;  %2060 = vadd.xlane.f32.xlu0 %v2059_v26 }
 0x3bc   :  { %v7134_v30 = vpop.eup %6481  ;;  %v2713_v31 = vmul.f32 1.442695, %v2712_v40 }
 0x3bd   :  { %v2875_v12 = vpop.xlane.xlu0 %2874  ;;  %v2223_v35 = vsel %vm84_vm2, %v7134_v30, 0.0 }
 0x3be   :  { %6487 = vpow2.f32 %v2713_v31  ;;  %v2876_v44 = vsub.f32 %v6998_v53, %v2875_v12  ;;  %2224 = vadd.xlane.f32.xlu0 %v2223_v35 }
 0x3c0   :  { %v7139_v37 = vpop.eup %6483  ;;  %v2877_v39 = vmul.f32 1.442695, %v2876_v44 }
 0x3c1   :  { %v3039_v16 = vpop.xlane.xlu1 %3038  ;;  %v2387_v42 = vsel %vm84_vm2, %v7139_v37, 0.0 }
 0x3c2   :  { %6489 = vpow2.f32 %v2877_v39  ;;  %v3040_v48 = vsub.f32 %v7002_v58, %v3039_v16  ;;  %2388 = vadd.xlane.f32.xlu1 %v2387_v42 }
 0x3c4   :  { %v7144_v45 = vpop.eup %6485  ;;  %v3041_v46 = vmul.f32 1.442695, %v3040_v48 }
 0x3c5   :  { %v3203_v20 = vpop.xlane.xlu0 %3202  ;;  %v2551_v50 = vsel %vm84_vm2, %v7144_v45, 0.0 }
 0x3c6   :  { %6491 = vpow2.f32 %v3041_v46  ;;  %v3204_v53 = vsub.f32 %v7006_v1, %v3203_v20  ;;  %2552 = vadd.xlane.f32.xlu0 %v2551_v50 }
 0x3c8   :  { %v7149_v52 = vpop.eup %6487  ;;  %v3205_v57 = vmul.f32 1.442695, %v3204_v53 }
 0x3c9   :  { %v3367_v24 = vpop.xlane.xlu1 %3366  ;;  %v2715_v51 = vsel %vm84_vm2, %v7149_v52, 0.0 }
 0x3ca   :  { %6493 = vpow2.f32 %v3205_v57  ;;  %v3368_v58 = vsub.f32 %v7010_v6, %v3367_v24  ;;  %2716 = vadd.xlane.f32.xlu1 %v2715_v51 }
 0x3cc   :  { %v7154_v55 = vpop.eup %6489  ;;  %v3369_v2 = vmul.f32 1.442695, %v3368_v58 }
 0x3cd   :  { %v3531_v28 = vpop.xlane.xlu0 %3530  ;;  %v2879_v3 = vsel %vm84_vm2, %v7154_v55, 0.0 }
 0x3ce   :  { %6495 = vpow2.f32 %v3369_v2  ;;  %v3532_v1 = vsub.f32 %v7014_v11, %v3531_v28  ;;  %2880 = vadd.xlane.f32.xlu0 %v2879_v3 }
 0x3d0   :  { %v7159_v63 = vpop.eup %6491  ;;  %v3533_v9 = vmul.f32 1.442695, %v3532_v1 }
 0x3d1   :  { %v3695_v32 = vpop.xlane.xlu1 %3694  ;;  %v3043_v13 = vsel %vm84_vm2, %v7159_v63, 0.0 }
 0x3d2   :  { %6497 = vpow2.f32 %v3533_v9  ;;  %v3696_v6 = vsub.f32 %v7018_v17, %v3695_v32  ;;  %3044 = vadd.xlane.f32.xlu1 %v3043_v13 }
 0x3d4   :  { %v7164_v4 = vpop.eup %6493  ;;  %v3697_v18 = vmul.f32 1.442695, %v3696_v6 }
 0x3d5   :  { %v3859_v36 = vpop.xlane.xlu1 %3858  ;;  %v3207_v23 = vsel %vm84_vm2, %v7164_v4, 0.0 }
 0x3d6   :  { %6499 = vpow2.f32 %v3697_v18  ;;  %v3860_v11 = vsub.f32 %v7022_v22, %v3859_v36  ;;  %3208 = vadd.xlane.f32.xlu0 %v3207_v23 }
 0x3d8   :  { %v7169_v8 = vpop.eup %6495  ;;  %v3861_v26 = vmul.f32 1.442695, %v3860_v11 }
 0x3d9   :  { %v4023_v40 = vpop.xlane.xlu1 %4022  ;;  %v3371_v31 = vsel %vm84_vm2, %v7169_v8, 0.0 }
 0x3da   :  { %6501 = vpow2.f32 %v3861_v26  ;;  %v4024_v17 = vsub.f32 %v7026_v27, %v4023_v40  ;;  %3372 = vadd.xlane.f32.xlu1 %v3371_v31 }
 0x3dc   :  { %v7174_v12 = vpop.eup %6497  ;;  %v4025_v35 = vmul.f32 1.442695, %v4024_v17 }
 0x3dd   :  { %v4187_v44 = vpop.xlane.xlu1 %4186  ;;  %v3535_v39 = vsel %vm84_vm2, %v7174_v12, 0.0 }
 0x3de   :  { %6503 = vpow2.f32 %v4025_v35  ;;  %v4188_v22 = vsub.f32 %v7030_v33, %v4187_v44  ;;  %3536 = vadd.xlane.f32.xlu0 %v3535_v39 }
 0x3e0   :  { %v7179_v16 = vpop.eup %6499  ;;  %v4189_v42 = vmul.f32 1.442695, %v4188_v22 }
 0x3e1   :  { %v4351_v48 = vpop.xlane.xlu1 %4350  ;;  %v3699_v46 = vsel %vm84_vm2, %v7179_v16, 0.0 }
 0x3e2   :  { %6505 = vpow2.f32 %v4189_v42  ;;  %v4352_v27 = vsub.f32 %v7034_v38, %v4351_v48  ;;  %3700 = vadd.xlane.f32.xlu1 %v3699_v46 }
 0x3e4   :  { %v7184_v20 = vpop.eup %6501  ;;  %v4353_v50 = vmul.f32 1.442695, %v4352_v27 }
 0x3e5   :  { %v4515_v53 = vpop.xlane.xlu1 %4514  ;;  %v3863_v57 = vsel %vm84_vm2, %v7184_v20, 0.0 }
 0x3e6   :  { %6507 = vpow2.f32 %v4353_v50  ;;  %v4516_v33 = vsub.f32 %v7038_v43, %v4515_v53  ;;  %3864 = vadd.xlane.f32.xlu0 %v3863_v57 }
 0x3e8   :  { %v7189_v24 = vpop.eup %6503  ;;  %v4517_v51 = vmul.f32 1.442695, %v4516_v33 }
 0x3e9   :  { %v4679_v58 = vpop.xlane.xlu1 %4678  ;;  %v4027_v2 = vsel %vm84_vm2, %v7189_v24, 0.0 }
 0x3ea   :  { %6509 = vpow2.f32 %v4517_v51  ;;  %v4680_v38 = vsub.f32 %v7042_v49, %v4679_v58  ;;  %4028 = vadd.xlane.f32.xlu1 %v4027_v2 }
 0x3ec   :  { %v7194_v28 = vpop.eup %6505  ;;  %v4681_v3 = vmul.f32 1.442695, %v4680_v38 }
 0x3ed   :  { %v4843_v1 = vpop.xlane.xlu1 %4842  ;;  %v4191_v9 = vsel %vm84_vm2, %v7194_v28, 0.0 }
 0x3ee   :  { %6511 = vpow2.f32 %v4681_v3  ;;  %v4844_v43 = vsub.f32 %v7046_v56, %v4843_v1  ;;  %4192 = vadd.xlane.f32.xlu0 %v4191_v9 }
 0x3f0   :  { %v7199_v32 = vpop.eup %6507  ;;  %v4845_v13 = vmul.f32 1.442695, %v4844_v43 }
 0x3f1   :  { %v5007_v6 = vpop.xlane.xlu1 %5006  ;;  %v4355_v18 = vsel %vm84_vm2, %v7199_v32, 0.0 }
 0x3f2   :  { %6513 = vpow2.f32 %v4845_v13  ;;  %v5008_v49 = vsub.f32 %v7050_v62, %v5007_v6  ;;  %4356 = vadd.xlane.f32.xlu1 %v4355_v18 }
 0x3f4   :  { %v7204_v36 = vpop.eup %6509  ;;  %v5009_v23 = vmul.f32 1.442695, %v5008_v49  ;;  %v6593_v49 = vld [vmem:[%s7674_s0 + $0x10] sm:$0x3f] }
 0x3f5   :  { %v5171_v11 = vpop.xlane.xlu1 %5170  ;;  %v4519_v26 = vsel %vm84_vm2, %v7204_v36, 0.0 }
 0x3f6   :  { %6515 = vpow2.f32 %v5009_v23  ;;  %v5172_v56 = vsub.f32 %v7054_v7, %v5171_v11  ;;  %4520 = vadd.xlane.f32.xlu0 %v4519_v26  ;;  %v6594_v26 = vld [vmem:[%s7674_s0 + $0x18] sm:$0x3f] }
 0x3f8   :  { %v7209_v40 = vpop.eup %6511  ;;  %v5173_v31 = vmul.f32 1.442695, %v5172_v56 }
 0x3f9   :  { %v5335_v17 = vpop.xlane.xlu1 %5334  ;;  %v4683_v35 = vsel %vm84_vm2, %v7209_v40, 0.0 }
 0x3fa   :  { %6517 = vpow2.f32 %v5173_v31  ;;  %v5336_v62 = vsub.f32 %v7058_v14, %v5335_v17  ;;  %4684 = vadd.xlane.f32.xlu1 %v4683_v35  ;;  %v6595_v17 = vld [vmem:[%s7674_s0 + $0x20] sm:$0x3f] }
 0x3fc   :  { %v7214_v44 = vpop.eup %6513  ;;  %v5337_v39 = vmul.f32 1.442695, %v5336_v62 }
 0x3fd   :  { %v5499_v22 = vpop.xlane.xlu1 %5498  ;;  %v4847_v42 = vsel %vm84_vm2, %v7214_v44, 0.0 }
 0x3fe   :  { %6519 = vpow2.f32 %v5337_v39  ;;  %v5500_v7 = vsub.f32 %v7062_v21, %v5499_v22  ;;  %4848 = vadd.xlane.f32.xlu0 %v4847_v42  ;;  %v6596_v39 = vld [vmem:[%s7674_s0 + $0x28] sm:$0x3f] }
 0x400   :  { %v7219_v48 = vpop.eup %6515  ;;  %v5501_v46 = vmul.f32 1.442695, %v5500_v7  ;;  %v6597_v7 = vld [vmem:[%s7674_s0 + $0x30] sm:$0x3f] }
 0x401   :  { %v5663_v27 = vpop.xlane.xlu1 %5662  ;;  %v5011_v50 = vsel %vm84_vm2, %v7219_v48, 0.0 }
 0x402   :  { %6521 = vpow2.f32 %v5501_v46  ;;  %v5664_v14 = vsub.f32 %v7066_v29, %v5663_v27  ;;  %5012 = vadd.xlane.f32.xlu1 %v5011_v50  ;;  %v6598_v50 = vld [vmem:[%s7674_s0 + $0x38] sm:$0x3f] }
 0x404   :  { %v7224_v53 = vpop.eup %6517  ;;  %v5665_v57 = vmul.f32 1.442695, %v5664_v14 }
 0x405   :  { %v5175_v33 = vsel %vm84_vm2, %v7224_v53, 0.0 }
 0x406   :  { %6523 = vpow2.f32 %v5665_v57  ;;  %5176 = vadd.xlane.f32.xlu0 %v5175_v33  ;;  %v6599_v33 = vld [vmem:[%s7674_s0 + $0x40] sm:$0x3f] }
 0x408   :  { %v7228_v21 = vpop.eup %6519 }
 0x409   :  { %v5339_v51 = vsel %vm84_vm2, %v7228_v21, 0.0 }
 0x40a   :  { %5340 = vadd.xlane.f32.xlu1 %v5339_v51 }
 0x40c   :  { %v7232_v58 = vpop.eup %6521 }
 0x40d   :  { %v5503_v29 = vsel %vm84_vm2, %v7232_v58, 0.0 }
 0x40e   :  { %5504 = vadd.xlane.f32.xlu0 %v5503_v29 }
 0x410   :  { %v7236_v2 = vpop.eup %6523 }
 0x411   :  { %v5667_v38 = vsel %vm84_vm2, %v7236_v2, 0.0 }
 0x412   :  { %5668 = vadd.xlane.f32.xlu1 %v5667_v38  ;;  %v6600_v38 = vld [vmem:[%s7674_s0 + $0x48] sm:$0x3f] }
 0x41b   :  { %v257_v3 = vpop.xlane.xlu0 %256 }
 0x41c   :  { %6525 = vrcp.f32 %v257_v3 }
 0x41f   :  { %v421_v1 = vpop.xlane.xlu0 %420 }
 0x420   :  { %6527 = vrcp.f32 %v421_v1 }
 0x423   :  { %v585_v9 = vpop.xlane.xlu0 %584 }
 0x424   :  { %6529 = vrcp.f32 %v585_v9  ;;  %v6601_v9 = vld [vmem:[%s7674_s0 + $0x50] sm:$0x3f] }
 0x426   :  { %v6526_v43 = vpop.eup %6525 }
 0x427   :  { %v259_v13 = vmul.f32 %v6526_v43, %v7074_v54  ;;  %v749_v6 = vpop.xlane.xlu0 %748 }
 0x428   :  { %6531 = vrcp.f32 %v749_v6  ;;  %v6602_v6 = vld [vmem:[%s7674_s0 + $0x58] sm:$0x3f] }
 0x429   :  { %6119 = vmatmul.mubr.msk.f32.vlgmr.msra.gmra.mrb[2].mxu0 %vm9_vm0, %v259_v13 }
 0x42a   :  { %v6528_v18 = vpop.eup %6527  ;;  %6127 = vmatpush3.msk.msra.mxu0 %vm99_vm3, %v6593_v49  ;;  %6128 = vmatprep.mubr.msk.f32.mxu0 %vm6627_vm1, %v6626_v0 }
 0x42b   :  { %v423_v23 = vmul.f32 %v6528_v18, %v7079_v61  ;;  %v913_v11 = vpop.xlane.xlu0 %912  ;;  %6136 = vmatprep.subr.mxu0 %v6626_v0 }
 0x42c   :  { %6533 = vrcp.f32 %v913_v11 }
 0x42d   :  { %6129 = vmatmul.mubr.msk.f32.vlgmr.msra.gmra.mrb[4].mxu0 %vm9_vm0, %v423_v23  ;;  %v6603_v23 = vld [vmem:[%s7674_s0 + $0x60] sm:$0x3f] }
 0x42e   :  { %v6530_v54 = vpop.eup %6529  ;;  %6137 = vmatpush3.msk.msra.mxu0 %vm99_vm3, %v6594_v26  ;;  %6138 = vmatprep.mubr.msk.f32.mxu0 %vm6627_vm1, %v6626_v0  ;;  %v6604_v26 = vld [vmem:[%s7674_s0 + $0x68] sm:$0x3f] }
 0x42f   :  { %v587_v56 = vmul.f32 %v6530_v54, %v7084_v5  ;;  %v1077_v31 = vpop.xlane.xlu0 %1076  ;;  %6146 = vmatprep.subr.mxu0 %v6626_v0 }
 0x430   :  { %6535 = vrcp.f32 %v1077_v31 }
 0x431   :  { %6139 = vmatmul.mubr.msk.f32.vlgmr.msra.gmra.mrb[6].mxu0 %vm9_vm0, %v587_v56 }
 0x432   :  { %v6532_v61 = vpop.eup %6531  ;;  %6147 = vmatpush3.msk.msra.mxu0 %vm99_vm3, %v6595_v17  ;;  %6148 = vmatprep.mubr.msk.f32.mxu0 %vm6627_vm1, %v6626_v0 }
 0x433   :  { %v751_v35 = vmul.f32 %v6532_v61, %v7089_v15  ;;  %v1241_v62 = vpop.xlane.xlu0 %1240  ;;  %6156 = vmatprep.subr.mxu0 %v6626_v0  ;;  %v6605_v61 = vld [vmem:[%s7674_s0 + $0x70] sm:$0x3f] }
 0x434   :  { %6537 = vrcp.f32 %v1241_v62  ;;  %v6606_v62 = vld [vmem:[%s7674_s0 + $0x78] sm:$0x3f] }
 0x435   :  { %6149 = vmatmul.mubr.msk.f32.vlgmr.msra.gmra.mrb[8].mxu0 %vm9_vm0, %v751_v35 }
 0x436   :  { %v6534_v5 = vpop.eup %6533  ;;  %6157 = vmatpush3.msk.msra.mxu0 %vm99_vm3, %v6596_v39  ;;  %6158 = vmatprep.mubr.msk.f32.mxu0 %vm6627_vm1, %v6626_v0 }
 0x437   :  { %v915_v22 = vmul.f32 %v6534_v5, %v7094_v25  ;;  %v1405_v42 = vpop.xlane.xlu0 %1404  ;;  %6166 = vmatprep.subr.mxu0 %v6626_v0 }
 0x438   :  { %6539 = vrcp.f32 %v1405_v42 }
 0x439   :  { %6159 = vmatmul.mubr.msk.f32.vlgmr.msra.gmra.mrb[10].mxu0 %vm9_vm0, %v915_v22  ;;  %v6607_v22 = vld [vmem:[%s7674_s0 + $0x80] sm:$0x3f] }
 0x43a   :  { %v6536_v15 = vpop.eup %6535  ;;  %6167 = vmatpush3.msk.msra.mxu0 %vm99_vm3, %v6597_v7  ;;  %6168 = vmatprep.mubr.msk.f32.mxu0 %vm6627_vm1, %v6626_v0  ;;  %v6608_v7 = vld [vmem:[%s7674_s0 + $0x88] sm:$0x3f] }
 0x43b   :  { %v1079_v46 = vmul.f32 %v6536_v15, %v7099_v34  ;;  %v1569_v27 = vpop.xlane.xlu0 %1568  ;;  %6176 = vmatprep.subr.mxu0 %v6626_v0 }
 0x43c   :  { %6541 = vrcp.f32 %v1569_v27 }
 0x43d   :  { %6169 = vmatmul.mubr.msk.f32.vlgmr.msra.gmra.mrb[12].mxu0 %vm9_vm0, %v1079_v46 }
 0x43e   :  { %v6538_v25 = vpop.eup %6537  ;;  %6177 = vmatpush3.msk.msra.mxu0 %vm99_vm3, %v6598_v50  ;;  %6178 = vmatprep.mubr.msk.f32.mxu0 %vm6627_vm1, %v6626_v0 }
 0x43f   :  { %v1243_v14 = vmul.f32 %v6538_v25, %v7104_v41  ;;  %v1733_v57 = vpop.xlane.xlu0 %1732  ;;  %6186 = vmatprep.subr.mxu0 %v6626_v0  ;;  %v6609_v25 = vld [vmem:[%s7674_s0 + $0x90] sm:$0x3f] }
 0x440   :  { %6543 = vrcp.f32 %v1733_v57  ;;  %v6610_v57 = vld [vmem:[%s7674_s0 + $0x98] sm:$0x3f] }
 0x441   :  { %6179 = vmatmul.mubr.msk.f32.vlgmr.msra.gmra.mrb[14].mxu0 %vm9_vm0, %v1243_v14 }
 0x442   :  { %v6540_v34 = vpop.eup %6539  ;;  %6187 = vmatpush3.msk.msra.mxu0 %vm99_vm3, %v6599_v33  ;;  %6188 = vmatprep.mubr.msk.f32.mxu0 %vm6627_vm1, %v6626_v0 }
 0x443   :  { %v1407_v51 = vmul.f32 %v6540_v34, %v7109_v47  ;;  %v1897_v29 = vpop.xlane.xlu0 %1896  ;;  %6196 = vmatprep.subr.mxu0 %v6626_v0 }
 0x444   :  { %6545 = vrcp.f32 %v1897_v29 }
 0x445   :  { %6189 = vmatmul.mubr.msk.f32.vlgmr.msra.gmra.mrb[16].mxu0 %vm9_vm0, %v1407_v51  ;;  %v6611_v51 = vld [vmem:[%s7674_s0 + $0xa0] sm:$0x3f] }
 0x446   :  { %v6542_v41 = vpop.eup %6541  ;;  %6197 = vmatpush3.msk.msra.mxu0 %vm99_vm3, %v6600_v38  ;;  %6198 = vmatprep.mubr.msk.f32.mxu0 %vm6627_vm1, %v6626_v0  ;;  %v6612_v38 = vld [vmem:[%s7674_s0 + $0xa8] sm:$0x3f] }
 0x447   :  { %v1571_v3 = vmul.f32 %v6542_v41, %v7114_v60  ;;  %v2061_v1 = vpop.xlane.xlu0 %2060  ;;  %6206 = vmatprep.subr.mxu0 %v6626_v0 }
 0x448   :  { %6547 = vrcp.f32 %v2061_v1 }
 0x449   :  { %6199 = vmatmul.mubr.msk.f32.vlgmr.msra.gmra.mrb[18].mxu0 %vm9_vm0, %v1571_v3 }
 0x44a   :  { %v6544_v47 = vpop.eup %6543  ;;  %6207 = vmatpush3.msk.msra.mxu0 %vm99_vm3, %v6601_v9  ;;  %6208 = vmatprep.mubr.msk.f32.mxu0 %vm6627_vm1, %v6626_v0 }
 0x44b   :  { %v1735_v43 = vmul.f32 %v6544_v47, %v7119_v59  ;;  %v2225_v13 = vpop.xlane.xlu0 %2224  ;;  %6216 = vmatprep.subr.mxu0 %v6626_v0  ;;  %v6613_v47 = vld [vmem:[%s7674_s0 + $0xb0] sm:$0x3f] }
 0x44c   :  { %6549 = vrcp.f32 %v2225_v13  ;;  %v6614_v13 = vld [vmem:[%s7674_s0 + $0xb8] sm:$0x3f] }
 0x44d   :  { %6209 = vmatmul.mubr.msk.f32.vlgmr.msra.gmra.mrb[20].mxu0 %vm9_vm0, %v1735_v43 }
 0x44e   :  { %v6546_v60 = vpop.eup %6545  ;;  %6217 = vmatpush3.msk.msra.mxu0 %vm99_vm3, %v6602_v6  ;;  %6218 = vmatprep.mubr.msk.f32.mxu0 %vm6627_vm1, %v6626_v0 }
 0x44f   :  { %v1899_v18 = vmul.f32 %v6546_v60, %v7124_v10  ;;  %v2389_v49 = vpop.xlane.xlu1 %2388  ;;  %6226 = vmatprep.subr.mxu0 %v6626_v0 }
 0x450   :  { %6551 = vrcp.f32 %v2389_v49 }
 0x451   :  { %6219 = vmatmul.mubr.msk.f32.vlgmr.msra.gmra.mrb[22].mxu0 %vm9_vm0, %v1899_v18  ;;  %v6615_v18 = vld [vmem:[%s7674_s0 + $0xc0] sm:$0x3f] }
 0x452   :  { %v6548_v59 = vpop.eup %6547  ;;  %6227 = vmatpush3.msk.msra.mxu0 %vm99_vm3, %v6603_v23  ;;  %6228 = vmatprep.mubr.msk.f32.mxu0 %vm6627_vm1, %v6626_v0  ;;  %v6616_v23 = vld [vmem:[%s7674_s0 + $0xc8] sm:$0x3f] }
 0x453   :  { %v2063_v11 = vmul.f32 %v6548_v59, %v7129_v19  ;;  %v2553_v54 = vpop.xlane.xlu0 %2552  ;;  %6236 = vmatprep.subr.mxu0 %v6626_v0 }
 0x454   :  { %6553 = vrcp.f32 %v2553_v54 }
 0x455   :  { %6229 = vmatmul.mubr.msk.f32.vlgmr.msra.gmra.mrb[24].mxu0 %vm9_vm0, %v2063_v11 }
 0x456   :  { %v6550_v10 = vpop.eup %6549  ;;  %6237 = vmatpush3.msk.msra.mxu0 %vm99_vm3, %v6604_v26  ;;  %6238 = vmatprep.mubr.msk.f32.mxu0 %vm6627_vm1, %v6626_v0 }
 0x457   :  { %v2227_v56 = vmul.f32 %v6550_v10, %v7134_v30  ;;  %v2717_v31 = vpop.xlane.xlu1 %2716  ;;  %6246 = vmatprep.subr.mxu0 %v6626_v0  ;;  %v6617_v10 = vld [vmem:[%s7674_s0 + $0xd0] sm:$0x3f] }
 0x458   :  { %6555 = vrcp.f32 %v2717_v31  ;;  %v6618_v31 = vld [vmem:[%s7674_s0 + $0xd8] sm:$0x3f] }
 0x459   :  { %6239 = vmatmul.mubr.msk.f32.vlgmr.msra.gmra.mrb[26].mxu0 %vm9_vm0, %v2227_v56 }
 0x45a   :  { %v6552_v19 = vpop.eup %6551  ;;  %6247 = vmatpush3.msk.msra.mxu0 %vm99_vm3, %v6605_v61  ;;  %6248 = vmatprep.mubr.msk.f32.mxu0 %vm6627_vm1, %v6626_v0 }
 0x45b   :  { %v2391_v17 = vmul.f32 %v6552_v19, %v7139_v37  ;;  %v2881_v35 = vpop.xlane.xlu0 %2880  ;;  %6256 = vmatprep.subr.mxu0 %v6626_v0 }
 0x45c   :  { %6557 = vrcp.f32 %v2881_v35 }
 0x45d   :  { %6249 = vmatmul.mubr.msk.f32.vlgmr.msra.gmra.mrb[28].mxu0 %vm9_vm0, %v2391_v17  ;;  %v6619_v17 = vld [vmem:[%s7674_s0 + $0xe0] sm:$0x3f] }
 0x45e   :  { %v6554_v30 = vpop.eup %6553  ;;  %6257 = vmatpush3.msk.msra.mxu0 %vm99_vm3, %v6606_v62  ;;  %6258 = vmatprep.mubr.msk.f32.mxu0 %vm6627_vm1, %v6626_v0  ;;  %v6620_v62 = vld [vmem:[%s7674_s0 + $0xe8] sm:$0x3f] }
 0x45f   :  { %v2555_v5 = vmul.f32 %v6554_v30, %v7144_v45  ;;  %v3045_v39 = vpop.xlane.xlu1 %3044  ;;  %6266 = vmatprep.subr.mxu0 %v6626_v0 }
 0x460   :  { %6559 = vrcp.f32 %v3045_v39 }
 0x461   :  { %6259 = vmatmul.mubr.msk.f32.vlgmr.msra.gmra.mrb[30].mxu0 %vm9_vm0, %v2555_v5 }
 0x462   :  { %v6556_v37 = vpop.eup %6555  ;;  %6267 = vmatpush3.msk.msra.mxu0 %vm99_vm3, %v6607_v22  ;;  %6268 = vmatprep.mubr.msk.f32.mxu0 %vm6627_vm1, %v6626_v0 }
 0x463   :  { %v2719_v42 = vmul.f32 %v6556_v37, %v7149_v52  ;;  %v3209_v15 = vpop.xlane.xlu0 %3208  ;;  %6276 = vmatprep.subr.mxu0 %v6626_v0  ;;  %v6621_v37 = vld [vmem:[%s7674_s0 + $0xf0] sm:$0x3f] }
 0x464   :  { %6561 = vrcp.f32 %v3209_v15  ;;  %v6622_v15 = vld [vmem:[%s7674_s0 + $0xf8] sm:$0x3f] }
 0x465   :  { %6269 = vmatmul.mubr.msk.f32.vlgmr.msra.gmra.mrb[32].mxu0 %vm9_vm0, %v2719_v42 }
 0x466   :  { %v6558_v45 = vpop.eup %6557  ;;  %6277 = vmatpush3.msk.msra.mxu0 %vm99_vm3, %v6608_v7  ;;  %6278 = vmatprep.mubr.msk.f32.mxu0 %vm6627_vm1, %v6626_v0 }
 0x467   :  { %v2883_v46 = vmul.f32 %v6558_v45, %v7154_v55  ;;  %v3373_v27 = vpop.xlane.xlu1 %3372  ;;  %6286 = vmatprep.subr.mxu0 %v6626_v0 }
 0x468   :  { %6563 = vrcp.f32 %v3373_v27 }
 0x469   :  { %6279 = vmatmul.mubr.msk.f32.vlgmr.msra.gmra.mrb[34].mxu0 %vm9_vm0, %v2883_v46  ;;  %v6623_v46 = vld [vmem:[%s7674_s0 + $0x100] sm:$0x3f] }
 0x46a   :  { %v6560_v52 = vpop.eup %6559  ;;  %6287 = vmatpush3.msk.msra.mxu0 %vm99_vm3, %v6609_v25  ;;  %6288 = vmatprep.mubr.msk.f32.mxu0 %vm6627_vm1, %v6626_v0 }
 0x46b   :  { %v3047_v50 = vmul.f32 %v6560_v52, %v7159_v63  ;;  %v3537_v14 = vpop.xlane.xlu0 %3536  ;;  %6296 = vmatprep.subr.mxu0 %v6626_v0  ;;  %v6624_v52 = vld [vmem:[%s7674_s0 + $0x108] sm:$0x3f] }
 0x46c   :  { %6565 = vrcp.f32 %v3537_v14 }
 0x46d   :  { %6289 = vmatmul.mubr.msk.f32.vlgmr.msra.gmra.mrb[36].mxu0 %vm9_vm0, %v3047_v50  ;;  %v6625_v50 = vld [vmem:[%s7674_s0 + $0x110] sm:$0x3f] }
 0x46e   :  { %v6562_v55 = vpop.eup %6561  ;;  %6297 = vmatpush3.msk.msra.mxu0 %vm99_vm3, %v6610_v57  ;;  %6298 = vmatprep.mubr.msk.f32.mxu0 %vm6627_vm1, %v6626_v0 }
 0x46f   :  { %v3211_v34 = vmul.f32 %v6562_v55, %v7164_v4  ;;  %v3701_v33 = vpop.xlane.xlu1 %3700  ;;  %6306 = vmatprep.subr.mxu0 %v6626_v0 }
 0x470   :  { %6567 = vrcp.f32 %v3701_v33 }
 0x471   :  { %6299 = vmatmul.mubr.msk.f32.vlgmr.msra.gmra.mrb[38].mxu0 %vm9_vm0, %v3211_v34 }
 0x472   :  { %v6564_v63 = vpop.eup %6563  ;;  %6307 = vmatpush3.msk.msra.mxu0 %vm99_vm3, %v6611_v51  ;;  %6308 = vmatprep.mubr.msk.f32.mxu0 %vm6627_vm1, %v6626_v0 }
 0x473   :  { %v3375_v29 = vmul.f32 %v6564_v63, %v7169_v8  ;;  %v3865_v41 = vpop.xlane.xlu0 %3864  ;;  %6316 = vmatprep.subr.mxu0 %v6626_v0 }
 0x474   :  { %6569 = vrcp.f32 %v3865_v41 }
 0x475   :  { %6309 = vmatmul.mubr.msk.f32.vlgmr.msra.gmra.mrb[40].mxu0 %vm9_vm0, %v3375_v29 }
 0x476   :  { %v6566_v4 = vpop.eup %6565  ;;  %6317 = vmatpush3.msk.msra.mxu0 %vm99_vm3, %v6612_v38  ;;  %6318 = vmatprep.mubr.msk.f32.mxu0 %vm6627_vm1, %v6626_v0 }
 0x477   :  { %v3539_v3 = vmul.f32 %v6566_v4, %v7174_v12  ;;  %v4029_v1 = vpop.xlane.xlu1 %4028  ;;  %6326 = vmatprep.subr.mxu0 %v6626_v0 }
 0x478   :  { %6571 = vrcp.f32 %v4029_v1 }
 0x479   :  { %6319 = vmatmul.mubr.msk.f32.vlgmr.msra.gmra.mrb[42].mxu0 %vm9_vm0, %v3539_v3 }
 0x47a   :  { %v6568_v8 = vpop.eup %6567  ;;  %6327 = vmatpush3.msk.msra.mxu0 %vm99_vm3, %v6613_v47  ;;  %6328 = vmatprep.mubr.msk.f32.mxu0 %vm6627_vm1, %v6626_v0 }
 0x47b   :  { %v3703_v9 = vmul.f32 %v6568_v8, %v7179_v16  ;;  %v4193_v43 = vpop.xlane.xlu0 %4192  ;;  %6336 = vmatprep.subr.mxu0 %v6626_v0 }
 0x47c   :  { %6573 = vrcp.f32 %v4193_v43 }
 0x47d   :  { %6329 = vmatmul.mubr.msk.f32.vlgmr.msra.gmra.mrb[44].mxu0 %vm9_vm0, %v3703_v9 }
 0x47e   :  { %v6570_v12 = vpop.eup %6569  ;;  %6337 = vmatpush3.msk.msra.mxu0 %vm99_vm3, %v6614_v13  ;;  %6338 = vmatprep.mubr.msk.f32.mxu0 %vm6627_vm1, %v6626_v0 }
 0x47f   :  { %v3867_v60 = vmul.f32 %v6570_v12, %v7184_v20  ;;  %v4357_v6 = vpop.xlane.xlu1 %4356  ;;  %6346 = vmatprep.subr.mxu0 %v6626_v0 }
 0x480   :  { %6575 = vrcp.f32 %v4357_v6 }
 0x481   :  { %6339 = vmatmul.mubr.msk.f32.vlgmr.msra.gmra.mrb[46].mxu0 %vm9_vm0, %v3867_v60 }
 0x482   :  { %v6572_v16 = vpop.eup %6571  ;;  %6347 = vmatpush3.msk.msra.mxu0 %vm99_vm3, %v6615_v18  ;;  %6348 = vmatprep.mubr.msk.f32.mxu0 %vm6627_vm1, %v6626_v0 }
 0x483   :  { %v4031_v49 = vmul.f32 %v6572_v16, %v7189_v24  ;;  %v4521_v59 = vpop.xlane.xlu0 %4520  ;;  %6356 = vmatprep.subr.mxu0 %v6626_v0 }
 0x484   :  { %6577 = vrcp.f32 %v4521_v59 }
 0x485   :  { %6349 = vmatmul.mubr.msk.f32.vlgmr.msra.gmra.mrb[48].mxu0 %vm9_vm0, %v4031_v49 }
 0x486   :  { %v6574_v20 = vpop.eup %6573  ;;  %6357 = vmatpush3.msk.msra.mxu0 %vm99_vm3, %v6616_v23  ;;  %6358 = vmatprep.mubr.msk.f32.mxu0 %vm6627_vm1, %v6626_v0 }
 0x487   :  { %v4195_v11 = vmul.f32 %v6574_v20, %v7194_v28  ;;  %v4685_v54 = vpop.xlane.xlu1 %4684  ;;  %6366 = vmatprep.subr.mxu0 %v6626_v0 }
 0x488   :  { %6579 = vrcp.f32 %v4685_v54 }
 0x489   :  { %6359 = vmatmul.mubr.msk.f32.vlgmr.msra.gmra.mrb[50].mxu0 %vm9_vm0, %v4195_v11 }
 0x48a   :  { %v6576_v24 = vpop.eup %6575  ;;  %6367 = vmatpush3.msk.msra.mxu0 %vm99_vm3, %v6617_v10  ;;  %6368 = vmatprep.mubr.msk.f32.mxu0 %vm6627_vm1, %v6626_v0 }
 0x48b   :  { %v4359_v26 = vmul.f32 %v6576_v24, %v7199_v32  ;;  %v4849_v56 = vpop.xlane.xlu0 %4848  ;;  %6376 = vmatprep.subr.mxu0 %v6626_v0 }
 0x48c   :  { %6581 = vrcp.f32 %v4849_v56 }
 0x48d   :  { %6369 = vmatmul.mubr.msk.f32.vlgmr.msra.gmra.mrb[52].mxu0 %vm9_vm0, %v4359_v26 }
 0x48e   :  { %v6578_v28 = vpop.eup %6577  ;;  %6377 = vmatpush3.msk.msra.mxu0 %vm99_vm3, %v6618_v31  ;;  %6378 = vmatprep.mubr.msk.f32.mxu0 %vm6627_vm1, %v6626_v0 }
 0x48f   :  { %v4523_v19 = vmul.f32 %v6578_v28, %v7204_v36  ;;  %v5013_v61 = vpop.xlane.xlu1 %5012  ;;  %6386 = vmatprep.subr.mxu0 %v6626_v0 }
 0x490   :  { %6583 = vrcp.f32 %v5013_v61 }
 0x491   :  { %6379 = vmatmul.mubr.msk.f32.vlgmr.msra.gmra.mrb[54].mxu0 %vm9_vm0, %v4523_v19 }
 0x492   :  { %v6580_v32 = vpop.eup %6579  ;;  %6387 = vmatpush3.msk.msra.mxu0 %vm99_vm3, %v6619_v17  ;;  %6388 = vmatprep.mubr.msk.f32.mxu0 %vm6627_vm1, %v6626_v0 }
 0x493   :  { %v4687_v35 = vmul.f32 %v6580_v32, %v7209_v40  ;;  %v5177_v30 = vpop.xlane.xlu0 %5176  ;;  %6396 = vmatprep.subr.mxu0 %v6626_v0 }
 0x494   :  { %6585 = vrcp.f32 %v5177_v30 }
 0x495   :  { %6389 = vmatmul.mubr.msk.f32.vlgmr.msra.gmra.mrb[56].mxu0 %vm9_vm0, %v4687_v35 }
 0x496   :  { %v6582_v36 = vpop.eup %6581  ;;  %6397 = vmatpush3.msk.msra.mxu0 %vm99_vm3, %v6620_v62  ;;  %6398 = vmatprep.mubr.msk.f32.mxu0 %vm6627_vm1, %v6626_v0 }
 0x497   :  { %v4851_v5 = vmul.f32 %v6582_v36, %v7214_v44  ;;  %v5341_v39 = vpop.xlane.xlu1 %5340  ;;  %6406 = vmatprep.subr.mxu0 %v6626_v0 }
 0x498   :  { %6587 = vrcp.f32 %v5341_v39 }
 0x499   :  { %6399 = vmatmul.mubr.msk.f32.vlgmr.msra.gmra.mrb[58].mxu0 %vm9_vm0, %v4851_v5 }
 0x49a   :  { %v6584_v40 = vpop.eup %6583  ;;  %6407 = vmatpush3.msk.msra.mxu0 %vm99_vm3, %v6621_v37  ;;  %6408 = vmatprep.mubr.msk.f32.mxu0 %vm6627_vm1, %v6626_v0 }
 0x49b   :  { %v5015_v22 = vmul.f32 %v6584_v40, %v7219_v48  ;;  %v5505_v42 = vpop.xlane.xlu0 %5504  ;;  %6416 = vmatprep.subr.mxu0 %v6626_v0 }
 0x49c   :  { %6589 = vrcp.f32 %v5505_v42 }
 0x49d   :  { %6409 = vmatmul.mubr.msk.f32.vlgmr.msra.gmra.mrb[60].mxu0 %vm9_vm0, %v5015_v22 }
 0x49e   :  { %v6586_v44 = vpop.eup %6585  ;;  %6417 = vmatpush3.msk.msra.mxu0 %vm99_vm3, %v6622_v15  ;;  %6418 = vmatprep.mubr.msk.f32.mxu0 %vm6627_vm1, %v6626_v0 }
 0x49f   :  { %v5179_v45 = vmul.f32 %v6586_v44, %v7224_v53  ;;  %v5669_v7 = vpop.xlane.xlu1 %5668  ;;  %6426 = vmatprep.subr.mxu0 %v6626_v0 }
 0x4a0   :  { %6591 = vrcp.f32 %v5669_v7 }
 0x4a1   :  { %6419 = vmatmul.mubr.msk.f32.vlgmr.msra.gmra.mrb[62].mxu0 %vm9_vm0, %v5179_v45 }
 0x4a2   :  { %v6588_v48 = vpop.eup %6587  ;;  %6427 = vmatpush3.msk.msra.mxu0 %vm99_vm3, %v6623_v46  ;;  %6428 = vmatprep.mubr.msk.f32.mxu0 %vm6627_vm1, %v6626_v0 }
 0x4a3   :  { %v5343_v27 = vmul.f32 %v6588_v48, %v7228_v21  ;;  %6436 = vmatprep.subr.mxu0 %v6626_v0 }
 0x4a5   :  { %6429 = vmatmul.mubr.msk.f32.vlgmr.msra.gmra.mrb[64].mxu0 %vm9_vm0, %v5343_v27 }
 0x4a6   :  { %v6590_v53 = vpop.eup %6589  ;;  %6437 = vmatpush3.msk.msra.mxu0 %vm99_vm3, %v6624_v52  ;;  %6438 = vmatprep.mubr.msk.f32.mxu0 %vm6627_vm1, %v6626_v0 }
 0x4a7   :  { %v5507_v25 = vmul.f32 %v6590_v53, %v7232_v58  ;;  %6446 = vmatprep.subr.mxu0 %v6626_v0 }
 0x4a9   :  { %6439 = vmatmul.mubr.msk.f32.vlgmr.msra.gmra.mrb[66].mxu0 %vm9_vm0, %v5507_v25 }
 0x4aa   :  { %v6592_v21 = vpop.eup %6591  ;;  %6447 = vmatpush3.msk.msra.mxu0 %vm99_vm3, %v6625_v50  ;;  %6448 = vmatprep.mubr.msk.f32.mxu0 %vm6627_vm1, %v6626_v0 }
 0x4ab   :  { %v5671_v14 = vmul.f32 %v6592_v21, %v7236_v2 }
 0x4ad   :  { %6449 = vmatmul.mubr.msk.f32.vlgmr.msra.gmra.mrb[68].mxu0 %vm9_vm0, %v5671_v14 }
 0x4fc   :  { %v331_v55 = vpop.f32.mrb[2].mxu0 }
 0x4fd   :  { %5762 = vst.msk [vmem:[%s7675_s1 + $0x8] sm:$0x3f] %vm84_vm2, %v331_v55  ;;  %v6120_v58 = vpop.f32.mrb[3].mxu0 }
 0x500   :  { %v495_v57 = vpop.f32.mrb[4].mxu0 }
 0x501   :  { %5768 = vst.msk [vmem:[%s7675_s1 + $0x10] sm:$0x3f] %vm84_vm2, %v495_v57  ;;  %v6130_v34 = vpop.f32.mrb[5].mxu0 }
 0x504   :  { %v659_v33 = vpop.f32.mrb[6].mxu0 }
 0x505   :  { %5774 = vst.msk [vmem:[%s7675_s1 + $0x18] sm:$0x3f] %vm84_vm2, %v659_v33  ;;  %v6140_v0 = vpop.f32.mrb[7].mxu0 }
 0x508   :  { %v823_v2 = vpop.f32.mrb[8].mxu0 }
 0x509   :  { %5780 = vst.msk [vmem:[%s7675_s1 + $0x20] sm:$0x3f] %vm84_vm2, %v823_v2  ;;  %v6150_v63 = vpop.f32.mrb[9].mxu0 }
 0x50c   :  { %v987_v51 = vpop.f32.mrb[10].mxu0 }
 0x50d   :  { %5786 = vst.msk [vmem:[%s7675_s1 + $0x28] sm:$0x3f] %vm84_vm2, %v987_v51  ;;  %v6160_v29 = vpop.f32.mrb[11].mxu0 }
 0x510   :  { %v1151_v41 = vpop.f32.mrb[12].mxu0 }
 0x511   :  { %5792 = vst.msk [vmem:[%s7675_s1 + $0x30] sm:$0x3f] %vm84_vm2, %v1151_v41  ;;  %v6170_v4 = vpop.f32.mrb[13].mxu0 }
 0x514   :  { %v1315_v38 = vpop.f32.mrb[14].mxu0 }
 0x515   :  { %5798 = vst.msk [vmem:[%s7675_s1 + $0x38] sm:$0x3f] %vm84_vm2, %v1315_v38  ;;  %v6180_v3 = vpop.f32.mrb[15].mxu0 }
 0x518   :  { %v1479_v1 = vpop.f32.mrb[16].mxu0 }
 0x519   :  { %5804 = vst.msk [vmem:[%s7675_s1 + $0x40] sm:$0x3f] %vm84_vm2, %v1479_v1  ;;  %v6190_v8 = vpop.f32.mrb[17].mxu0 }
 0x51c   :  { %v1643_v47 = vpop.f32.mrb[18].mxu0 }
 0x51d   :  { %5810 = vst.msk [vmem:[%s7675_s1 + $0x48] sm:$0x3f] %vm84_vm2, %v1643_v47  ;;  %v6200_v9 = vpop.f32.mrb[19].mxu0 }
 0x520   :  { %v1807_v43 = vpop.f32.mrb[20].mxu0 }
 0x521   :  { %5816 = vst.msk [vmem:[%s7675_s1 + $0x50] sm:$0x3f] %vm84_vm2, %v1807_v43  ;;  %v6210_v12 = vpop.f32.mrb[21].mxu0 }
 0x524   :  { %v1971_v13 = vpop.f32.mrb[22].mxu0 }
 0x525   :  { %5822 = vst.msk [vmem:[%s7675_s1 + $0x58] sm:$0x3f] %vm84_vm2, %v1971_v13  ;;  %v6220_v60 = vpop.f32.mrb[23].mxu0 }
 0x528   :  { %v2135_v6 = vpop.f32.mrb[24].mxu0 }
 0x529   :  { %5828 = vst.msk [vmem:[%s7675_s1 + $0x60] sm:$0x3f] %vm84_vm2, %v2135_v6  ;;  %v6230_v16 = vpop.f32.mrb[25].mxu0 }
 0x52c   :  { %v2299_v18 = vpop.f32.mrb[26].mxu0 }
 0x52d   :  { %5834 = vst.msk [vmem:[%s7675_s1 + $0x68] sm:$0x3f] %vm84_vm2, %v2299_v18  ;;  %v6240_v49 = vpop.f32.mrb[27].mxu0 }
 0x530   :  { %v2463_v59 = vpop.f32.mrb[28].mxu0 }
 0x531   :  { %5840 = vst.msk [vmem:[%s7675_s1 + $0x70] sm:$0x3f] %vm84_vm2, %v2463_v59  ;;  %v6250_v20 = vpop.f32.mrb[29].mxu0 }
 0x534   :  { %v2627_v23 = vpop.f32.mrb[30].mxu0 }
 0x535   :  { %5846 = vst.msk [vmem:[%s7675_s1 + $0x78] sm:$0x3f] %vm84_vm2, %v2627_v23  ;;  %v6260_v11 = vpop.f32.mrb[31].mxu0 }
 0x538   :  { %v2791_v54 = vpop.f32.mrb[32].mxu0 }
 0x539   :  { %5852 = vst.msk [vmem:[%s7675_s1 + $0x80] sm:$0x3f] %vm84_vm2, %v2791_v54  ;;  %v6270_v24 = vpop.f32.mrb[33].mxu0 }
 0x53c   :  { %v2955_v10 = vpop.f32.mrb[34].mxu0 }
 0x53d   :  { %5858 = vst.msk [vmem:[%s7675_s1 + $0x88] sm:$0x3f] %vm84_vm2, %v2955_v10  ;;  %v6280_v26 = vpop.f32.mrb[35].mxu0 }
 0x540   :  { %v3119_v56 = vpop.f32.mrb[36].mxu0 }
 0x541   :  { %5864 = vst.msk [vmem:[%s7675_s1 + $0x90] sm:$0x3f] %vm84_vm2, %v3119_v56  ;;  %v6290_v28 = vpop.f32.mrb[37].mxu0 }
 0x544   :  { %v3283_v31 = vpop.f32.mrb[38].mxu0 }
 0x545   :  { %5870 = vst.msk [vmem:[%s7675_s1 + $0x98] sm:$0x3f] %vm84_vm2, %v3283_v31  ;;  %v6300_v19 = vpop.f32.mrb[39].mxu0 }
 0x548   :  { %v3447_v61 = vpop.f32.mrb[40].mxu0 }
 0x549   :  { %5876 = vst.msk [vmem:[%s7675_s1 + $0xa0] sm:$0x3f] %vm84_vm2, %v3447_v61  ;;  %v6310_v32 = vpop.f32.mrb[41].mxu0 }
 0x54c   :  { %v3611_v17 = vpop.f32.mrb[42].mxu0 }
 0x54d   :  { %5882 = vst.msk [vmem:[%s7675_s1 + $0xa8] sm:$0x3f] %vm84_vm2, %v3611_v17  ;;  %v6320_v35 = vpop.f32.mrb[43].mxu0 }
 0x550   :  { %v3775_v30 = vpop.f32.mrb[44].mxu0 }
 0x551   :  { %5888 = vst.msk [vmem:[%s7675_s1 + $0xb0] sm:$0x3f] %vm84_vm2, %v3775_v30  ;;  %v6330_v36 = vpop.f32.mrb[45].mxu0 }
 0x554   :  { %v3939_v62 = vpop.f32.mrb[46].mxu0 }
 0x555   :  { %5894 = vst.msk [vmem:[%s7675_s1 + $0xb8] sm:$0x3f] %vm84_vm2, %v3939_v62  ;;  %v6340_v5 = vpop.f32.mrb[47].mxu0 }
 0x558   :  { %v4103_v39 = vpop.f32.mrb[48].mxu0 }
 0x559   :  { %5900 = vst.msk [vmem:[%s7675_s1 + $0xc0] sm:$0x3f] %vm84_vm2, %v4103_v39  ;;  %v6350_v40 = vpop.f32.mrb[49].mxu0 }
 0x55c   :  { %v4267_v37 = vpop.f32.mrb[50].mxu0 }
 0x55d   :  { %5906 = vst.msk [vmem:[%s7675_s1 + $0xc8] sm:$0x3f] %vm84_vm2, %v4267_v37  ;;  %v6360_v22 = vpop.f32.mrb[51].mxu0 }
 0x560   :  { %v4431_v42 = vpop.f32.mrb[52].mxu0 }
 0x561   :  { %5912 = vst.msk [vmem:[%s7675_s1 + $0xd0] sm:$0x3f] %vm84_vm2, %v4431_v42  ;;  %v6370_v44 = vpop.f32.mrb[53].mxu0 }
 0x564   :  { %v4595_v15 = vpop.f32.mrb[54].mxu0 }
 0x565   :  { %5918 = vst.msk [vmem:[%s7675_s1 + $0xd8] sm:$0x3f] %vm84_vm2, %v4595_v15  ;;  %v6380_v45 = vpop.f32.mrb[55].mxu0 }
 0x568   :  { %v4759_v7 = vpop.f32.mrb[56].mxu0 }
 0x569   :  { %5924 = vst.msk [vmem:[%s7675_s1 + $0xe0] sm:$0x3f] %vm84_vm2, %v4759_v7  ;;  %v6390_v48 = vpop.f32.mrb[57].mxu0 }
 0x56c   :  { %v4923_v46 = vpop.f32.mrb[58].mxu0 }
 0x56d   :  { %5930 = vst.msk [vmem:[%s7675_s1 + $0xe8] sm:$0x3f] %vm84_vm2, %v4923_v46  ;;  %v6400_v27 = vpop.f32.mrb[59].mxu0 }
 0x570   :  { %v5087_v53 = vpop.f32.mrb[60].mxu0 }
 0x571   :  { %5936 = vst.msk [vmem:[%s7675_s1 + $0xf0] sm:$0x3f] %vm84_vm2, %v5087_v53  ;;  %v6410_v52 = vpop.f32.mrb[61].mxu0 }
 0x574   :  { %v5251_v25 = vpop.f32.mrb[62].mxu0 }
 0x575   :  { %5942 = vst.msk [vmem:[%s7675_s1 + $0xf8] sm:$0x3f] %vm84_vm2, %v5251_v25  ;;  %v6420_v21 = vpop.f32.mrb[63].mxu0 }
 0x578   :  { %v5415_v50 = vpop.f32.mrb[64].mxu0 }
 0x579   :  { %5948 = vst.msk [vmem:[%s7675_s1 + $0x100] sm:$0x3f] %vm84_vm2, %v5415_v50  ;;  %v6430_v14 = vpop.f32.mrb[65].mxu0 }
 0x57c   :  { %v5579_v55 = vpop.f32.mrb[66].mxu0 }
 0x57d   :  { %5954 = vst.msk [vmem:[%s7675_s1 + $0x108] sm:$0x3f] %vm84_vm2, %v5579_v55  ;;  %v6440_v58 = vpop.f32.mrb[67].mxu0 }
 0x580   :  { %v5743_v57 = vpop.f32.mrb[68].mxu0 }
 0x581   :  { %5960 = vst.msk [vmem:[%s7675_s1 + $0x110] sm:$0x3f] %vm84_vm2, %v5743_v57  ;;  %v6450_v34 = vpop.f32.mrb[69].mxu0 }

</bundles_post_ra>
